<compile_context>
chip_gen: v6e
topology: v6e:2x2x1
jax: 0.10.0
libtpu: 0.0.40
codegen_flags: <defaults>
</compile_context>

<pallas_src>
from functools import partial

import jax
import jax.numpy as jnp
from jax import lax
from jax.experimental import pallas as pl
from jax.experimental.pallas import tpu as pltpu

HIDDEN = 16  # hidden_size fixed by the PyTorch module


def gru_model_kernel(xc_ref, h0_ref, w1_ref, wslab_ref, bslab_ref, out_ref,
                     gx_ref, hs_ref):
    # xc_ref:    (S*B, D)     time-major flattened concat([x, w, g]) (f32)
    # h0_ref:    (B, H)       initial hidden state (f32)
    # w1_ref:    (D, H)       fc1 weight (bf16)
    # wslab_ref: (H, 7H+OUT)  [Wf=W2@Wih | Whr | Whz | Whn | W3 | W4] (bf16)
    # bslab_ref: (1, 6H+OUT)  [b1 | bF(r,z,n fused) | bhn | b3 | b4] (f32)
    # out_ref:   (L*B, OUT)   outputs, row k*B+b = (pass k, batch b) (f32)
    # gx_ref:    (S*B, 3H)    scratch: precomputed GRU input projection
    # hs_ref:    (L*B, H)     scratch: h snapshot after each of the L passes
    SB = xc_ref.shape[0]
    B, H = h0_ref.shape
    S = SB // B
    LB, OUT = out_ref.shape
    L = LB // B

    def bdot(a, b):
        # Single-pass bf16 MXU dot with f32 accumulation (b is already bf16).
        return jnp.dot(a.astype(jnp.bfloat16), b,
                       preferred_element_type=jnp.float32)

    # ---- biases (f32) -------------------------------------------------------
    b1  = bslab_ref[:, 0:H]
    bF  = bslab_ref[:, H:4 * H]          # (b2@Wih + bih), with bhh_{r,z} folded in
    bhn = bslab_ref[:, 4 * H:5 * H]      # bhh_n stays inside the r*(.) term
    b3  = bslab_ref[:, 5 * H:6 * H]
    b4  = bslab_ref[:, 6 * H:6 * H + OUT]

    # ---- batched input projection (off the serial chain) -------------------
    # Z = relu(fc1(xc)) for every (t, b) at once; GX = Z @ (W2@Wih) + fused bias.
    z = jnp.maximum(bdot(xc_ref[...], w1_ref[...]) + b1, 0.0)          # (S*B, H)
    gx_ref[...] = bdot(z, wslab_ref[:, 0:3 * H]) + bF                  # (S*B, 3H)

    # Recurrence weights: the only values pinned across the unrolled chain.
    whr = wslab_ref[:, 3 * H:4 * H]
    whz = wslab_ref[:, 4 * H:5 * H]
    whn = wslab_ref[:, 5 * H:6 * H]

    # ---- serial recurrence: L passes over the sequence, h carried ----------
    # Fully unrolled (L, S, B are compile-time constants) so the scheduler can
    # overlap MXU latency with the EUP/VPU gate math of adjacent steps.
    h = h0_ref[...]
    for k in range(L):
        for t in range(S):
            gx = gx_ref[pl.ds(t * B, B), :]                            # (B, 3H)
            hb = h.astype(jnp.bfloat16)
            r  = jax.nn.sigmoid(
                gx[:, 0:H] + jnp.dot(hb, whr, preferred_element_type=jnp.float32))
            zg = jax.nn.sigmoid(
                gx[:, H:2 * H] + jnp.dot(hb, whz, preferred_element_type=jnp.float32))
            n  = jnp.tanh(
                gx[:, 2 * H:3 * H]
                + r * (jnp.dot(hb, whn, preferred_element_type=jnp.float32) + bhn))
            h = n + zg * (h - n)                                       # (1-z)*n + z*h
        hs_ref[pl.ds(k * B, B), :] = h                                 # snapshot pass k

    # ---- epilogue: fc3 -> relu -> fc4 for all L snapshots at once ----------
    y = jnp.maximum(bdot(hs_ref[...], wslab_ref[:, 6 * H:7 * H]) + b3, 0.0)
    out_ref[...] = bdot(y, wslab_ref[:, 7 * H:7 * H + OUT]) + b4       # (L*B, OUT)


def fuse_params(params):
    """One-time constant folding of the module parameters into packed slabs."""
    H = HIDDEN
    wf = params['w2'] @ params['wih']                      # fc2 fused into W_ih: (H, 3H)
    bf = params['b2'] @ params['wih'] + params['bih']      # (1, 3H)
    bhh = params['bhh']
    # Fold bhh_{r,z} into the precomputed biases; bhh_n must stay inside r*(.).
    bF = jnp.concatenate([bf[:, :2 * H] + bhh[:, :2 * H], bf[:, 2 * H:]], axis=1)
    whh = params['whh']
    wslab = jnp.concatenate(
        [wf, whh[:, :H], whh[:, H:2 * H], whh[:, 2 * H:], params['w3'], params['w4']],
        axis=1).astype(jnp.bfloat16)                       # (H, 7H+OUT) = (16, 120)
    bslab = jnp.concatenate(
        [params['b1'], bF, bhh[:, 2 * H:], params['b3'], params['b4']],
        axis=1)                                            # (1, 6H+OUT) = (1, 104)
    return {'w1': params['w1'].astype(jnp.bfloat16),       # (D, H)
            'wslab': wslab, 'bslab': bslab}


@partial(jax.jit, static_argnames=('output_len',))
def gru_model_forward(fused, x, w, g, h0, output_len):
    """Batch-first forward matching GRUModel.forward (use_condition=True)."""
    B, S, _ = x.shape
    H = HIDDEN
    L = output_len
    OUT = fused['wslab'].shape[1] - 7 * H

    # Condition broadcast + concat (tiny, fused under this jit).
    w_e = jnp.broadcast_to(w[:, None, :], (B, S, w.shape[1]))
    g_e = jnp.broadcast_to(g[:, None, :], (B, S, g.shape[1]))
    xc = jnp.concatenate([x, w_e, g_e], axis=-1)               # (B, S, D)
    xc = jnp.transpose(xc, (1, 0, 2)).reshape(S * B, -1)       # time-major flat

    vmem = pl.BlockSpec(memory_space=pltpu.MemorySpace.VMEM)
    y_flat = pl.pallas_call(
        gru_model_kernel,
        out_shape=jax.ShapeDtypeStruct((L * B, OUT), jnp.float32),
        in_specs=[vmem] * 5,
        out_specs=vmem,
        scratch_shapes=[pltpu.VMEM((S * B, 3 * H), jnp.float32),   # gx
                        pltpu.VMEM((L * B, H), jnp.float32)],      # h snapshots
    )(xc, h0, fused['w1'], fused['wslab'], fused['bslab'])
    return jnp.transpose(y_flat.reshape(L, B, OUT), (1, 0, 2))     # (B, L, OUT)


def reference_forward(params, x, w, g, h0, output_len):
    """Pure-JAX reference reproducing the PyTorch forward exactly (unfused, f32)."""
    B, S, _ = x.shape
    H = HIDDEN
    w_e = jnp.broadcast_to(w[:, None, :], (B, S, w.shape[1]))
    g_e = jnp.broadcast_to(g[:, None, :], (B, S, g.shape[1]))
    xc = jnp.concatenate([x, w_e, g_e], axis=-1)
    enc = jnp.maximum(xc @ params['w1'] + params['b1'], 0.0) @ params['w2'] + params['b2']

    def cell(h, xt):
        gx = xt @ params['wih'] + params['bih']
        gh = h @ params['whh'] + params['bhh']
        r = jax.nn.sigmoid(gx[:, :H] + gh[:, :H])
        z = jax.nn.sigmoid(gx[:, H:2 * H] + gh[:, H:2 * H])
        n = jnp.tanh(gx[:, 2 * H:] + r * gh[:, 2 * H:])
        return (1.0 - z) * n + z * h, None

    h = h0
    outs = []
    for _ in range(output_len):
        h, _ = lax.scan(cell, h, jnp.transpose(enc, (1, 0, 2)))
        y = jnp.maximum(h @ params['w3'] + params['b3'], 0.0) @ params['w4'] + params['b4']
        outs.append(y)
    return jnp.stack(outs, axis=1)


def init_params(key, input_size, hidden, output_size):
    ks = jax.random.split(key, 13)
    u = lambda k, shape, fan: jax.random.uniform(
        k, shape, jnp.float32, -1.0 / jnp.sqrt(fan), 1.0 / jnp.sqrt(fan))
    return {
        'w1': u(ks[0], (input_size, hidden), input_size),
        'b1': u(ks[1], (1, hidden), input_size),
        'w2': u(ks[2], (hidden, hidden), hidden),
        'b2': u(ks[3], (1, hidden), hidden),
        # NOTE: gate order [r|z|n], layout (H, 3H). PyTorch stores weight_ih_l0 as
        # (3H, H); transpose before slicing if importing real checkpoints.
        'wih': u(ks[4], (hidden, 3 * hidden), hidden),
        'bih': u(ks[5], (1, 3 * hidden), hidden),
        'whh': u(ks[6], (hidden, 3 * hidden), hidden),
        'bhh': u(ks[7], (1, 3 * hidden), hidden),
        'w3': u(ks[8], (hidden, hidden), hidden),
        'b3': u(ks[9], (1, hidden), hidden),
        'w4': u(ks[10], (hidden, output_size), hidden),
        'b4': u(ks[11], (1, output_size), hidden),
    }


if __name__ == "__main__":
    # Small config consistent with the module (use_condition=True)
    B, S = 2, 8
    num_agent, n_dim, g_dim, w_dim = 2, 4, 3, 2
    TARGET_WINDOW = 5                      # output_len
    input_size = (n_dim + g_dim) * num_agent + w_dim * num_agent * (num_agent - 1)  # 18
    output_size = n_dim * num_agent                                                  # 8

    key = jax.random.PRNGKey(0)
    kx, kw, kg, kp = jax.random.split(key, 4)
    x = jax.random.normal(kx, (B, S, n_dim * num_agent), jnp.float32)
    w = jax.random.normal(kw, (B, w_dim * num_agent * (num_agent - 1)), jnp.float32)
    g = jax.random.normal(kg, (B, g_dim * num_agent), jnp.float32)
    h0 = jnp.zeros((B, HIDDEN), jnp.float32)               # h=None -> zeros, squeezed
    params = init_params(kp, input_size, HIDDEN, output_size)

    fused = fuse_params(params)                            # one-time constant folding
    y = gru_model_forward(fused, x, w, g, h0, TARGET_WINDOW)
    y = jax.block_until_ready(y)

    y_ref = jax.block_until_ready(reference_forward(params, x, w, g, h0, TARGET_WINDOW))
    assert y.shape == (B, TARGET_WINDOW, output_size), y.shape
    # Tolerance covers (a) single-pass bf16 MXU operand rounding (applied per the
    # perf review) accumulated over the 40-step recurrence vs the f32 reference and
    # (b) the benign reassociation from fusing fc2 into W_ih. Structural errors
    # (gate order, recurrence, bias placement) would exceed this by >10x.
    assert jnp.allclose(y, y_ref, rtol=5e-2, atol=5e-2), "mismatch vs reference"
    print("KERNEL_OK")
</pallas_src>

<mosaic_0001>
module attributes {stable_mosaic.version = 11 : i64} {
  func.func @gru_model_kernel(%arg0: memref<16x18xf32, #tpu.memory_space<vmem>>, %arg1: memref<2x16xf32, #tpu.memory_space<vmem>>, %arg2: memref<18x16xbf16, #tpu.memory_space<vmem>>, %arg3: memref<16x120xbf16, #tpu.memory_space<vmem>>, %arg4: memref<1x104xf32, #tpu.memory_space<vmem>>, %arg5: memref<10x8xf32, #tpu.memory_space<vmem>>, %arg6: memref<16x48xf32, #tpu.memory_space<vmem>>, %arg7: memref<10x16xf32, #tpu.memory_space<vmem>>) attributes {dimension_semantics = [], scalar_prefetch = 0 : i64, scratch_operands = 2 : i64, tpu.core_type = #tpu.core_type<tc>} {
    %c0 = arith.constant 0 : index
    %c0_0 = arith.constant 0 : index
    %0 = vector.load %arg4[%c0, %c0_0] : memref<1x104xf32, #tpu.memory_space<vmem>>, vector<1x16xf32>
    %c0_1 = arith.constant 0 : index
    %c16 = arith.constant 16 : index
    %1 = vector.load %arg4[%c0_1, %c16] : memref<1x104xf32, #tpu.memory_space<vmem>>, vector<1x48xf32>
    %c0_2 = arith.constant 0 : index
    %c64 = arith.constant 64 : index
    %2 = vector.load %arg4[%c0_2, %c64] : memref<1x104xf32, #tpu.memory_space<vmem>>, vector<1x16xf32>
    %c0_3 = arith.constant 0 : index
    %c80 = arith.constant 80 : index
    %3 = vector.load %arg4[%c0_3, %c80] : memref<1x104xf32, #tpu.memory_space<vmem>>, vector<1x16xf32>
    %c0_4 = arith.constant 0 : index
    %c96 = arith.constant 96 : index
    %4 = vector.load %arg4[%c0_4, %c96] : memref<1x104xf32, #tpu.memory_space<vmem>>, vector<1x8xf32>
    %c0_5 = arith.constant 0 : index
    %c0_6 = arith.constant 0 : index
    %5 = vector.load %arg0[%c0_5, %c0_6] : memref<16x18xf32, #tpu.memory_space<vmem>>, vector<16x18xf32>
    %c0_7 = arith.constant 0 : index
    %c0_8 = arith.constant 0 : index
    %6 = vector.load %arg2[%c0_7, %c0_8] : memref<18x16xbf16, #tpu.memory_space<vmem>>, vector<18x16xbf16>
    %7 = arith.truncf %5 : vector<16x18xf32> to vector<16x18xbf16>
    %cst = arith.constant dense<0.000000e+00> : vector<16x16xf32>
    %8 = tpu.matmul %7, %6, %cst {dimension_numbers = #tpu.dot_dimension_numbers<[1], [0], [0], [1], [0, 0, 1, 1], [], []>} : vector<16x18xbf16>, vector<18x16xbf16>, vector<16x16xf32> -> vector<16x16xf32>
    %9 = vector.broadcast %0 : vector<1x16xf32> to vector<16x16xf32>
    %10 = arith.addf %8, %9 : vector<16x16xf32>
    %cst_9 = arith.constant 0.000000e+00 : f32
    %11 = vector.broadcast %cst_9 : f32 to vector<16x16xf32>
    %12 = arith.maximumf %10, %11 : vector<16x16xf32>
    %c0_10 = arith.constant 0 : index
    %c0_11 = arith.constant 0 : index
    %13 = vector.load %arg3[%c0_10, %c0_11] : memref<16x120xbf16, #tpu.memory_space<vmem>>, vector<16x48xbf16>
    %14 = arith.truncf %12 : vector<16x16xf32> to vector<16x16xbf16>
    %cst_12 = arith.constant dense<0.000000e+00> : vector<16x48xf32>
    %15 = tpu.matmul %14, %13, %cst_12 {dimension_numbers = #tpu.dot_dimension_numbers<[1], [0], [0], [1], [0, 0, 1, 1], [], []>} : vector<16x16xbf16>, vector<16x48xbf16>, vector<16x48xf32> -> vector<16x48xf32>
    %16 = vector.broadcast %1 : vector<1x48xf32> to vector<16x48xf32>
    %17 = arith.addf %15, %16 : vector<16x48xf32>
    %c0_13 = arith.constant 0 : index
    %c0_14 = arith.constant 0 : index
    %18 = vector.load %arg6[%c0_13, %c0_14] : memref<16x48xf32, #tpu.memory_space<vmem>>, vector<16x48xf32>
    tpu.vector_store %arg6[%c0_13, %c0_14], %17 {strides = array<i32>} : memref<16x48xf32, #tpu.memory_space<vmem>>, vector<16x48xf32>,
    %c0_15 = arith.constant 0 : index
    %c48 = arith.constant 48 : index
    %19 = vector.load %arg3[%c0_15, %c48] : memref<16x120xbf16, #tpu.memory_space<vmem>>, vector<16x16xbf16>
    %c0_16 = arith.constant 0 : index
    %c64_17 = arith.constant 64 : index
    %20 = vector.load %arg3[%c0_16, %c64_17] : memref<16x120xbf16, #tpu.memory_space<vmem>>, vector<16x16xbf16>
    %c0_18 = arith.constant 0 : index
    %c80_19 = arith.constant 80 : index
    %21 = vector.load %arg3[%c0_18, %c80_19] : memref<16x120xbf16, #tpu.memory_space<vmem>>, vector<16x16xbf16>
    %c0_20 = arith.constant 0 : index
    %c0_21 = arith.constant 0 : index
    %22 = vector.load %arg1[%c0_20, %c0_21] : memref<2x16xf32, #tpu.memory_space<vmem>>, vector<2x16xf32>
    %c0_22 = arith.constant 0 : index
    %c0_23 = arith.constant 0 : index
    %23 = vector.load %arg6[%c0_22, %c0_23] : memref<16x48xf32, #tpu.memory_space<vmem>>, vector<2x48xf32>
    %24 = arith.truncf %22 : vector<2x16xf32> to vector<2x16xbf16>
    %25 = vector.extract_strided_slice %23 {offsets = [0, 0], sizes = [2, 16], strides = [1, 1]} : vector<2x48xf32> to vector<2x16xf32>
    %cst_24 = arith.constant dense<0.000000e+00> : vector<2x16xf32>
    %26 = tpu.matmul %24, %19, %cst_24 {dimension_numbers = #tpu.dot_dimension_numbers<[1], [0], [0], [1], [0, 0, 1, 1], [], []>} : vector<2x16xbf16>, vector<16x16xbf16>, vector<2x16xf32> -> vector<2x16xf32>
    %27 = arith.addf %25, %26 : vector<2x16xf32>
    %28 = arith.negf %27 : vector<2x16xf32>
    %29 = math.exp %28 : vector<2x16xf32>
    %cst_25 = arith.constant 1.000000e+00 : f32
    %30 = vector.broadcast %cst_25 : f32 to vector<2x16xf32>
    %31 = arith.addf %30, %29 : vector<2x16xf32>
    %32 = arith.divf %30, %31 : vector<2x16xf32>
    %33 = vector.extract_strided_slice %23 {offsets = [0, 16], sizes = [2, 16], strides = [1, 1]} : vector<2x48xf32> to vector<2x16xf32>
    %cst_26 = arith.constant dense<0.000000e+00> : vector<2x16xf32>
    %34 = tpu.matmul %24, %20, %cst_26 {dimension_numbers = #tpu.dot_dimension_numbers<[1], [0], [0], [1], [0, 0, 1, 1], [], []>} : vector<2x16xbf16>, vector<16x16xbf16>, vector<2x16xf32> -> vector<2x16xf32>
    %35 = arith.addf %33, %34 : vector<2x16xf32>
    %36 = arith.negf %35 : vector<2x16xf32>
    %37 = math.exp %36 : vector<2x16xf32>
    %cst_27 = arith.constant 1.000000e+00 : f32
    %38 = vector.broadcast %cst_27 : f32 to vector<2x16xf32>
    %39 = arith.addf %38, %37 : vector<2x16xf32>
    %40 = arith.divf %38, %39 : vector<2x16xf32>
    %41 = vector.extract_strided_slice %23 {offsets = [0, 32], sizes = [2, 16], strides = [1, 1]} : vector<2x48xf32> to vector<2x16xf32>
    %cst_28 = arith.constant dense<0.000000e+00> : vector<2x16xf32>
    %42 = tpu.matmul %24, %21, %cst_28 {dimension_numbers = #tpu.dot_dimension_numbers<[1], [0], [0], [1], [0, 0, 1, 1], [], []>} : vector<2x16xbf16>, vector<16x16xbf16>, vector<2x16xf32> -> vector<2x16xf32>
    %43 = vector.broadcast %2 : vector<1x16xf32> to vector<2x16xf32>
    %44 = arith.addf %42, %43 : vector<2x16xf32>
    %45 = arith.mulf %32, %44 : vector<2x16xf32>
    %46 = arith.addf %41, %45 : vector<2x16xf32>
    %47 = math.tanh %46 : vector<2x16xf32>
    %48 = arith.subf %22, %47 : vector<2x16xf32>
    %49 = arith.mulf %40, %48 : vector<2x16xf32>
    %50 = arith.addf %47, %49 : vector<2x16xf32>
    %c2 = arith.constant 2 : index
    %c0_29 = arith.constant 0 : index
    %51 = vector.load %arg6[%c2, %c0_29] : memref<16x48xf32, #tpu.memory_space<vmem>>, vector<2x48xf32>
    %52 = arith.truncf %50 : vector<2x16xf32> to vector<2x16xbf16>
    %53 = vector.extract_strided_slice %51 {offsets = [0, 0], sizes = [2, 16], strides = [1, 1]} : vector<2x48xf32> to vector<2x16xf32>
    %cst_30 = arith.constant dense<0.000000e+00> : vector<2x16xf32>
    %54 = tpu.matmul %52, %19, %cst_30 {dimension_numbers = #tpu.dot_dimension_numbers<[1], [0], [0], [1], [0, 0, 1, 1], [], []>} : vector<2x16xbf16>, vector<16x16xbf16>, vector<2x16xf32> -> vector<2x16xf32>
    %55 = arith.addf %53, %54 : vector<2x16xf32>
    %56 = arith.negf %55 : vector<2x16xf32>
    %57 = math.exp %56 : vector<2x16xf32>
    %cst_31 = arith.constant 1.000000e+00 : f32
    %58 = vector.broadcast %cst_31 : f32 to vector<2x16xf32>
    %59 = arith.addf %58, %57 : vector<2x16xf32>
    %60 = arith.divf %58, %59 : vector<2x16xf32>
    %61 = vector.extract_strided_slice %51 {offsets = [0, 16], sizes = [2, 16], strides = [1, 1]} : vector<2x48xf32> to vector<2x16xf32>
    %cst_32 = arith.constant dense<0.000000e+00> : vector<2x16xf32>
    %62 = tpu.matmul %52, %20, %cst_32 {dimension_numbers = #tpu.dot_dimension_numbers<[1], [0], [0], [1], [0, 0, 1, 1], [], []>} : vector<2x16xbf16>, vector<16x16xbf16>, vector<2x16xf32> -> vector<2x16xf32>
    %63 = arith.addf %61, %62 : vector<2x16xf32>
    %64 = arith.negf %63 : vector<2x16xf32>
    %65 = math.exp %64 : vector<2x16xf32>
    %cst_33 = arith.constant 1.000000e+00 : f32
    %66 = vector.broadcast %cst_33 : f32 to vector<2x16xf32>
    %67 = arith.addf %66, %65 : vector<2x16xf32>
    %68 = arith.divf %66, %67 : vector<2x16xf32>
    %69 = vector.extract_strided_slice %51 {offsets = [0, 32], sizes = [2, 16], strides = [1, 1]} : vector<2x48xf32> to vector<2x16xf32>
    %cst_34 = arith.constant dense<0.000000e+00> : vector<2x16xf32>
    %70 = tpu.matmul %52, %21, %cst_34 {dimension_numbers = #tpu.dot_dimension_numbers<[1], [0], [0], [1], [0, 0, 1, 1], [], []>} : vector<2x16xbf16>, vector<16x16xbf16>, vector<2x16xf32> -> vector<2x16xf32>
    %71 = vector.broadcast %2 : vector<1x16xf32> to vector<2x16xf32>
    %72 = arith.addf %70, %71 : vector<2x16xf32>
    %73 = arith.mulf %60, %72 : vector<2x16xf32>
    %74 = arith.addf %69, %73 : vector<2x16xf32>
    %75 = math.tanh %74 : vector<2x16xf32>
    %76 = arith.subf %50, %75 : vector<2x16xf32>
    %77 = arith.mulf %68, %76 : vector<2x16xf32>
    %78 = arith.addf %75, %77 : vector<2x16xf32>
    %c4 = arith.constant 4 : index
    %c0_35 = arith.constant 0 : index
    %79 = vector.load %arg6[%c4, %c0_35] : memref<16x48xf32, #tpu.memory_space<vmem>>, vector<2x48xf32>
    %80 = arith.truncf %78 : vector<2x16xf32> to vector<2x16xbf16>
    %81 = vector.extract_strided_slice %79 {offsets = [0, 0], sizes = [2, 16], strides = [1, 1]} : vector<2x48xf32> to vector<2x16xf32>
    %cst_36 = arith.constant dense<0.000000e+00> : vector<2x16xf32>
    %82 = tpu.matmul %80, %19, %cst_36 {dimension_numbers = #tpu.dot_dimension_numbers<[1], [0], [0], [1], [0, 0, 1, 1], [], []>} : vector<2x16xbf16>, vector<16x16xbf16>, vector<2x16xf32> -> vector<2x16xf32>
    %83 = arith.addf %81, %82 : vector<2x16xf32>
    %84 = arith.negf %83 : vector<2x16xf32>
    %85 = math.exp %84 : vector<2x16xf32>
    %cst_37 = arith.constant 1.000000e+00 : f32
    %86 = vector.broadcast %cst_37 : f32 to vector<2x16xf32>
    %87 = arith.addf %86, %85 : vector<2x16xf32>
    %88 = arith.divf %86, %87 : vector<2x16xf32>
    %89 = vector.extract_strided_slice %79 {offsets = [0, 16], sizes = [2, 16], strides = [1, 1]} : vector<2x48xf32> to vector<2x16xf32>
    %cst_38 = arith.constant dense<0.000000e+00> : vector<2x16xf32>
    %90 = tpu.matmul %80, %20, %cst_38 {dimension_numbers = #tpu.dot_dimension_numbers<[1], [0], [0], [1], [0, 0, 1, 1], [], []>} : vector<2x16xbf16>, vector<16x16xbf16>, vector<2x16xf32> -> vector<2x16xf32>
    %91 = arith.addf %89, %90 : vector<2x16xf32>
    %92 = arith.negf %91 : vector<2x16xf32>
    %93 = math.exp %92 : vector<2x16xf32>
    %cst_39 = arith.constant 1.000000e+00 : f32
    %94 = vector.broadcast %cst_39 : f32 to vector<2x16xf32>
    %95 = arith.addf %94, %93 : vector<2x16xf32>
    %96 = arith.divf %94, %95 : vector<2x16xf32>
    %97 = vector.extract_strided_slice %79 {offsets = [0, 32], sizes = [2, 16], strides = [1, 1]} : vector<2x48xf32> to vector<2x16xf32>
    %cst_40 = arith.constant dense<0.000000e+00> : vector<2x16xf32>
    %98 = tpu.matmul %80, %21, %cst_40 {dimension_numbers = #tpu.dot_dimension_numbers<[1], [0], [0], [1], [0, 0, 1, 1], [], []>} : vector<2x16xbf16>, vector<16x16xbf16>, vector<2x16xf32> -> vector<2x16xf32>
    %99 = vector.broadcast %2 : vector<1x16xf32> to vector<2x16xf32>
    %100 = arith.addf %98, %99 : vector<2x16xf32>
    %101 = arith.mulf %88, %100 : vector<2x16xf32>
    %102 = arith.addf %97, %101 : vector<2x16xf32>
    %103 = math.tanh %102 : vector<2x16xf32>
    %104 = arith.subf %78, %103 : vector<2x16xf32>
    %105 = arith.mulf %96, %104 : vector<2x16xf32>
    %106 = arith.addf %103, %105 : vector<2x16xf32>
    %c6 = arith.constant 6 : index
    %c0_41 = arith.constant 0 : index
    %107 = vector.load %arg6[%c6, %c0_41] : memref<16x48xf32, #tpu.memory_space<vmem>>, vector<2x48xf32>
    %108 = arith.truncf %106 : vector<2x16xf32> to vector<2x16xbf16>
    %109 = vector.extract_strided_slice %107 {offsets = [0, 0], sizes = [2, 16], strides = [1, 1]} : vector<2x48xf32> to vector<2x16xf32>
    %cst_42 = arith.constant dense<0.000000e+00> : vector<2x16xf32>
    %110 = tpu.matmul %108, %19, %cst_42 {dimension_numbers = #tpu.dot_dimension_numbers<[1], [0], [0], [1], [0, 0, 1, 1], [], []>} : vector<2x16xbf16>, vector<16x16xbf16>, vector<2x16xf32> -> vector<2x16xf32>
    %111 = arith.addf %109, %110 : vector<2x16xf32>
    %112 = arith.negf %111 : vector<2x16xf32>
    %113 = math.exp %112 : vector<2x16xf32>
    %cst_43 = arith.constant 1.000000e+00 : f32
    %114 = vector.broadcast %cst_43 : f32 to vector<2x16xf32>
    %115 = arith.addf %114, %113 : vector<2x16xf32>
    %116 = arith.divf %114, %115 : vector<2x16xf32>
    %117 = vector.extract_strided_slice %107 {offsets = [0, 16], sizes = [2, 16], strides = [1, 1]} : vector<2x48xf32> to vector<2x16xf32>
    %cst_44 = arith.constant dense<0.000000e+00> : vector<2x16xf32>
    %118 = tpu.matmul %108, %20, %cst_44 {dimension_numbers = #tpu.dot_dimension_numbers<[1], [0], [0], [1], [0, 0, 1, 1], [], []>} : vector<2x16xbf16>, vector<16x16xbf16>, vector<2x16xf32> -> vector<2x16xf32>
    %119 = arith.addf %117, %118 : vector<2x16xf32>
    %120 = arith.negf %119 : vector<2x16xf32>
    %121 = math.exp %120 : vector<2x16xf32>
    %cst_45 = arith.constant 1.000000e+00 : f32
    %122 = vector.broadcast %cst_45 : f32 to vector<2x16xf32>
    %123 = arith.addf %122, %121 : vector<2x16xf32>
    %124 = arith.divf %122, %123 : vector<2x16xf32>
    %125 = vector.extract_strided_slice %107 {offsets = [0, 32], sizes = [2, 16], strides = [1, 1]} : vector<2x48xf32> to vector<2x16xf32>
    %cst_46 = arith.constant dense<0.000000e+00> : vector<2x16xf32>
    %126 = tpu.matmul %108, %21, %cst_46 {dimension_numbers = #tpu.dot_dimension_numbers<[1], [0], [0], [1], [0, 0, 1, 1], [], []>} : vector<2x16xbf16>, vector<16x16xbf16>, vector<2x16xf32> -> vector<2x16xf32>
    %127 = vector.broadcast %2 : vector<1x16xf32> to vector<2x16xf32>
    %128 = arith.addf %126, %127 : vector<2x16xf32>
    %129 = arith.mulf %116, %128 : vector<2x16xf32>
    %130 = arith.addf %125, %129 : vector<2x16xf32>
    %131 = math.tanh %130 : vector<2x16xf32>
    %132 = arith.subf %106, %131 : vector<2x16xf32>
    %133 = arith.mulf %124, %132 : vector<2x16xf32>
    %134 = arith.addf %131, %133 : vector<2x16xf32>
    %c8 = arith.constant 8 : index
    %c0_47 = arith.constant 0 : index
    %135 = vector.load %arg6[%c8, %c0_47] : memref<16x48xf32, #tpu.memory_space<vmem>>, vector<2x48xf32>
    %136 = arith.truncf %134 : vector<2x16xf32> to vector<2x16xbf16>
    %137 = vector.extract_strided_slice %135 {offsets = [0, 0], sizes = [2, 16], strides = [1, 1]} : vector<2x48xf32> to vector<2x16xf32>
    %cst_48 = arith.constant dense<0.000000e+00> : vector<2x16xf32>
    %138 = tpu.matmul %136, %19, %cst_48 {dimension_numbers = #tpu.dot_dimension_numbers<[1], [0], [0], [1], [0, 0, 1, 1], [], []>} : vector<2x16xbf16>, vector<16x16xbf16>, vector<2x16xf32> -> vector<2x16xf32>
    %139 = arith.addf %137, %138 : vector<2x16xf32>
    %140 = arith.negf %139 : vector<2x16xf32>
    %141 = math.exp %140 : vector<2x16xf32>
    %cst_49 = arith.constant 1.000000e+00 : f32
    %142 = vector.broadcast %cst_49 : f32 to vector<2x16xf32>
    %143 = arith.addf %142, %141 : vector<2x16xf32>
    %144 = arith.divf %142, %143 : vector<2x16xf32>
    %145 = vector.extract_strided_slice %135 {offsets = [0, 16], sizes = [2, 16], strides = [1, 1]} : vector<2x48xf32> to vector<2x16xf32>
    %cst_50 = arith.constant dense<0.000000e+00> : vector<2x16xf32>
    %146 = tpu.matmul %136, %20, %cst_50 {dimension_numbers = #tpu.dot_dimension_numbers<[1], [0], [0], [1], [0, 0, 1, 1], [], []>} : vector<2x16xbf16>, vector<16x16xbf16>, vector<2x16xf32> -> vector<2x16xf32>
    %147 = arith.addf %145, %146 : vector<2x16xf32>
    %148 = arith.negf %147 : vector<2x16xf32>
    %149 = math.exp %148 : vector<2x16xf32>
    %cst_51 = arith.constant 1.000000e+00 : f32
    %150 = vector.broadcast %cst_51 : f32 to vector<2x16xf32>
    %151 = arith.addf %150, %149 : vector<2x16xf32>
    %152 = arith.divf %150, %151 : vector<2x16xf32>
    %153 = vector.extract_strided_slice %135 {offsets = [0, 32], sizes = [2, 16], strides = [1, 1]} : vector<2x48xf32> to vector<2x16xf32>
    %cst_52 = arith.constant dense<0.000000e+00> : vector<2x16xf32>
    %154 = tpu.matmul %136, %21, %cst_52 {dimension_numbers = #tpu.dot_dimension_numbers<[1], [0], [0], [1], [0, 0, 1, 1], [], []>} : vector<2x16xbf16>, vector<16x16xbf16>, vector<2x16xf32> -> vector<2x16xf32>
    %155 = vector.broadcast %2 : vector<1x16xf32> to vector<2x16xf32>
    %156 = arith.addf %154, %155 : vector<2x16xf32>
    %157 = arith.mulf %144, %156 : vector<2x16xf32>
    %158 = arith.addf %153, %157 : vector<2x16xf32>
    %159 = math.tanh %158 : vector<2x16xf32>
    %160 = arith.subf %134, %159 : vector<2x16xf32>
    %161 = arith.mulf %152, %160 : vector<2x16xf32>
    %162 = arith.addf %159, %161 : vector<2x16xf32>
    %c10 = arith.constant 10 : index
    %c0_53 = arith.constant 0 : index
    %163 = vector.load %arg6[%c10, %c0_53] : memref<16x48xf32, #tpu.memory_space<vmem>>, vector<2x48xf32>
    %164 = arith.truncf %162 : vector<2x16xf32> to vector<2x16xbf16>
    %165 = vector.extract_strided_slice %163 {offsets = [0, 0], sizes = [2, 16], strides = [1, 1]} : vector<2x48xf32> to vector<2x16xf32>
    %cst_54 = arith.constant dense<0.000000e+00> : vector<2x16xf32>
    %166 = tpu.matmul %164, %19, %cst_54 {dimension_numbers = #tpu.dot_dimension_numbers<[1], [0], [0], [1], [0, 0, 1, 1], [], []>} : vector<2x16xbf16>, vector<16x16xbf16>, vector<2x16xf32> -> vector<2x16xf32>
    %167 = arith.addf %165, %166 : vector<2x16xf32>
    %168 = arith.negf %167 : vector<2x16xf32>
    %169 = math.exp %168 : vector<2x16xf32>
    %cst_55 = arith.constant 1.000000e+00 : f32
    %170 = vector.broadcast %cst_55 : f32 to vector<2x16xf32>
    %171 = arith.addf %170, %169 : vector<2x16xf32>
    %172 = arith.divf %170, %171 : vector<2x16xf32>
    %173 = vector.extract_strided_slice %163 {offsets = [0, 16], sizes = [2, 16], strides = [1, 1]} : vector<2x48xf32> to vector<2x16xf32>
    %cst_56 = arith.constant dense<0.000000e+00> : vector<2x16xf32>
    %174 = tpu.matmul %164, %20, %cst_56 {dimension_numbers = #tpu.dot_dimension_numbers<[1], [0], [0], [1], [0, 0, 1, 1], [], []>} : vector<2x16xbf16>, vector<16x16xbf16>, vector<2x16xf32> -> vector<2x16xf32>
    %175 = arith.addf %173, %174 : vector<2x16xf32>
    %176 = arith.negf %175 : vector<2x16xf32>
    %177 = math.exp %176 : vector<2x16xf32>
    %cst_57 = arith.constant 1.000000e+00 : f32
    %178 = vector.broadcast %cst_57 : f32 to vector<2x16xf32>
    %179 = arith.addf %178, %177 : vector<2x16xf32>
    %180 = arith.divf %178, %179 : vector<2x16xf32>
    %181 = vector.extract_strided_slice %163 {offsets = [0, 32], sizes = [2, 16], strides = [1, 1]} : vector<2x48xf32> to vector<2x16xf32>
    %cst_58 = arith.constant dense<0.000000e+00> : vector<2x16xf32>
    %182 = tpu.matmul %164, %21, %cst_58 {dimension_numbers = #tpu.dot_dimension_numbers<[1], [0], [0], [1], [0, 0, 1, 1], [], []>} : vector<2x16xbf16>, vector<16x16xbf16>, vector<2x16xf32> -> vector<2x16xf32>
    %183 = vector.broadcast %2 : vector<1x16xf32> to vector<2x16xf32>
    %184 = arith.addf %182, %183 : vector<2x16xf32>
    %185 = arith.mulf %172, %184 : vector<2x16xf32>
    %186 = arith.addf %181, %185 : vector<2x16xf32>
    %187 = math.tanh %186 : vector<2x16xf32>
    %188 = arith.subf %162, %187 : vector<2x16xf32>
    %189 = arith.mulf %180, %188 : vector<2x16xf32>
    %190 = arith.addf %187, %189 : vector<2x16xf32>
    %c12 = arith.constant 12 : index
    %c0_59 = arith.constant 0 : index
    %191 = vector.load %arg6[%c12, %c0_59] : memref<16x48xf32, #tpu.memory_space<vmem>>, vector<2x48xf32>
    %192 = arith.truncf %190 : vector<2x16xf32> to vector<2x16xbf16>
    %193 = vector.extract_strided_slice %191 {offsets = [0, 0], sizes = [2, 16], strides = [1, 1]} : vector<2x48xf32> to vector<2x16xf32>
    %cst_60 = arith.constant dense<0.000000e+00> : vector<2x16xf32>
    %194 = tpu.matmul %192, %19, %cst_60 {dimension_numbers = #tpu.dot_dimension_numbers<[1], [0], [0], [1], [0, 0, 1, 1], [], []>} : vector<2x16xbf16>, vector<16x16xbf16>, vector<2x16xf32> -> vector<2x16xf32>
    %195 = arith.addf %193, %194 : vector<2x16xf32>
    %196 = arith.negf %195 : vector<2x16xf32>
    %197 = math.exp %196 : vector<2x16xf32>
    %cst_61 = arith.constant 1.000000e+00 : f32
    %198 = vector.broadcast %cst_61 : f32 to vector<2x16xf32>
    %199 = arith.addf %198, %197 : vector<2x16xf32>
    %200 = arith.divf %198, %199 : vector<2x16xf32>
    %201 = vector.extract_strided_slice %191 {offsets = [0, 16], sizes = [2, 16], strides = [1, 1]} : vector<2x48xf32> to vector<2x16xf32>
    %cst_62 = arith.constant dense<0.000000e+00> : vector<2x16xf32>
    %202 = tpu.matmul %192, %20, %cst_62 {dimension_numbers = #tpu.dot_dimension_numbers<[1], [0], [0], [1], [0, 0, 1, 1], [], []>} : vector<2x16xbf16>, vector<16x16xbf16>, vector<2x16xf32> -> vector<2x16xf32>
    %203 = arith.addf %201, %202 : vector<2x16xf32>
    %204 = arith.negf %203 : vector<2x16xf32>
    %205 = math.exp %204 : vector<2x16xf32>
    %cst_63 = arith.constant 1.000000e+00 : f32
    %206 = vector.broadcast %cst_63 : f32 to vector<2x16xf32>
    %207 = arith.addf %206, %205 : vector<2x16xf32>
    %208 = arith.divf %206, %207 : vector<2x16xf32>
    %209 = vector.extract_strided_slice %191 {offsets = [0, 32], sizes = [2, 16], strides = [1, 1]} : vector<2x48xf32> to vector<2x16xf32>
    %cst_64 = arith.constant dense<0.000000e+00> : vector<2x16xf32>
    %210 = tpu.matmul %192, %21, %cst_64 {dimension_numbers = #tpu.dot_dimension_numbers<[1], [0], [0], [1], [0, 0, 1, 1], [], []>} : vector<2x16xbf16>, vector<16x16xbf16>, vector<2x16xf32> -> vector<2x16xf32>
    %211 = vector.broadcast %2 : vector<1x16xf32> to vector<2x16xf32>
    %212 = arith.addf %210, %211 : vector<2x16xf32>
    %213 = arith.mulf %200, %212 : vector<2x16xf32>
    %214 = arith.addf %209, %213 : vector<2x16xf32>
    %215 = math.tanh %214 : vector<2x16xf32>
    %216 = arith.subf %190, %215 : vector<2x16xf32>
    %217 = arith.mulf %208, %216 : vector<2x16xf32>
    %218 = arith.addf %215, %217 : vector<2x16xf32>
    %c14 = arith.constant 14 : index
    %c0_65 = arith.constant 0 : index
    %219 = vector.load %arg6[%c14, %c0_65] : memref<16x48xf32, #tpu.memory_space<vmem>>, vector<2x48xf32>
    %220 = arith.truncf %218 : vector<2x16xf32> to vector<2x16xbf16>
    %221 = vector.extract_strided_slice %219 {offsets = [0, 0], sizes = [2, 16], strides = [1, 1]} : vector<2x48xf32> to vector<2x16xf32>
    %cst_66 = arith.constant dense<0.000000e+00> : vector<2x16xf32>
    %222 = tpu.matmul %220, %19, %cst_66 {dimension_numbers = #tpu.dot_dimension_numbers<[1], [0], [0], [1], [0, 0, 1, 1], [], []>} : vector<2x16xbf16>, vector<16x16xbf16>, vector<2x16xf32> -> vector<2x16xf32>
    %223 = arith.addf %221, %222 : vector<2x16xf32>
    %224 = arith.negf %223 : vector<2x16xf32>
    %225 = math.exp %224 : vector<2x16xf32>
    %cst_67 = arith.constant 1.000000e+00 : f32
    %226 = vector.broadcast %cst_67 : f32 to vector<2x16xf32>
    %227 = arith.addf %226, %225 : vector<2x16xf32>
    %228 = arith.divf %226, %227 : vector<2x16xf32>
    %229 = vector.extract_strided_slice %219 {offsets = [0, 16], sizes = [2, 16], strides = [1, 1]} : vector<2x48xf32> to vector<2x16xf32>
    %cst_68 = arith.constant dense<0.000000e+00> : vector<2x16xf32>
    %230 = tpu.matmul %220, %20, %cst_68 {dimension_numbers = #tpu.dot_dimension_numbers<[1], [0], [0], [1], [0, 0, 1, 1], [], []>} : vector<2x16xbf16>, vector<16x16xbf16>, vector<2x16xf32> -> vector<2x16xf32>
    %231 = arith.addf %229, %230 : vector<2x16xf32>
    %232 = arith.negf %231 : vector<2x16xf32>
    %233 = math.exp %232 : vector<2x16xf32>
    %cst_69 = arith.constant 1.000000e+00 : f32
    %234 = vector.broadcast %cst_69 : f32 to vector<2x16xf32>
    %235 = arith.addf %234, %233 : vector<2x16xf32>
    %236 = arith.divf %234, %235 : vector<2x16xf32>
    %237 = vector.extract_strided_slice %219 {offsets = [0, 32], sizes = [2, 16], strides = [1, 1]} : vector<2x48xf32> to vector<2x16xf32>
    %cst_70 = arith.constant dense<0.000000e+00> : vector<2x16xf32>
    %238 = tpu.matmul %220, %21, %cst_70 {dimension_numbers = #tpu.dot_dimension_numbers<[1], [0], [0], [1], [0, 0, 1, 1], [], []>} : vector<2x16xbf16>, vector<16x16xbf16>, vector<2x16xf32> -> vector<2x16xf32>
    %239 = vector.broadcast %2 : vector<1x16xf32> to vector<2x16xf32>
    %240 = arith.addf %238, %239 : vector<2x16xf32>
    %241 = arith.mulf %228, %240 : vector<2x16xf32>
    %242 = arith.addf %237, %241 : vector<2x16xf32>
    %243 = math.tanh %242 : vector<2x16xf32>
    %244 = arith.subf %218, %243 : vector<2x16xf32>
    %245 = arith.mulf %236, %244 : vector<2x16xf32>
    %246 = arith.addf %243, %245 : vector<2x16xf32>
    %c0_71 = arith.constant 0 : index
    %c0_72 = arith.constant 0 : index
    %247 = vector.load %arg7[%c0_71, %c0_72] : memref<10x16xf32, #tpu.memory_space<vmem>>, vector<2x16xf32>
    tpu.vector_store %arg7[%c0_71, %c0_72], %246 {strides = array<i32>} : memref<10x16xf32, #tpu.memory_space<vmem>>, vector<2x16xf32>,
    %c0_73 = arith.constant 0 : index
    %c0_74 = arith.constant 0 : index
    %248 = vector.load %arg6[%c0_73, %c0_74] : memref<16x48xf32, #tpu.memory_space<vmem>>, vector<2x48xf32>
    %249 = arith.truncf %246 : vector<2x16xf32> to vector<2x16xbf16>
    %250 = vector.extract_strided_slice %248 {offsets = [0, 0], sizes = [2, 16], strides = [1, 1]} : vector<2x48xf32> to vector<2x16xf32>
    %cst_75 = arith.constant dense<0.000000e+00> : vector<2x16xf32>
    %251 = tpu.matmul %249, %19, %cst_75 {dimension_numbers = #tpu.dot_dimension_numbers<[1], [0], [0], [1], [0, 0, 1, 1], [], []>} : vector<2x16xbf16>, vector<16x16xbf16>, vector<2x16xf32> -> vector<2x16xf32>
    %252 = arith.addf %250, %251 : vector<2x16xf32>
    %253 = arith.negf %252 : vector<2x16xf32>
    %254 = math.exp %253 : vector<2x16xf32>
    %cst_76 = arith.constant 1.000000e+00 : f32
    %255 = vector.broadcast %cst_76 : f32 to vector<2x16xf32>
    %256 = arith.addf %255, %254 : vector<2x16xf32>
    %257 = arith.divf %255, %256 : vector<2x16xf32>
    %258 = vector.extract_strided_slice %248 {offsets = [0, 16], sizes = [2, 16], strides = [1, 1]} : vector<2x48xf32> to vector<2x16xf32>
    %cst_77 = arith.constant dense<0.000000e+00> : vector<2x16xf32>
    %259 = tpu.matmul %249, %20, %cst_77 {dimension_numbers = #tpu.dot_dimension_numbers<[1], [0], [0], [1], [0, 0, 1, 1], [], []>} : vector<2x16xbf16>, vector<16x16xbf16>, vector<2x16xf32> -> vector<2x16xf32>
    %260 = arith.addf %258, %259 : vector<2x16xf32>
    %261 = arith.negf %260 : vector<2x16xf32>
    %262 = math.exp %261 : vector<2x16xf32>
    %cst_78 = arith.constant 1.000000e+00 : f32
    %263 = vector.broadcast %cst_78 : f32 to vector<2x16xf32>
    %264 = arith.addf %263, %262 : vector<2x16xf32>
    %265 = arith.divf %263, %264 : vector<2x16xf32>
    %266 = vector.extract_strided_slice %248 {offsets = [0, 32], sizes = [2, 16], strides = [1, 1]} : vector<2x48xf32> to vector<2x16xf32>
    %cst_79 = arith.constant dense<0.000000e+00> : vector<2x16xf32>
    %267 = tpu.matmul %249, %21, %cst_79 {dimension_numbers = #tpu.dot_dimension_numbers<[1], [0], [0], [1], [0, 0, 1, 1], [], []>} : vector<2x16xbf16>, vector<16x16xbf16>, vector<2x16xf32> -> vector<2x16xf32>
    %268 = vector.broadcast %2 : vector<1x16xf32> to vector<2x16xf32>
    %269 = arith.addf %267, %268 : vector<2x16xf32>
    %270 = arith.mulf %257, %269 : vector<2x16xf32>
    %271 = arith.addf %266, %270 : vector<2x16xf32>
    %272 = math.tanh %271 : vector<2x16xf32>
    %273 = arith.subf %246, %272 : vector<2x16xf32>
    %274 = arith.mulf %265, %273 : vector<2x16xf32>
    %275 = arith.addf %272, %274 : vector<2x16xf32>
    %c2_80 = arith.constant 2 : index
    %c0_81 = arith.constant 0 : index
    %276 = vector.load %arg6[%c2_80, %c0_81] : memref<16x48xf32, #tpu.memory_space<vmem>>, vector<2x48xf32>
    %277 = arith.truncf %275 : vector<2x16xf32> to vector<2x16xbf16>
    %278 = vector.extract_strided_slice %276 {offsets = [0, 0], sizes = [2, 16], strides = [1, 1]} : vector<2x48xf32> to vector<2x16xf32>
    %cst_82 = arith.constant dense<0.000000e+00> : vector<2x16xf32>
    %279 = tpu.matmul %277, %19, %cst_82 {dimension_numbers = #tpu.dot_dimension_numbers<[1], [0], [0], [1], [0, 0, 1, 1], [], []>} : vector<2x16xbf16>, vector<16x16xbf16>, vector<2x16xf32> -> vector<2x16xf32>
    %280 = arith.addf %278, %279 : vector<2x16xf32>
    %281 = arith.negf %280 : vector<2x16xf32>
    %282 = math.exp %281 : vector<2x16xf32>
    %cst_83 = arith.constant 1.000000e+00 : f32
    %283 = vector.broadcast %cst_83 : f32 to vector<2x16xf32>
    %284 = arith.addf %283, %282 : vector<2x16xf32>
    %285 = arith.divf %283, %284 : vector<2x16xf32>
    %286 = vector.extract_strided_slice %276 {offsets = [0, 16], sizes = [2, 16], strides = [1, 1]} : vector<2x48xf32> to vector<2x16xf32>
    %cst_84 = arith.constant dense<0.000000e+00> : vector<2x16xf32>
    %287 = tpu.matmul %277, %20, %cst_84 {dimension_numbers = #tpu.dot_dimension_numbers<[1], [0], [0], [1], [0, 0, 1, 1], [], []>} : vector<2x16xbf16>, vector<16x16xbf16>, vector<2x16xf32> -> vector<2x16xf32>
    %288 = arith.addf %286, %287 : vector<2x16xf32>
    %289 = arith.negf %288 : vector<2x16xf32>
    %290 = math.exp %289 : vector<2x16xf32>
    %cst_85 = arith.constant 1.000000e+00 : f32
    %291 = vector.broadcast %cst_85 : f32 to vector<2x16xf32>
    %292 = arith.addf %291, %290 : vector<2x16xf32>
    %293 = arith.divf %291, %292 : vector<2x16xf32>
    %294 = vector.extract_strided_slice %276 {offsets = [0, 32], sizes = [2, 16], strides = [1, 1]} : vector<2x48xf32> to vector<2x16xf32>
    %cst_86 = arith.constant dense<0.000000e+00> : vector<2x16xf32>
    %295 = tpu.matmul %277, %21, %cst_86 {dimension_numbers = #tpu.dot_dimension_numbers<[1], [0], [0], [1], [0, 0, 1, 1], [], []>} : vector<2x16xbf16>, vector<16x16xbf16>, vector<2x16xf32> -> vector<2x16xf32>
    %296 = vector.broadcast %2 : vector<1x16xf32> to vector<2x16xf32>
    %297 = arith.addf %295, %296 : vector<2x16xf32>
    %298 = arith.mulf %285, %297 : vector<2x16xf32>
    %299 = arith.addf %294, %298 : vector<2x16xf32>
    %300 = math.tanh %299 : vector<2x16xf32>
    %301 = arith.subf %275, %300 : vector<2x16xf32>
    %302 = arith.mulf %293, %301 : vector<2x16xf32>
    %303 = arith.addf %300, %302 : vector<2x16xf32>
    %c4_87 = arith.constant 4 : index
    %c0_88 = arith.constant 0 : index
    %304 = vector.load %arg6[%c4_87, %c0_88] : memref<16x48xf32, #tpu.memory_space<vmem>>, vector<2x48xf32>
    %305 = arith.truncf %303 : vector<2x16xf32> to vector<2x16xbf16>
    %306 = vector.extract_strided_slice %304 {offsets = [0, 0], sizes = [2, 16], strides = [1, 1]} : vector<2x48xf32> to vector<2x16xf32>
    %cst_89 = arith.constant dense<0.000000e+00> : vector<2x16xf32>
    %307 = tpu.matmul %305, %19, %cst_89 {dimension_numbers = #tpu.dot_dimension_numbers<[1], [0], [0], [1], [0, 0, 1, 1], [], []>} : vector<2x16xbf16>, vector<16x16xbf16>, vector<2x16xf32> -> vector<2x16xf32>
    %308 = arith.addf %306, %307 : vector<2x16xf32>
    %309 = arith.negf %308 : vector<2x16xf32>
    %310 = math.exp %309 : vector<2x16xf32>
    %cst_90 = arith.constant 1.000000e+00 : f32
    %311 = vector.broadcast %cst_90 : f32 to vector<2x16xf32>
    %312 = arith.addf %311, %310 : vector<2x16xf32>
    %313 = arith.divf %311, %312 : vector<2x16xf32>
    %314 = vector.extract_strided_slice %304 {offsets = [0, 16], sizes = [2, 16], strides = [1, 1]} : vector<2x48xf32> to vector<2x16xf32>
    %cst_91 = arith.constant dense<0.000000e+00> : vector<2x16xf32>
    %315 = tpu.matmul %305, %20, %cst_91 {dimension_numbers = #tpu.dot_dimension_numbers<[1], [0], [0], [1], [0, 0, 1, 1], [], []>} : vector<2x16xbf16>, vector<16x16xbf16>, vector<2x16xf32> -> vector<2x16xf32>
    %316 = arith.addf %314, %315 : vector<2x16xf32>
    %317 = arith.negf %316 : vector<2x16xf32>
    %318 = math.exp %317 : vector<2x16xf32>
    %cst_92 = arith.constant 1.000000e+00 : f32
    %319 = vector.broadcast %cst_92 : f32 to vector<2x16xf32>
    %320 = arith.addf %319, %318 : vector<2x16xf32>
    %321 = arith.divf %319, %320 : vector<2x16xf32>
    %322 = vector.extract_strided_slice %304 {offsets = [0, 32], sizes = [2, 16], strides = [1, 1]} : vector<2x48xf32> to vector<2x16xf32>
    %cst_93 = arith.constant dense<0.000000e+00> : vector<2x16xf32>
    %323 = tpu.matmul %305, %21, %cst_93 {dimension_numbers = #tpu.dot_dimension_numbers<[1], [0], [0], [1], [0, 0, 1, 1], [], []>} : vector<2x16xbf16>, vector<16x16xbf16>, vector<2x16xf32> -> vector<2x16xf32>
    %324 = vector.broadcast %2 : vector<1x16xf32> to vector<2x16xf32>
    %325 = arith.addf %323, %324 : vector<2x16xf32>
    %326 = arith.mulf %313, %325 : vector<2x16xf32>
    %327 = arith.addf %322, %326 : vector<2x16xf32>
    %328 = math.tanh %327 : vector<2x16xf32>
    %329 = arith.subf %303, %328 : vector<2x16xf32>
    %330 = arith.mulf %321, %329 : vector<2x16xf32>
    %331 = arith.addf %328, %330 : vector<2x16xf32>
    %c6_94 = arith.constant 6 : index
    %c0_95 = arith.constant 0 : index
    %332 = vector.load %arg6[%c6_94, %c0_95] : memref<16x48xf32, #tpu.memory_space<vmem>>, vector<2x48xf32>
    %333 = arith.truncf %331 : vector<2x16xf32> to vector<2x16xbf16>
    %334 = vector.extract_strided_slice %332 {offsets = [0, 0], sizes = [2, 16], strides = [1, 1]} : vector<2x48xf32> to vector<2x16xf32>
    %cst_96 = arith.constant dense<0.000000e+00> : vector<2x16xf32>
    %335 = tpu.matmul %333, %19, %cst_96 {dimension_numbers = #tpu.dot_dimension_numbers<[1], [0], [0], [1], [0, 0, 1, 1], [], []>} : vector<2x16xbf16>, vector<16x16xbf16>, vector<2x16xf32> -> vector<2x16xf32>
    %336 = arith.addf %334, %335 : vector<2x16xf32>
    %337 = arith.negf %336 : vector<2x16xf32>
    %338 = math.exp %337 : vector<2x16xf32>
    %cst_97 = arith.constant 1.000000e+00 : f32
    %339 = vector.broadcast %cst_97 : f32 to vector<2x16xf32>
    %340 = arith.addf %339, %338 : vector<2x16xf32>
    %341 = arith.divf %339, %340 : vector<2x16xf32>
    %342 = vector.extract_strided_slice %332 {offsets = [0, 16], sizes = [2, 16], strides = [1, 1]} : vector<2x48xf32> to vector<2x16xf32>
    %cst_98 = arith.constant dense<0.000000e+00> : vector<2x16xf32>
    %343 = tpu.matmul %333, %20, %cst_98 {dimension_numbers = #tpu.dot_dimension_numbers<[1], [0], [0], [1], [0, 0, 1, 1], [], []>} : vector<2x16xbf16>, vector<16x16xbf16>, vector<2x16xf32> -> vector<2x16xf32>
    %344 = arith.addf %342, %343 : vector<2x16xf32>
    %345 = arith.negf %344 : vector<2x16xf32>
    %346 = math.exp %345 : vector<2x16xf32>
    %cst_99 = arith.constant 1.000000e+00 : f32
    %347 = vector.broadcast %cst_99 : f32 to vector<2x16xf32>
    %348 = arith.addf %347, %346 : vector<2x16xf32>
    %349 = arith.divf %347, %348 : vector<2x16xf32>
    %350 = vector.extract_strided_slice %332 {offsets = [0, 32], sizes = [2, 16], strides = [1, 1]} : vector<2x48xf32> to vector<2x16xf32>
    %cst_100 = arith.constant dense<0.000000e+00> : vector<2x16xf32>
    %351 = tpu.matmul %333, %21, %cst_100 {dimension_numbers = #tpu.dot_dimension_numbers<[1], [0], [0], [1], [0, 0, 1, 1], [], []>} : vector<2x16xbf16>, vector<16x16xbf16>, vector<2x16xf32> -> vector<2x16xf32>
    %352 = vector.broadcast %2 : vector<1x16xf32> to vector<2x16xf32>
    %353 = arith.addf %351, %352 : vector<2x16xf32>
    %354 = arith.mulf %341, %353 : vector<2x16xf32>
    %355 = arith.addf %350, %354 : vector<2x16xf32>
    %356 = math.tanh %355 : vector<2x16xf32>
    %357 = arith.subf %331, %356 : vector<2x16xf32>
    %358 = arith.mulf %349, %357 : vector<2x16xf32>
    %359 = arith.addf %356, %358 : vector<2x16xf32>
    %c8_101 = arith.constant 8 : index
    %c0_102 = arith.constant 0 : index
    %360 = vector.load %arg6[%c8_101, %c0_102] : memref<16x48xf32, #tpu.memory_space<vmem>>, vector<2x48xf32>
    %361 = arith.truncf %359 : vector<2x16xf32> to vector<2x16xbf16>
    %362 = vector.extract_strided_slice %360 {offsets = [0, 0], sizes = [2, 16], strides = [1, 1]} : vector<2x48xf32> to vector<2x16xf32>
    %cst_103 = arith.constant dense<0.000000e+00> : vector<2x16xf32>
    %363 = tpu.matmul %361, %19, %cst_103 {dimension_numbers = #tpu.dot_dimension_numbers<[1], [0], [0], [1], [0, 0, 1, 1], [], []>} : vector<2x16xbf16>, vector<16x16xbf16>, vector<2x16xf32> -> vector<2x16xf32>
    %364 = arith.addf %362, %363 : vector<2x16xf32>
    %365 = arith.negf %364 : vector<2x16xf32>
    %366 = math.exp %365 : vector<2x16xf32>
    %cst_104 = arith.constant 1.000000e+00 : f32
    %367 = vector.broadcast %cst_104 : f32 to vector<2x16xf32>
    %368 = arith.addf %367, %366 : vector<2x16xf32>
    %369 = arith.divf %367, %368 : vector<2x16xf32>
    %370 = vector.extract_strided_slice %360 {offsets = [0, 16], sizes = [2, 16], strides = [1, 1]} : vector<2x48xf32> to vector<2x16xf32>
    %cst_105 = arith.constant dense<0.000000e+00> : vector<2x16xf32>
    %371 = tpu.matmul %361, %20, %cst_105 {dimension_numbers = #tpu.dot_dimension_numbers<[1], [0], [0], [1], [0, 0, 1, 1], [], []>} : vector<2x16xbf16>, vector<16x16xbf16>, vector<2x16xf32> -> vector<2x16xf32>
    %372 = arith.addf %370, %371 : vector<2x16xf32>
    %373 = arith.negf %372 : vector<2x16xf32>
    %374 = math.exp %373 : vector<2x16xf32>
    %cst_106 = arith.constant 1.000000e+00 : f32
    %375 = vector.broadcast %cst_106 : f32 to vector<2x16xf32>
    %376 = arith.addf %375, %374 : vector<2x16xf32>
    %377 = arith.divf %375, %376 : vector<2x16xf32>
    %378 = vector.extract_strided_slice %360 {offsets = [0, 32], sizes = [2, 16], strides = [1, 1]} : vector<2x48xf32> to vector<2x16xf32>
    %cst_107 = arith.constant dense<0.000000e+00> : vector<2x16xf32>
    %379 = tpu.matmul %361, %21, %cst_107 {dimension_numbers = #tpu.dot_dimension_numbers<[1], [0], [0], [1], [0, 0, 1, 1], [], []>} : vector<2x16xbf16>, vector<16x16xbf16>, vector<2x16xf32> -> vector<2x16xf32>
    %380 = vector.broadcast %2 : vector<1x16xf32> to vector<2x16xf32>
    %381 = arith.addf %379, %380 : vector<2x16xf32>
    %382 = arith.mulf %369, %381 : vector<2x16xf32>
    %383 = arith.addf %378, %382 : vector<2x16xf32>
    %384 = math.tanh %383 : vector<2x16xf32>
    %385 = arith.subf %359, %384 : vector<2x16xf32>
    %386 = arith.mulf %377, %385 : vector<2x16xf32>
    %387 = arith.addf %384, %386 : vector<2x16xf32>
    %c10_108 = arith.constant 10 : index
    %c0_109 = arith.constant 0 : index
    %388 = vector.load %arg6[%c10_108, %c0_109] : memref<16x48xf32, #tpu.memory_space<vmem>>, vector<2x48xf32>
    %389 = arith.truncf %387 : vector<2x16xf32> to vector<2x16xbf16>
    %390 = vector.extract_strided_slice %388 {offsets = [0, 0], sizes = [2, 16], strides = [1, 1]} : vector<2x48xf32> to vector<2x16xf32>
    %cst_110 = arith.constant dense<0.000000e+00> : vector<2x16xf32>
    %391 = tpu.matmul %389, %19, %cst_110 {dimension_numbers = #tpu.dot_dimension_numbers<[1], [0], [0], [1], [0, 0, 1, 1], [], []>} : vector<2x16xbf16>, vector<16x16xbf16>, vector<2x16xf32> -> vector<2x16xf32>
    %392 = arith.addf %390, %391 : vector<2x16xf32>
    %393 = arith.negf %392 : vector<2x16xf32>
    %394 = math.exp %393 : vector<2x16xf32>
    %cst_111 = arith.constant 1.000000e+00 : f32
    %395 = vector.broadcast %cst_111 : f32 to vector<2x16xf32>
    %396 = arith.addf %395, %394 : vector<2x16xf32>
    %397 = arith.divf %395, %396 : vector<2x16xf32>
    %398 = vector.extract_strided_slice %388 {offsets = [0, 16], sizes = [2, 16], strides = [1, 1]} : vector<2x48xf32> to vector<2x16xf32>
    %cst_112 = arith.constant dense<0.000000e+00> : vector<2x16xf32>
    %399 = tpu.matmul %389, %20, %cst_112 {dimension_numbers = #tpu.dot_dimension_numbers<[1], [0], [0], [1], [0, 0, 1, 1], [], []>} : vector<2x16xbf16>, vector<16x16xbf16>, vector<2x16xf32> -> vector<2x16xf32>
    %400 = arith.addf %398, %399 : vector<2x16xf32>
    %401 = arith.negf %400 : vector<2x16xf32>
    %402 = math.exp %401 : vector<2x16xf32>
    %cst_113 = arith.constant 1.000000e+00 : f32
    %403 = vector.broadcast %cst_113 : f32 to vector<2x16xf32>
    %404 = arith.addf %403, %402 : vector<2x16xf32>
    %405 = arith.divf %403, %404 : vector<2x16xf32>
    %406 = vector.extract_strided_slice %388 {offsets = [0, 32], sizes = [2, 16], strides = [1, 1]} : vector<2x48xf32> to vector<2x16xf32>
    %cst_114 = arith.constant dense<0.000000e+00> : vector<2x16xf32>
    %407 = tpu.matmul %389, %21, %cst_114 {dimension_numbers = #tpu.dot_dimension_numbers<[1], [0], [0], [1], [0, 0, 1, 1], [], []>} : vector<2x16xbf16>, vector<16x16xbf16>, vector<2x16xf32> -> vector<2x16xf32>
    %408 = vector.broadcast %2 : vector<1x16xf32> to vector<2x16xf32>
    %409 = arith.addf %407, %408 : vector<2x16xf32>
    %410 = arith.mulf %397, %409 : vector<2x16xf32>
    %411 = arith.addf %406, %410 : vector<2x16xf32>
    %412 = math.tanh %411 : vector<2x16xf32>
    %413 = arith.subf %387, %412 : vector<2x16xf32>
    %414 = arith.mulf %405, %413 : vector<2x16xf32>
    %415 = arith.addf %412, %414 : vector<2x16xf32>
    %c12_115 = arith.constant 12 : index
    %c0_116 = arith.constant 0 : index
    %416 = vector.load %arg6[%c12_115, %c0_116] : memref<16x48xf32, #tpu.memory_space<vmem>>, vector<2x48xf32>
    %417 = arith.truncf %415 : vector<2x16xf32> to vector<2x16xbf16>
    %418 = vector.extract_strided_slice %416 {offsets = [0, 0], sizes = [2, 16], strides = [1, 1]} : vector<2x48xf32> to vector<2x16xf32>
    %cst_117 = arith.constant dense<0.000000e+00> : vector<2x16xf32>
    %419 = tpu.matmul %417, %19, %cst_117 {dimension_numbers = #tpu.dot_dimension_numbers<[1], [0], [0], [1], [0, 0, 1, 1], [], []>} : vector<2x16xbf16>, vector<16x16xbf16>, vector<2x16xf32> -> vector<2x16xf32>
    %420 = arith.addf %418, %419 : vector<2x16xf32>
    %421 = arith.negf %420 : vector<2x16xf32>
    %422 = math.exp %421 : vector<2x16xf32>
    %cst_118 = arith.constant 1.000000e+00 : f32
    %423 = vector.broadcast %cst_118 : f32 to vector<2x16xf32>
    %424 = arith.addf %423, %422 : vector<2x16xf32>
    %425 = arith.divf %423, %424 : vector<2x16xf32>
    %426 = vector.extract_strided_slice %416 {offsets = [0, 16], sizes = [2, 16], strides = [1, 1]} : vector<2x48xf32> to vector<2x16xf32>
    %cst_119 = arith.constant dense<0.000000e+00> : vector<2x16xf32>
    %427 = tpu.matmul %417, %20, %cst_119 {dimension_numbers = #tpu.dot_dimension_numbers<[1], [0], [0], [1], [0, 0, 1, 1], [], []>} : vector<2x16xbf16>, vector<16x16xbf16>, vector<2x16xf32> -> vector<2x16xf32>
    %428 = arith.addf %426, %427 : vector<2x16xf32>
    %429 = arith.negf %428 : vector<2x16xf32>
    %430 = math.exp %429 : vector<2x16xf32>
    %cst_120 = arith.constant 1.000000e+00 : f32
    %431 = vector.broadcast %cst_120 : f32 to vector<2x16xf32>
    %432 = arith.addf %431, %430 : vector<2x16xf32>
    %433 = arith.divf %431, %432 : vector<2x16xf32>
    %434 = vector.extract_strided_slice %416 {offsets = [0, 32], sizes = [2, 16], strides = [1, 1]} : vector<2x48xf32> to vector<2x16xf32>
    %cst_121 = arith.constant dense<0.000000e+00> : vector<2x16xf32>
    %435 = tpu.matmul %417, %21, %cst_121 {dimension_numbers = #tpu.dot_dimension_numbers<[1], [0], [0], [1], [0, 0, 1, 1], [], []>} : vector<2x16xbf16>, vector<16x16xbf16>, vector<2x16xf32> -> vector<2x16xf32>
    %436 = vector.broadcast %2 : vector<1x16xf32> to vector<2x16xf32>
    %437 = arith.addf %435, %436 : vector<2x16xf32>
    %438 = arith.mulf %425, %437 : vector<2x16xf32>
    %439 = arith.addf %434, %438 : vector<2x16xf32>
    %440 = math.tanh %439 : vector<2x16xf32>
    %441 = arith.subf %415, %440 : vector<2x16xf32>
    %442 = arith.mulf %433, %441 : vector<2x16xf32>
    %443 = arith.addf %440, %442 : vector<2x16xf32>
    %c14_122 = arith.constant 14 : index
    %c0_123 = arith.constant 0 : index
    %444 = vector.load %arg6[%c14_122, %c0_123] : memref<16x48xf32, #tpu.memory_space<vmem>>, vector<2x48xf32>
    %445 = arith.truncf %443 : vector<2x16xf32> to vector<2x16xbf16>
    %446 = vector.extract_strided_slice %444 {offsets = [0, 0], sizes = [2, 16], strides = [1, 1]} : vector<2x48xf32> to vector<2x16xf32>
    %cst_124 = arith.constant dense<0.000000e+00> : vector<2x16xf32>
    %447 = tpu.matmul %445, %19, %cst_124 {dimension_numbers = #tpu.dot_dimension_numbers<[1], [0], [0], [1], [0, 0, 1, 1], [], []>} : vector<2x16xbf16>, vector<16x16xbf16>, vector<2x16xf32> -> vector<2x16xf32>
    %448 = arith.addf %446, %447 : vector<2x16xf32>
    %449 = arith.negf %448 : vector<2x16xf32>
    %450 = math.exp %449 : vector<2x16xf32>
    %cst_125 = arith.constant 1.000000e+00 : f32
    %451 = vector.broadcast %cst_125 : f32 to vector<2x16xf32>
    %452 = arith.addf %451, %450 : vector<2x16xf32>
    %453 = arith.divf %451, %452 : vector<2x16xf32>
    %454 = vector.extract_strided_slice %444 {offsets = [0, 16], sizes = [2, 16], strides = [1, 1]} : vector<2x48xf32> to vector<2x16xf32>
    %cst_126 = arith.constant dense<0.000000e+00> : vector<2x16xf32>
    %455 = tpu.matmul %445, %20, %cst_126 {dimension_numbers = #tpu.dot_dimension_numbers<[1], [0], [0], [1], [0, 0, 1, 1], [], []>} : vector<2x16xbf16>, vector<16x16xbf16>, vector<2x16xf32> -> vector<2x16xf32>
    %456 = arith.addf %454, %455 : vector<2x16xf32>
    %457 = arith.negf %456 : vector<2x16xf32>
    %458 = math.exp %457 : vector<2x16xf32>
    %cst_127 = arith.constant 1.000000e+00 : f32
    %459 = vector.broadcast %cst_127 : f32 to vector<2x16xf32>
    %460 = arith.addf %459, %458 : vector<2x16xf32>
    %461 = arith.divf %459, %460 : vector<2x16xf32>
    %462 = vector.extract_strided_slice %444 {offsets = [0, 32], sizes = [2, 16], strides = [1, 1]} : vector<2x48xf32> to vector<2x16xf32>
    %cst_128 = arith.constant dense<0.000000e+00> : vector<2x16xf32>
    %463 = tpu.matmul %445, %21, %cst_128 {dimension_numbers = #tpu.dot_dimension_numbers<[1], [0], [0], [1], [0, 0, 1, 1], [], []>} : vector<2x16xbf16>, vector<16x16xbf16>, vector<2x16xf32> -> vector<2x16xf32>
    %464 = vector.broadcast %2 : vector<1x16xf32> to vector<2x16xf32>
    %465 = arith.addf %463, %464 : vector<2x16xf32>
    %466 = arith.mulf %453, %465 : vector<2x16xf32>
    %467 = arith.addf %462, %466 : vector<2x16xf32>
    %468 = math.tanh %467 : vector<2x16xf32>
    %469 = arith.subf %443, %468 : vector<2x16xf32>
    %470 = arith.mulf %461, %469 : vector<2x16xf32>
    %471 = arith.addf %468, %470 : vector<2x16xf32>
    %c2_129 = arith.constant 2 : index
    %c0_130 = arith.constant 0 : index
    %472 = vector.load %arg7[%c2_129, %c0_130] : memref<10x16xf32, #tpu.memory_space<vmem>>, vector<2x16xf32>
    tpu.vector_store %arg7[%c2_129, %c0_130], %471 {strides = array<i32>} : memref<10x16xf32, #tpu.memory_space<vmem>>, vector<2x16xf32>,
    %c0_131 = arith.constant 0 : index
    %c0_132 = arith.constant 0 : index
    %473 = vector.load %arg6[%c0_131, %c0_132] : memref<16x48xf32, #tpu.memory_space<vmem>>, vector<2x48xf32>
    %474 = arith.truncf %471 : vector<2x16xf32> to vector<2x16xbf16>
    %475 = vector.extract_strided_slice %473 {offsets = [0, 0], sizes = [2, 16], strides = [1, 1]} : vector<2x48xf32> to vector<2x16xf32>
    %cst_133 = arith.constant dense<0.000000e+00> : vector<2x16xf32>
    %476 = tpu.matmul %474, %19, %cst_133 {dimension_numbers = #tpu.dot_dimension_numbers<[1], [0], [0], [1], [0, 0, 1, 1], [], []>} : vector<2x16xbf16>, vector<16x16xbf16>, vector<2x16xf32> -> vector<2x16xf32>
    %477 = arith.addf %475, %476 : vector<2x16xf32>
    %478 = arith.negf %477 : vector<2x16xf32>
    %479 = math.exp %478 : vector<2x16xf32>
    %cst_134 = arith.constant 1.000000e+00 : f32
    %480 = vector.broadcast %cst_134 : f32 to vector<2x16xf32>
    %481 = arith.addf %480, %479 : vector<2x16xf32>
    %482 = arith.divf %480, %481 : vector<2x16xf32>
    %483 = vector.extract_strided_slice %473 {offsets = [0, 16], sizes = [2, 16], strides = [1, 1]} : vector<2x48xf32> to vector<2x16xf32>
    %cst_135 = arith.constant dense<0.000000e+00> : vector<2x16xf32>
    %484 = tpu.matmul %474, %20, %cst_135 {dimension_numbers = #tpu.dot_dimension_numbers<[1], [0], [0], [1], [0, 0, 1, 1], [], []>} : vector<2x16xbf16>, vector<16x16xbf16>, vector<2x16xf32> -> vector<2x16xf32>
    %485 = arith.addf %483, %484 : vector<2x16xf32>
    %486 = arith.negf %485 : vector<2x16xf32>
    %487 = math.exp %486 : vector<2x16xf32>
    %cst_136 = arith.constant 1.000000e+00 : f32
    %488 = vector.broadcast %cst_136 : f32 to vector<2x16xf32>
    %489 = arith.addf %488, %487 : vector<2x16xf32>
    %490 = arith.divf %488, %489 : vector<2x16xf32>
    %491 = vector.extract_strided_slice %473 {offsets = [0, 32], sizes = [2, 16], strides = [1, 1]} : vector<2x48xf32> to vector<2x16xf32>
    %cst_137 = arith.constant dense<0.000000e+00> : vector<2x16xf32>
    %492 = tpu.matmul %474, %21, %cst_137 {dimension_numbers = #tpu.dot_dimension_numbers<[1], [0], [0], [1], [0, 0, 1, 1], [], []>} : vector<2x16xbf16>, vector<16x16xbf16>, vector<2x16xf32> -> vector<2x16xf32>
    %493 = vector.broadcast %2 : vector<1x16xf32> to vector<2x16xf32>
    %494 = arith.addf %492, %493 : vector<2x16xf32>
    %495 = arith.mulf %482, %494 : vector<2x16xf32>
    %496 = arith.addf %491, %495 : vector<2x16xf32>
    %497 = math.tanh %496 : vector<2x16xf32>
    %498 = arith.subf %471, %497 : vector<2x16xf32>
    %499 = arith.mulf %490, %498 : vector<2x16xf32>
    %500 = arith.addf %497, %499 : vector<2x16xf32>
    %c2_138 = arith.constant 2 : index
    %c0_139 = arith.constant 0 : index
    %501 = vector.load %arg6[%c2_138, %c0_139] : memref<16x48xf32, #tpu.memory_space<vmem>>, vector<2x48xf32>
    %502 = arith.truncf %500 : vector<2x16xf32> to vector<2x16xbf16>
    %503 = vector.extract_strided_slice %501 {offsets = [0, 0], sizes = [2, 16], strides = [1, 1]} : vector<2x48xf32> to vector<2x16xf32>
    %cst_140 = arith.constant dense<0.000000e+00> : vector<2x16xf32>
    %504 = tpu.matmul %502, %19, %cst_140 {dimension_numbers = #tpu.dot_dimension_numbers<[1], [0], [0], [1], [0, 0, 1, 1], [], []>} : vector<2x16xbf16>, vector<16x16xbf16>, vector<2x16xf32> -> vector<2x16xf32>
    %505 = arith.addf %503, %504 : vector<2x16xf32>
    %506 = arith.negf %505 : vector<2x16xf32>
    %507 = math.exp %506 : vector<2x16xf32>
    %cst_141 = arith.constant 1.000000e+00 : f32
    %508 = vector.broadcast %cst_141 : f32 to vector<2x16xf32>
    %509 = arith.addf %508, %507 : vector<2x16xf32>
    %510 = arith.divf %508, %509 : vector<2x16xf32>
    %511 = vector.extract_strided_slice %501 {offsets = [0, 16], sizes = [2, 16], strides = [1, 1]} : vector<2x48xf32> to vector<2x16xf32>
    %cst_142 = arith.constant dense<0.000000e+00> : vector<2x16xf32>
    %512 = tpu.matmul %502, %20, %cst_142 {dimension_numbers = #tpu.dot_dimension_numbers<[1], [0], [0], [1], [0, 0, 1, 1], [], []>} : vector<2x16xbf16>, vector<16x16xbf16>, vector<2x16xf32> -> vector<2x16xf32>
    %513 = arith.addf %511, %512 : vector<2x16xf32>
    %514 = arith.negf %513 : vector<2x16xf32>
    %515 = math.exp %514 : vector<2x16xf32>
    %cst_143 = arith.constant 1.000000e+00 : f32
    %516 = vector.broadcast %cst_143 : f32 to vector<2x16xf32>
    %517 = arith.addf %516, %515 : vector<2x16xf32>
    %518 = arith.divf %516, %517 : vector<2x16xf32>
    %519 = vector.extract_strided_slice %501 {offsets = [0, 32], sizes = [2, 16], strides = [1, 1]} : vector<2x48xf32> to vector<2x16xf32>
    %cst_144 = arith.constant dense<0.000000e+00> : vector<2x16xf32>
    %520 = tpu.matmul %502, %21, %cst_144 {dimension_numbers = #tpu.dot_dimension_numbers<[1], [0], [0], [1], [0, 0, 1, 1], [], []>} : vector<2x16xbf16>, vector<16x16xbf16>, vector<2x16xf32> -> vector<2x16xf32>
    %521 = vector.broadcast %2 : vector<1x16xf32> to vector<2x16xf32>
    %522 = arith.addf %520, %521 : vector<2x16xf32>
    %523 = arith.mulf %510, %522 : vector<2x16xf32>
    %524 = arith.addf %519, %523 : vector<2x16xf32>
    %525 = math.tanh %524 : vector<2x16xf32>
    %526 = arith.subf %500, %525 : vector<2x16xf32>
    %527 = arith.mulf %518, %526 : vector<2x16xf32>
    %528 = arith.addf %525, %527 : vector<2x16xf32>
    %c4_145 = arith.constant 4 : index
    %c0_146 = arith.constant 0 : index
    %529 = vector.load %arg6[%c4_145, %c0_146] : memref<16x48xf32, #tpu.memory_space<vmem>>, vector<2x48xf32>
    %530 = arith.truncf %528 : vector<2x16xf32> to vector<2x16xbf16>
    %531 = vector.extract_strided_slice %529 {offsets = [0, 0], sizes = [2, 16], strides = [1, 1]} : vector<2x48xf32> to vector<2x16xf32>
    %cst_147 = arith.constant dense<0.000000e+00> : vector<2x16xf32>
    %532 = tpu.matmul %530, %19, %cst_147 {dimension_numbers = #tpu.dot_dimension_numbers<[1], [0], [0], [1], [0, 0, 1, 1], [], []>} : vector<2x16xbf16>, vector<16x16xbf16>, vector<2x16xf32> -> vector<2x16xf32>
    %533 = arith.addf %531, %532 : vector<2x16xf32>
    %534 = arith.negf %533 : vector<2x16xf32>
    %535 = math.exp %534 : vector<2x16xf32>
    %cst_148 = arith.constant 1.000000e+00 : f32
    %536 = vector.broadcast %cst_148 : f32 to vector<2x16xf32>
    %537 = arith.addf %536, %535 : vector<2x16xf32>
    %538 = arith.divf %536, %537 : vector<2x16xf32>
    %539 = vector.extract_strided_slice %529 {offsets = [0, 16], sizes = [2, 16], strides = [1, 1]} : vector<2x48xf32> to vector<2x16xf32>
    %cst_149 = arith.constant dense<0.000000e+00> : vector<2x16xf32>
    %540 = tpu.matmul %530, %20, %cst_149 {dimension_numbers = #tpu.dot_dimension_numbers<[1], [0], [0], [1], [0, 0, 1, 1], [], []>} : vector<2x16xbf16>, vector<16x16xbf16>, vector<2x16xf32> -> vector<2x16xf32>
    %541 = arith.addf %539, %540 : vector<2x16xf32>
    %542 = arith.negf %541 : vector<2x16xf32>
    %543 = math.exp %542 : vector<2x16xf32>
    %cst_150 = arith.constant 1.000000e+00 : f32
    %544 = vector.broadcast %cst_150 : f32 to vector<2x16xf32>
    %545 = arith.addf %544, %543 : vector<2x16xf32>
    %546 = arith.divf %544, %545 : vector<2x16xf32>
    %547 = vector.extract_strided_slice %529 {offsets = [0, 32], sizes = [2, 16], strides = [1, 1]} : vector<2x48xf32> to vector<2x16xf32>
    %cst_151 = arith.constant dense<0.000000e+00> : vector<2x16xf32>
    %548 = tpu.matmul %530, %21, %cst_151 {dimension_numbers = #tpu.dot_dimension_numbers<[1], [0], [0], [1], [0, 0, 1, 1], [], []>} : vector<2x16xbf16>, vector<16x16xbf16>, vector<2x16xf32> -> vector<2x16xf32>
    %549 = vector.broadcast %2 : vector<1x16xf32> to vector<2x16xf32>
    %550 = arith.addf %548, %549 : vector<2x16xf32>
    %551 = arith.mulf %538, %550 : vector<2x16xf32>
    %552 = arith.addf %547, %551 : vector<2x16xf32>
    %553 = math.tanh %552 : vector<2x16xf32>
    %554 = arith.subf %528, %553 : vector<2x16xf32>
    %555 = arith.mulf %546, %554 : vector<2x16xf32>
    %556 = arith.addf %553, %555 : vector<2x16xf32>
    %c6_152 = arith.constant 6 : index
    %c0_153 = arith.constant 0 : index
    %557 = vector.load %arg6[%c6_152, %c0_153] : memref<16x48xf32, #tpu.memory_space<vmem>>, vector<2x48xf32>
    %558 = arith.truncf %556 : vector<2x16xf32> to vector<2x16xbf16>
    %559 = vector.extract_strided_slice %557 {offsets = [0, 0], sizes = [2, 16], strides = [1, 1]} : vector<2x48xf32> to vector<2x16xf32>
    %cst_154 = arith.constant dense<0.000000e+00> : vector<2x16xf32>
    %560 = tpu.matmul %558, %19, %cst_154 {dimension_numbers = #tpu.dot_dimension_numbers<[1], [0], [0], [1], [0, 0, 1, 1], [], []>} : vector<2x16xbf16>, vector<16x16xbf16>, vector<2x16xf32> -> vector<2x16xf32>
    %561 = arith.addf %559, %560 : vector<2x16xf32>
    %562 = arith.negf %561 : vector<2x16xf32>
    %563 = math.exp %562 : vector<2x16xf32>
    %cst_155 = arith.constant 1.000000e+00 : f32
    %564 = vector.broadcast %cst_155 : f32 to vector<2x16xf32>
    %565 = arith.addf %564, %563 : vector<2x16xf32>
    %566 = arith.divf %564, %565 : vector<2x16xf32>
    %567 = vector.extract_strided_slice %557 {offsets = [0, 16], sizes = [2, 16], strides = [1, 1]} : vector<2x48xf32> to vector<2x16xf32>
    %cst_156 = arith.constant dense<0.000000e+00> : vector<2x16xf32>
    %568 = tpu.matmul %558, %20, %cst_156 {dimension_numbers = #tpu.dot_dimension_numbers<[1], [0], [0], [1], [0, 0, 1, 1], [], []>} : vector<2x16xbf16>, vector<16x16xbf16>, vector<2x16xf32> -> vector<2x16xf32>
    %569 = arith.addf %567, %568 : vector<2x16xf32>
    %570 = arith.negf %569 : vector<2x16xf32>
    %571 = math.exp %570 : vector<2x16xf32>
    %cst_157 = arith.constant 1.000000e+00 : f32
    %572 = vector.broadcast %cst_157 : f32 to vector<2x16xf32>
    %573 = arith.addf %572, %571 : vector<2x16xf32>
    %574 = arith.divf %572, %573 : vector<2x16xf32>
    %575 = vector.extract_strided_slice %557 {offsets = [0, 32], sizes = [2, 16], strides = [1, 1]} : vector<2x48xf32> to vector<2x16xf32>
    %cst_158 = arith.constant dense<0.000000e+00> : vector<2x16xf32>
    %576 = tpu.matmul %558, %21, %cst_158 {dimension_numbers = #tpu.dot_dimension_numbers<[1], [0], [0], [1], [0, 0, 1, 1], [], []>} : vector<2x16xbf16>, vector<16x16xbf16>, vector<2x16xf32> -> vector<2x16xf32>
    %577 = vector.broadcast %2 : vector<1x16xf32> to vector<2x16xf32>
    %578 = arith.addf %576, %577 : vector<2x16xf32>
    %579 = arith.mulf %566, %578 : vector<2x16xf32>
    %580 = arith.addf %575, %579 : vector<2x16xf32>
    %581 = math.tanh %580 : vector<2x16xf32>
    %582 = arith.subf %556, %581 : vector<2x16xf32>
    %583 = arith.mulf %574, %582 : vector<2x16xf32>
    %584 = arith.addf %581, %583 : vector<2x16xf32>
    %c8_159 = arith.constant 8 : index
    %c0_160 = arith.constant 0 : index
    %585 = vector.load %arg6[%c8_159, %c0_160] : memref<16x48xf32, #tpu.memory_space<vmem>>, vector<2x48xf32>
    %586 = arith.truncf %584 : vector<2x16xf32> to vector<2x16xbf16>
    %587 = vector.extract_strided_slice %585 {offsets = [0, 0], sizes = [2, 16], strides = [1, 1]} : vector<2x48xf32> to vector<2x16xf32>
    %cst_161 = arith.constant dense<0.000000e+00> : vector<2x16xf32>
    %588 = tpu.matmul %586, %19, %cst_161 {dimension_numbers = #tpu.dot_dimension_numbers<[1], [0], [0], [1], [0, 0, 1, 1], [], []>} : vector<2x16xbf16>, vector<16x16xbf16>, vector<2x16xf32> -> vector<2x16xf32>
    %589 = arith.addf %587, %588 : vector<2x16xf32>
    %590 = arith.negf %589 : vector<2x16xf32>
    %591 = math.exp %590 : vector<2x16xf32>
    %cst_162 = arith.constant 1.000000e+00 : f32
    %592 = vector.broadcast %cst_162 : f32 to vector<2x16xf32>
    %593 = arith.addf %592, %591 : vector<2x16xf32>
    %594 = arith.divf %592, %593 : vector<2x16xf32>
    %595 = vector.extract_strided_slice %585 {offsets = [0, 16], sizes = [2, 16], strides = [1, 1]} : vector<2x48xf32> to vector<2x16xf32>
    %cst_163 = arith.constant dense<0.000000e+00> : vector<2x16xf32>
    %596 = tpu.matmul %586, %20, %cst_163 {dimension_numbers = #tpu.dot_dimension_numbers<[1], [0], [0], [1], [0, 0, 1, 1], [], []>} : vector<2x16xbf16>, vector<16x16xbf16>, vector<2x16xf32> -> vector<2x16xf32>
    %597 = arith.addf %595, %596 : vector<2x16xf32>
    %598 = arith.negf %597 : vector<2x16xf32>
    %599 = math.exp %598 : vector<2x16xf32>
    %cst_164 = arith.constant 1.000000e+00 : f32
    %600 = vector.broadcast %cst_164 : f32 to vector<2x16xf32>
    %601 = arith.addf %600, %599 : vector<2x16xf32>
    %602 = arith.divf %600, %601 : vector<2x16xf32>
    %603 = vector.extract_strided_slice %585 {offsets = [0, 32], sizes = [2, 16], strides = [1, 1]} : vector<2x48xf32> to vector<2x16xf32>
    %cst_165 = arith.constant dense<0.000000e+00> : vector<2x16xf32>
    %604 = tpu.matmul %586, %21, %cst_165 {dimension_numbers = #tpu.dot_dimension_numbers<[1], [0], [0], [1], [0, 0, 1, 1], [], []>} : vector<2x16xbf16>, vector<16x16xbf16>, vector<2x16xf32> -> vector<2x16xf32>
    %605 = vector.broadcast %2 : vector<1x16xf32> to vector<2x16xf32>
    %606 = arith.addf %604, %605 : vector<2x16xf32>
    %607 = arith.mulf %594, %606 : vector<2x16xf32>
    %608 = arith.addf %603, %607 : vector<2x16xf32>
    %609 = math.tanh %608 : vector<2x16xf32>
    %610 = arith.subf %584, %609 : vector<2x16xf32>
    %611 = arith.mulf %602, %610 : vector<2x16xf32>
    %612 = arith.addf %609, %611 : vector<2x16xf32>
    %c10_166 = arith.constant 10 : index
    %c0_167 = arith.constant 0 : index
    %613 = vector.load %arg6[%c10_166, %c0_167] : memref<16x48xf32, #tpu.memory_space<vmem>>, vector<2x48xf32>
    %614 = arith.truncf %612 : vector<2x16xf32> to vector<2x16xbf16>
    %615 = vector.extract_strided_slice %613 {offsets = [0, 0], sizes = [2, 16], strides = [1, 1]} : vector<2x48xf32> to vector<2x16xf32>
    %cst_168 = arith.constant dense<0.000000e+00> : vector<2x16xf32>
    %616 = tpu.matmul %614, %19, %cst_168 {dimension_numbers = #tpu.dot_dimension_numbers<[1], [0], [0], [1], [0, 0, 1, 1], [], []>} : vector<2x16xbf16>, vector<16x16xbf16>, vector<2x16xf32> -> vector<2x16xf32>
    %617 = arith.addf %615, %616 : vector<2x16xf32>
    %618 = arith.negf %617 : vector<2x16xf32>
    %619 = math.exp %618 : vector<2x16xf32>
    %cst_169 = arith.constant 1.000000e+00 : f32
    %620 = vector.broadcast %cst_169 : f32 to vector<2x16xf32>
    %621 = arith.addf %620, %619 : vector<2x16xf32>
    %622 = arith.divf %620, %621 : vector<2x16xf32>
    %623 = vector.extract_strided_slice %613 {offsets = [0, 16], sizes = [2, 16], strides = [1, 1]} : vector<2x48xf32> to vector<2x16xf32>
    %cst_170 = arith.constant dense<0.000000e+00> : vector<2x16xf32>
    %624 = tpu.matmul %614, %20, %cst_170 {dimension_numbers = #tpu.dot_dimension_numbers<[1], [0], [0], [1], [0, 0, 1, 1], [], []>} : vector<2x16xbf16>, vector<16x16xbf16>, vector<2x16xf32> -> vector<2x16xf32>
    %625 = arith.addf %623, %624 : vector<2x16xf32>
    %626 = arith.negf %625 : vector<2x16xf32>
    %627 = math.exp %626 : vector<2x16xf32>
    %cst_171 = arith.constant 1.000000e+00 : f32
    %628 = vector.broadcast %cst_171 : f32 to vector<2x16xf32>
    %629 = arith.addf %628, %627 : vector<2x16xf32>
    %630 = arith.divf %628, %629 : vector<2x16xf32>
    %631 = vector.extract_strided_slice %613 {offsets = [0, 32], sizes = [2, 16], strides = [1, 1]} : vector<2x48xf32> to vector<2x16xf32>
    %cst_172 = arith.constant dense<0.000000e+00> : vector<2x16xf32>
    %632 = tpu.matmul %614, %21, %cst_172 {dimension_numbers = #tpu.dot_dimension_numbers<[1], [0], [0], [1], [0, 0, 1, 1], [], []>} : vector<2x16xbf16>, vector<16x16xbf16>, vector<2x16xf32> -> vector<2x16xf32>
    %633 = vector.broadcast %2 : vector<1x16xf32> to vector<2x16xf32>
    %634 = arith.addf %632, %633 : vector<2x16xf32>
    %635 = arith.mulf %622, %634 : vector<2x16xf32>
    %636 = arith.addf %631, %635 : vector<2x16xf32>
    %637 = math.tanh %636 : vector<2x16xf32>
    %638 = arith.subf %612, %637 : vector<2x16xf32>
    %639 = arith.mulf %630, %638 : vector<2x16xf32>
    %640 = arith.addf %637, %639 : vector<2x16xf32>
    %c12_173 = arith.constant 12 : index
    %c0_174 = arith.constant 0 : index
    %641 = vector.load %arg6[%c12_173, %c0_174] : memref<16x48xf32, #tpu.memory_space<vmem>>, vector<2x48xf32>
    %642 = arith.truncf %640 : vector<2x16xf32> to vector<2x16xbf16>
    %643 = vector.extract_strided_slice %641 {offsets = [0, 0], sizes = [2, 16], strides = [1, 1]} : vector<2x48xf32> to vector<2x16xf32>
    %cst_175 = arith.constant dense<0.000000e+00> : vector<2x16xf32>
    %644 = tpu.matmul %642, %19, %cst_175 {dimension_numbers = #tpu.dot_dimension_numbers<[1], [0], [0], [1], [0, 0, 1, 1], [], []>} : vector<2x16xbf16>, vector<16x16xbf16>, vector<2x16xf32> -> vector<2x16xf32>
    %645 = arith.addf %643, %644 : vector<2x16xf32>
    %646 = arith.negf %645 : vector<2x16xf32>
    %647 = math.exp %646 : vector<2x16xf32>
    %cst_176 = arith.constant 1.000000e+00 : f32
    %648 = vector.broadcast %cst_176 : f32 to vector<2x16xf32>
    %649 = arith.addf %648, %647 : vector<2x16xf32>
    %650 = arith.divf %648, %649 : vector<2x16xf32>
    %651 = vector.extract_strided_slice %641 {offsets = [0, 16], sizes = [2, 16], strides = [1, 1]} : vector<2x48xf32> to vector<2x16xf32>
    %cst_177 = arith.constant dense<0.000000e+00> : vector<2x16xf32>
    %652 = tpu.matmul %642, %20, %cst_177 {dimension_numbers = #tpu.dot_dimension_numbers<[1], [0], [0], [1], [0, 0, 1, 1], [], []>} : vector<2x16xbf16>, vector<16x16xbf16>, vector<2x16xf32> -> vector<2x16xf32>
    %653 = arith.addf %651, %652 : vector<2x16xf32>
    %654 = arith.negf %653 : vector<2x16xf32>
    %655 = math.exp %654 : vector<2x16xf32>
    %cst_178 = arith.constant 1.000000e+00 : f32
    %656 = vector.broadcast %cst_178 : f32 to vector<2x16xf32>
    %657 = arith.addf %656, %655 : vector<2x16xf32>
    %658 = arith.divf %656, %657 : vector<2x16xf32>
    %659 = vector.extract_strided_slice %641 {offsets = [0, 32], sizes = [2, 16], strides = [1, 1]} : vector<2x48xf32> to vector<2x16xf32>
    %cst_179 = arith.constant dense<0.000000e+00> : vector<2x16xf32>
    %660 = tpu.matmul %642, %21, %cst_179 {dimension_numbers = #tpu.dot_dimension_numbers<[1], [0], [0], [1], [0, 0, 1, 1], [], []>} : vector<2x16xbf16>, vector<16x16xbf16>, vector<2x16xf32> -> vector<2x16xf32>
    %661 = vector.broadcast %2 : vector<1x16xf32> to vector<2x16xf32>
    %662 = arith.addf %660, %661 : vector<2x16xf32>
    %663 = arith.mulf %650, %662 : vector<2x16xf32>
    %664 = arith.addf %659, %663 : vector<2x16xf32>
    %665 = math.tanh %664 : vector<2x16xf32>
    %666 = arith.subf %640, %665 : vector<2x16xf32>
    %667 = arith.mulf %658, %666 : vector<2x16xf32>
    %668 = arith.addf %665, %667 : vector<2x16xf32>
    %c14_180 = arith.constant 14 : index
    %c0_181 = arith.constant 0 : index
    %669 = vector.load %arg6[%c14_180, %c0_181] : memref<16x48xf32, #tpu.memory_space<vmem>>, vector<2x48xf32>
    %670 = arith.truncf %668 : vector<2x16xf32> to vector<2x16xbf16>
    %671 = vector.extract_strided_slice %669 {offsets = [0, 0], sizes = [2, 16], strides = [1, 1]} : vector<2x48xf32> to vector<2x16xf32>
    %cst_182 = arith.constant dense<0.000000e+00> : vector<2x16xf32>
    %672 = tpu.matmul %670, %19, %cst_182 {dimension_numbers = #tpu.dot_dimension_numbers<[1], [0], [0], [1], [0, 0, 1, 1], [], []>} : vector<2x16xbf16>, vector<16x16xbf16>, vector<2x16xf32> -> vector<2x16xf32>
    %673 = arith.addf %671, %672 : vector<2x16xf32>
    %674 = arith.negf %673 : vector<2x16xf32>
    %675 = math.exp %674 : vector<2x16xf32>
    %cst_183 = arith.constant 1.000000e+00 : f32
    %676 = vector.broadcast %cst_183 : f32 to vector<2x16xf32>
    %677 = arith.addf %676, %675 : vector<2x16xf32>
    %678 = arith.divf %676, %677 : vector<2x16xf32>
    %679 = vector.extract_strided_slice %669 {offsets = [0, 16], sizes = [2, 16], strides = [1, 1]} : vector<2x48xf32> to vector<2x16xf32>
    %cst_184 = arith.constant dense<0.000000e+00> : vector<2x16xf32>
    %680 = tpu.matmul %670, %20, %cst_184 {dimension_numbers = #tpu.dot_dimension_numbers<[1], [0], [0], [1], [0, 0, 1, 1], [], []>} : vector<2x16xbf16>, vector<16x16xbf16>, vector<2x16xf32> -> vector<2x16xf32>
    %681 = arith.addf %679, %680 : vector<2x16xf32>
    %682 = arith.negf %681 : vector<2x16xf32>
    %683 = math.exp %682 : vector<2x16xf32>
    %cst_185 = arith.constant 1.000000e+00 : f32
    %684 = vector.broadcast %cst_185 : f32 to vector<2x16xf32>
    %685 = arith.addf %684, %683 : vector<2x16xf32>
    %686 = arith.divf %684, %685 : vector<2x16xf32>
    %687 = vector.extract_strided_slice %669 {offsets = [0, 32], sizes = [2, 16], strides = [1, 1]} : vector<2x48xf32> to vector<2x16xf32>
    %cst_186 = arith.constant dense<0.000000e+00> : vector<2x16xf32>
    %688 = tpu.matmul %670, %21, %cst_186 {dimension_numbers = #tpu.dot_dimension_numbers<[1], [0], [0], [1], [0, 0, 1, 1], [], []>} : vector<2x16xbf16>, vector<16x16xbf16>, vector<2x16xf32> -> vector<2x16xf32>
    %689 = vector.broadcast %2 : vector<1x16xf32> to vector<2x16xf32>
    %690 = arith.addf %688, %689 : vector<2x16xf32>
    %691 = arith.mulf %678, %690 : vector<2x16xf32>
    %692 = arith.addf %687, %691 : vector<2x16xf32>
    %693 = math.tanh %692 : vector<2x16xf32>
    %694 = arith.subf %668, %693 : vector<2x16xf32>
    %695 = arith.mulf %686, %694 : vector<2x16xf32>
    %696 = arith.addf %693, %695 : vector<2x16xf32>
    %c4_187 = arith.constant 4 : index
    %c0_188 = arith.constant 0 : index
    %697 = vector.load %arg7[%c4_187, %c0_188] : memref<10x16xf32, #tpu.memory_space<vmem>>, vector<2x16xf32>
    tpu.vector_store %arg7[%c4_187, %c0_188], %696 {strides = array<i32>} : memref<10x16xf32, #tpu.memory_space<vmem>>, vector<2x16xf32>,
    %c0_189 = arith.constant 0 : index
    %c0_190 = arith.constant 0 : index
    %698 = vector.load %arg6[%c0_189, %c0_190] : memref<16x48xf32, #tpu.memory_space<vmem>>, vector<2x48xf32>
    %699 = arith.truncf %696 : vector<2x16xf32> to vector<2x16xbf16>
    %700 = vector.extract_strided_slice %698 {offsets = [0, 0], sizes = [2, 16], strides = [1, 1]} : vector<2x48xf32> to vector<2x16xf32>
    %cst_191 = arith.constant dense<0.000000e+00> : vector<2x16xf32>
    %701 = tpu.matmul %699, %19, %cst_191 {dimension_numbers = #tpu.dot_dimension_numbers<[1], [0], [0], [1], [0, 0, 1, 1], [], []>} : vector<2x16xbf16>, vector<16x16xbf16>, vector<2x16xf32> -> vector<2x16xf32>
    %702 = arith.addf %700, %701 : vector<2x16xf32>
    %703 = arith.negf %702 : vector<2x16xf32>
    %704 = math.exp %703 : vector<2x16xf32>
    %cst_192 = arith.constant 1.000000e+00 : f32
    %705 = vector.broadcast %cst_192 : f32 to vector<2x16xf32>
    %706 = arith.addf %705, %704 : vector<2x16xf32>
    %707 = arith.divf %705, %706 : vector<2x16xf32>
    %708 = vector.extract_strided_slice %698 {offsets = [0, 16], sizes = [2, 16], strides = [1, 1]} : vector<2x48xf32> to vector<2x16xf32>
    %cst_193 = arith.constant dense<0.000000e+00> : vector<2x16xf32>
    %709 = tpu.matmul %699, %20, %cst_193 {dimension_numbers = #tpu.dot_dimension_numbers<[1], [0], [0], [1], [0, 0, 1, 1], [], []>} : vector<2x16xbf16>, vector<16x16xbf16>, vector<2x16xf32> -> vector<2x16xf32>
    %710 = arith.addf %708, %709 : vector<2x16xf32>
    %711 = arith.negf %710 : vector<2x16xf32>
    %712 = math.exp %711 : vector<2x16xf32>
    %cst_194 = arith.constant 1.000000e+00 : f32
    %713 = vector.broadcast %cst_194 : f32 to vector<2x16xf32>
    %714 = arith.addf %713, %712 : vector<2x16xf32>
    %715 = arith.divf %713, %714 : vector<2x16xf32>
    %716 = vector.extract_strided_slice %698 {offsets = [0, 32], sizes = [2, 16], strides = [1, 1]} : vector<2x48xf32> to vector<2x16xf32>
    %cst_195 = arith.constant dense<0.000000e+00> : vector<2x16xf32>
    %717 = tpu.matmul %699, %21, %cst_195 {dimension_numbers = #tpu.dot_dimension_numbers<[1], [0], [0], [1], [0, 0, 1, 1], [], []>} : vector<2x16xbf16>, vector<16x16xbf16>, vector<2x16xf32> -> vector<2x16xf32>
    %718 = vector.broadcast %2 : vector<1x16xf32> to vector<2x16xf32>
    %719 = arith.addf %717, %718 : vector<2x16xf32>
    %720 = arith.mulf %707, %719 : vector<2x16xf32>
    %721 = arith.addf %716, %720 : vector<2x16xf32>
    %722 = math.tanh %721 : vector<2x16xf32>
    %723 = arith.subf %696, %722 : vector<2x16xf32>
    %724 = arith.mulf %715, %723 : vector<2x16xf32>
    %725 = arith.addf %722, %724 : vector<2x16xf32>
    %c2_196 = arith.constant 2 : index
    %c0_197 = arith.constant 0 : index
    %726 = vector.load %arg6[%c2_196, %c0_197] : memref<16x48xf32, #tpu.memory_space<vmem>>, vector<2x48xf32>
    %727 = arith.truncf %725 : vector<2x16xf32> to vector<2x16xbf16>
    %728 = vector.extract_strided_slice %726 {offsets = [0, 0], sizes = [2, 16], strides = [1, 1]} : vector<2x48xf32> to vector<2x16xf32>
    %cst_198 = arith.constant dense<0.000000e+00> : vector<2x16xf32>
    %729 = tpu.matmul %727, %19, %cst_198 {dimension_numbers = #tpu.dot_dimension_numbers<[1], [0], [0], [1], [0, 0, 1, 1], [], []>} : vector<2x16xbf16>, vector<16x16xbf16>, vector<2x16xf32> -> vector<2x16xf32>
    %730 = arith.addf %728, %729 : vector<2x16xf32>
    %731 = arith.negf %730 : vector<2x16xf32>
    %732 = math.exp %731 : vector<2x16xf32>
    %cst_199 = arith.constant 1.000000e+00 : f32
    %733 = vector.broadcast %cst_199 : f32 to vector<2x16xf32>
    %734 = arith.addf %733, %732 : vector<2x16xf32>
    %735 = arith.divf %733, %734 : vector<2x16xf32>
    %736 = vector.extract_strided_slice %726 {offsets = [0, 16], sizes = [2, 16], strides = [1, 1]} : vector<2x48xf32> to vector<2x16xf32>
    %cst_200 = arith.constant dense<0.000000e+00> : vector<2x16xf32>
    %737 = tpu.matmul %727, %20, %cst_200 {dimension_numbers = #tpu.dot_dimension_numbers<[1], [0], [0], [1], [0, 0, 1, 1], [], []>} : vector<2x16xbf16>, vector<16x16xbf16>, vector<2x16xf32> -> vector<2x16xf32>
    %738 = arith.addf %736, %737 : vector<2x16xf32>
    %739 = arith.negf %738 : vector<2x16xf32>
    %740 = math.exp %739 : vector<2x16xf32>
    %cst_201 = arith.constant 1.000000e+00 : f32
    %741 = vector.broadcast %cst_201 : f32 to vector<2x16xf32>
    %742 = arith.addf %741, %740 : vector<2x16xf32>
    %743 = arith.divf %741, %742 : vector<2x16xf32>
    %744 = vector.extract_strided_slice %726 {offsets = [0, 32], sizes = [2, 16], strides = [1, 1]} : vector<2x48xf32> to vector<2x16xf32>
    %cst_202 = arith.constant dense<0.000000e+00> : vector<2x16xf32>
    %745 = tpu.matmul %727, %21, %cst_202 {dimension_numbers = #tpu.dot_dimension_numbers<[1], [0], [0], [1], [0, 0, 1, 1], [], []>} : vector<2x16xbf16>, vector<16x16xbf16>, vector<2x16xf32> -> vector<2x16xf32>
    %746 = vector.broadcast %2 : vector<1x16xf32> to vector<2x16xf32>
    %747 = arith.addf %745, %746 : vector<2x16xf32>
    %748 = arith.mulf %735, %747 : vector<2x16xf32>
    %749 = arith.addf %744, %748 : vector<2x16xf32>
    %750 = math.tanh %749 : vector<2x16xf32>
    %751 = arith.subf %725, %750 : vector<2x16xf32>
    %752 = arith.mulf %743, %751 : vector<2x16xf32>
    %753 = arith.addf %750, %752 : vector<2x16xf32>
    %c4_203 = arith.constant 4 : index
    %c0_204 = arith.constant 0 : index
    %754 = vector.load %arg6[%c4_203, %c0_204] : memref<16x48xf32, #tpu.memory_space<vmem>>, vector<2x48xf32>
    %755 = arith.truncf %753 : vector<2x16xf32> to vector<2x16xbf16>
    %756 = vector.extract_strided_slice %754 {offsets = [0, 0], sizes = [2, 16], strides = [1, 1]} : vector<2x48xf32> to vector<2x16xf32>
    %cst_205 = arith.constant dense<0.000000e+00> : vector<2x16xf32>
    %757 = tpu.matmul %755, %19, %cst_205 {dimension_numbers = #tpu.dot_dimension_numbers<[1], [0], [0], [1], [0, 0, 1, 1], [], []>} : vector<2x16xbf16>, vector<16x16xbf16>, vector<2x16xf32> -> vector<2x16xf32>
    %758 = arith.addf %756, %757 : vector<2x16xf32>
    %759 = arith.negf %758 : vector<2x16xf32>
    %760 = math.exp %759 : vector<2x16xf32>
    %cst_206 = arith.constant 1.000000e+00 : f32
    %761 = vector.broadcast %cst_206 : f32 to vector<2x16xf32>
    %762 = arith.addf %761, %760 : vector<2x16xf32>
    %763 = arith.divf %761, %762 : vector<2x16xf32>
    %764 = vector.extract_strided_slice %754 {offsets = [0, 16], sizes = [2, 16], strides = [1, 1]} : vector<2x48xf32> to vector<2x16xf32>
    %cst_207 = arith.constant dense<0.000000e+00> : vector<2x16xf32>
    %765 = tpu.matmul %755, %20, %cst_207 {dimension_numbers = #tpu.dot_dimension_numbers<[1], [0], [0], [1], [0, 0, 1, 1], [], []>} : vector<2x16xbf16>, vector<16x16xbf16>, vector<2x16xf32> -> vector<2x16xf32>
    %766 = arith.addf %764, %765 : vector<2x16xf32>
    %767 = arith.negf %766 : vector<2x16xf32>
    %768 = math.exp %767 : vector<2x16xf32>
    %cst_208 = arith.constant 1.000000e+00 : f32
    %769 = vector.broadcast %cst_208 : f32 to vector<2x16xf32>
    %770 = arith.addf %769, %768 : vector<2x16xf32>
    %771 = arith.divf %769, %770 : vector<2x16xf32>
    %772 = vector.extract_strided_slice %754 {offsets = [0, 32], sizes = [2, 16], strides = [1, 1]} : vector<2x48xf32> to vector<2x16xf32>
    %cst_209 = arith.constant dense<0.000000e+00> : vector<2x16xf32>
    %773 = tpu.matmul %755, %21, %cst_209 {dimension_numbers = #tpu.dot_dimension_numbers<[1], [0], [0], [1], [0, 0, 1, 1], [], []>} : vector<2x16xbf16>, vector<16x16xbf16>, vector<2x16xf32> -> vector<2x16xf32>
    %774 = vector.broadcast %2 : vector<1x16xf32> to vector<2x16xf32>
    %775 = arith.addf %773, %774 : vector<2x16xf32>
    %776 = arith.mulf %763, %775 : vector<2x16xf32>
    %777 = arith.addf %772, %776 : vector<2x16xf32>
    %778 = math.tanh %777 : vector<2x16xf32>
    %779 = arith.subf %753, %778 : vector<2x16xf32>
    %780 = arith.mulf %771, %779 : vector<2x16xf32>
    %781 = arith.addf %778, %780 : vector<2x16xf32>
    %c6_210 = arith.constant 6 : index
    %c0_211 = arith.constant 0 : index
    %782 = vector.load %arg6[%c6_210, %c0_211] : memref<16x48xf32, #tpu.memory_space<vmem>>, vector<2x48xf32>
    %783 = arith.truncf %781 : vector<2x16xf32> to vector<2x16xbf16>
    %784 = vector.extract_strided_slice %782 {offsets = [0, 0], sizes = [2, 16], strides = [1, 1]} : vector<2x48xf32> to vector<2x16xf32>
    %cst_212 = arith.constant dense<0.000000e+00> : vector<2x16xf32>
    %785 = tpu.matmul %783, %19, %cst_212 {dimension_numbers = #tpu.dot_dimension_numbers<[1], [0], [0], [1], [0, 0, 1, 1], [], []>} : vector<2x16xbf16>, vector<16x16xbf16>, vector<2x16xf32> -> vector<2x16xf32>
    %786 = arith.addf %784, %785 : vector<2x16xf32>
    %787 = arith.negf %786 : vector<2x16xf32>
    %788 = math.exp %787 : vector<2x16xf32>
    %cst_213 = arith.constant 1.000000e+00 : f32
    %789 = vector.broadcast %cst_213 : f32 to vector<2x16xf32>
    %790 = arith.addf %789, %788 : vector<2x16xf32>
    %791 = arith.divf %789, %790 : vector<2x16xf32>
    %792 = vector.extract_strided_slice %782 {offsets = [0, 16], sizes = [2, 16], strides = [1, 1]} : vector<2x48xf32> to vector<2x16xf32>
    %cst_214 = arith.constant dense<0.000000e+00> : vector<2x16xf32>
    %793 = tpu.matmul %783, %20, %cst_214 {dimension_numbers = #tpu.dot_dimension_numbers<[1], [0], [0], [1], [0, 0, 1, 1], [], []>} : vector<2x16xbf16>, vector<16x16xbf16>, vector<2x16xf32> -> vector<2x16xf32>
    %794 = arith.addf %792, %793 : vector<2x16xf32>
    %795 = arith.negf %794 : vector<2x16xf32>
    %796 = math.exp %795 : vector<2x16xf32>
    %cst_215 = arith.constant 1.000000e+00 : f32
    %797 = vector.broadcast %cst_215 : f32 to vector<2x16xf32>
    %798 = arith.addf %797, %796 : vector<2x16xf32>
    %799 = arith.divf %797, %798 : vector<2x16xf32>
    %800 = vector.extract_strided_slice %782 {offsets = [0, 32], sizes = [2, 16], strides = [1, 1]} : vector<2x48xf32> to vector<2x16xf32>
    %cst_216 = arith.constant dense<0.000000e+00> : vector<2x16xf32>
    %801 = tpu.matmul %783, %21, %cst_216 {dimension_numbers = #tpu.dot_dimension_numbers<[1], [0], [0], [1], [0, 0, 1, 1], [], []>} : vector<2x16xbf16>, vector<16x16xbf16>, vector<2x16xf32> -> vector<2x16xf32>
    %802 = vector.broadcast %2 : vector<1x16xf32> to vector<2x16xf32>
    %803 = arith.addf %801, %802 : vector<2x16xf32>
    %804 = arith.mulf %791, %803 : vector<2x16xf32>
    %805 = arith.addf %800, %804 : vector<2x16xf32>
    %806 = math.tanh %805 : vector<2x16xf32>
    %807 = arith.subf %781, %806 : vector<2x16xf32>
    %808 = arith.mulf %799, %807 : vector<2x16xf32>
    %809 = arith.addf %806, %808 : vector<2x16xf32>
    %c8_217 = arith.constant 8 : index
    %c0_218 = arith.constant 0 : index
    %810 = vector.load %arg6[%c8_217, %c0_218] : memref<16x48xf32, #tpu.memory_space<vmem>>, vector<2x48xf32>
    %811 = arith.truncf %809 : vector<2x16xf32> to vector<2x16xbf16>
    %812 = vector.extract_strided_slice %810 {offsets = [0, 0], sizes = [2, 16], strides = [1, 1]} : vector<2x48xf32> to vector<2x16xf32>
    %cst_219 = arith.constant dense<0.000000e+00> : vector<2x16xf32>
    %813 = tpu.matmul %811, %19, %cst_219 {dimension_numbers = #tpu.dot_dimension_numbers<[1], [0], [0], [1], [0, 0, 1, 1], [], []>} : vector<2x16xbf16>, vector<16x16xbf16>, vector<2x16xf32> -> vector<2x16xf32>
    %814 = arith.addf %812, %813 : vector<2x16xf32>
    %815 = arith.negf %814 : vector<2x16xf32>
    %816 = math.exp %815 : vector<2x16xf32>
    %cst_220 = arith.constant 1.000000e+00 : f32
    %817 = vector.broadcast %cst_220 : f32 to vector<2x16xf32>
    %818 = arith.addf %817, %816 : vector<2x16xf32>
    %819 = arith.divf %817, %818 : vector<2x16xf32>
    %820 = vector.extract_strided_slice %810 {offsets = [0, 16], sizes = [2, 16], strides = [1, 1]} : vector<2x48xf32> to vector<2x16xf32>
    %cst_221 = arith.constant dense<0.000000e+00> : vector<2x16xf32>
    %821 = tpu.matmul %811, %20, %cst_221 {dimension_numbers = #tpu.dot_dimension_numbers<[1], [0], [0], [1], [0, 0, 1, 1], [], []>} : vector<2x16xbf16>, vector<16x16xbf16>, vector<2x16xf32> -> vector<2x16xf32>
    %822 = arith.addf %820, %821 : vector<2x16xf32>
    %823 = arith.negf %822 : vector<2x16xf32>
    %824 = math.exp %823 : vector<2x16xf32>
    %cst_222 = arith.constant 1.000000e+00 : f32
    %825 = vector.broadcast %cst_222 : f32 to vector<2x16xf32>
    %826 = arith.addf %825, %824 : vector<2x16xf32>
    %827 = arith.divf %825, %826 : vector<2x16xf32>
    %828 = vector.extract_strided_slice %810 {offsets = [0, 32], sizes = [2, 16], strides = [1, 1]} : vector<2x48xf32> to vector<2x16xf32>
    %cst_223 = arith.constant dense<0.000000e+00> : vector<2x16xf32>
    %829 = tpu.matmul %811, %21, %cst_223 {dimension_numbers = #tpu.dot_dimension_numbers<[1], [0], [0], [1], [0, 0, 1, 1], [], []>} : vector<2x16xbf16>, vector<16x16xbf16>, vector<2x16xf32> -> vector<2x16xf32>
    %830 = vector.broadcast %2 : vector<1x16xf32> to vector<2x16xf32>
    %831 = arith.addf %829, %830 : vector<2x16xf32>
    %832 = arith.mulf %819, %831 : vector<2x16xf32>
    %833 = arith.addf %828, %832 : vector<2x16xf32>
    %834 = math.tanh %833 : vector<2x16xf32>
    %835 = arith.subf %809, %834 : vector<2x16xf32>
    %836 = arith.mulf %827, %835 : vector<2x16xf32>
    %837 = arith.addf %834, %836 : vector<2x16xf32>
    %c10_224 = arith.constant 10 : index
    %c0_225 = arith.constant 0 : index
    %838 = vector.load %arg6[%c10_224, %c0_225] : memref<16x48xf32, #tpu.memory_space<vmem>>, vector<2x48xf32>
    %839 = arith.truncf %837 : vector<2x16xf32> to vector<2x16xbf16>
    %840 = vector.extract_strided_slice %838 {offsets = [0, 0], sizes = [2, 16], strides = [1, 1]} : vector<2x48xf32> to vector<2x16xf32>
    %cst_226 = arith.constant dense<0.000000e+00> : vector<2x16xf32>
    %841 = tpu.matmul %839, %19, %cst_226 {dimension_numbers = #tpu.dot_dimension_numbers<[1], [0], [0], [1], [0, 0, 1, 1], [], []>} : vector<2x16xbf16>, vector<16x16xbf16>, vector<2x16xf32> -> vector<2x16xf32>
    %842 = arith.addf %840, %841 : vector<2x16xf32>
    %843 = arith.negf %842 : vector<2x16xf32>
    %844 = math.exp %843 : vector<2x16xf32>
    %cst_227 = arith.constant 1.000000e+00 : f32
    %845 = vector.broadcast %cst_227 : f32 to vector<2x16xf32>
    %846 = arith.addf %845, %844 : vector<2x16xf32>
    %847 = arith.divf %845, %846 : vector<2x16xf32>
    %848 = vector.extract_strided_slice %838 {offsets = [0, 16], sizes = [2, 16], strides = [1, 1]} : vector<2x48xf32> to vector<2x16xf32>
    %cst_228 = arith.constant dense<0.000000e+00> : vector<2x16xf32>
    %849 = tpu.matmul %839, %20, %cst_228 {dimension_numbers = #tpu.dot_dimension_numbers<[1], [0], [0], [1], [0, 0, 1, 1], [], []>} : vector<2x16xbf16>, vector<16x16xbf16>, vector<2x16xf32> -> vector<2x16xf32>
    %850 = arith.addf %848, %849 : vector<2x16xf32>
    %851 = arith.negf %850 : vector<2x16xf32>
    %852 = math.exp %851 : vector<2x16xf32>
    %cst_229 = arith.constant 1.000000e+00 : f32
    %853 = vector.broadcast %cst_229 : f32 to vector<2x16xf32>
    %854 = arith.addf %853, %852 : vector<2x16xf32>
    %855 = arith.divf %853, %854 : vector<2x16xf32>
    %856 = vector.extract_strided_slice %838 {offsets = [0, 32], sizes = [2, 16], strides = [1, 1]} : vector<2x48xf32> to vector<2x16xf32>
    %cst_230 = arith.constant dense<0.000000e+00> : vector<2x16xf32>
    %857 = tpu.matmul %839, %21, %cst_230 {dimension_numbers = #tpu.dot_dimension_numbers<[1], [0], [0], [1], [0, 0, 1, 1], [], []>} : vector<2x16xbf16>, vector<16x16xbf16>, vector<2x16xf32> -> vector<2x16xf32>
    %858 = vector.broadcast %2 : vector<1x16xf32> to vector<2x16xf32>
    %859 = arith.addf %857, %858 : vector<2x16xf32>
    %860 = arith.mulf %847, %859 : vector<2x16xf32>
    %861 = arith.addf %856, %860 : vector<2x16xf32>
    %862 = math.tanh %861 : vector<2x16xf32>
    %863 = arith.subf %837, %862 : vector<2x16xf32>
    %864 = arith.mulf %855, %863 : vector<2x16xf32>
    %865 = arith.addf %862, %864 : vector<2x16xf32>
    %c12_231 = arith.constant 12 : index
    %c0_232 = arith.constant 0 : index
    %866 = vector.load %arg6[%c12_231, %c0_232] : memref<16x48xf32, #tpu.memory_space<vmem>>, vector<2x48xf32>
    %867 = arith.truncf %865 : vector<2x16xf32> to vector<2x16xbf16>
    %868 = vector.extract_strided_slice %866 {offsets = [0, 0], sizes = [2, 16], strides = [1, 1]} : vector<2x48xf32> to vector<2x16xf32>
    %cst_233 = arith.constant dense<0.000000e+00> : vector<2x16xf32>
    %869 = tpu.matmul %867, %19, %cst_233 {dimension_numbers = #tpu.dot_dimension_numbers<[1], [0], [0], [1], [0, 0, 1, 1], [], []>} : vector<2x16xbf16>, vector<16x16xbf16>, vector<2x16xf32> -> vector<2x16xf32>
    %870 = arith.addf %868, %869 : vector<2x16xf32>
    %871 = arith.negf %870 : vector<2x16xf32>
    %872 = math.exp %871 : vector<2x16xf32>
    %cst_234 = arith.constant 1.000000e+00 : f32
    %873 = vector.broadcast %cst_234 : f32 to vector<2x16xf32>
    %874 = arith.addf %873, %872 : vector<2x16xf32>
    %875 = arith.divf %873, %874 : vector<2x16xf32>
    %876 = vector.extract_strided_slice %866 {offsets = [0, 16], sizes = [2, 16], strides = [1, 1]} : vector<2x48xf32> to vector<2x16xf32>
    %cst_235 = arith.constant dense<0.000000e+00> : vector<2x16xf32>
    %877 = tpu.matmul %867, %20, %cst_235 {dimension_numbers = #tpu.dot_dimension_numbers<[1], [0], [0], [1], [0, 0, 1, 1], [], []>} : vector<2x16xbf16>, vector<16x16xbf16>, vector<2x16xf32> -> vector<2x16xf32>
    %878 = arith.addf %876, %877 : vector<2x16xf32>
    %879 = arith.negf %878 : vector<2x16xf32>
    %880 = math.exp %879 : vector<2x16xf32>
    %cst_236 = arith.constant 1.000000e+00 : f32
    %881 = vector.broadcast %cst_236 : f32 to vector<2x16xf32>
    %882 = arith.addf %881, %880 : vector<2x16xf32>
    %883 = arith.divf %881, %882 : vector<2x16xf32>
    %884 = vector.extract_strided_slice %866 {offsets = [0, 32], sizes = [2, 16], strides = [1, 1]} : vector<2x48xf32> to vector<2x16xf32>
    %cst_237 = arith.constant dense<0.000000e+00> : vector<2x16xf32>
    %885 = tpu.matmul %867, %21, %cst_237 {dimension_numbers = #tpu.dot_dimension_numbers<[1], [0], [0], [1], [0, 0, 1, 1], [], []>} : vector<2x16xbf16>, vector<16x16xbf16>, vector<2x16xf32> -> vector<2x16xf32>
    %886 = vector.broadcast %2 : vector<1x16xf32> to vector<2x16xf32>
    %887 = arith.addf %885, %886 : vector<2x16xf32>
    %888 = arith.mulf %875, %887 : vector<2x16xf32>
    %889 = arith.addf %884, %888 : vector<2x16xf32>
    %890 = math.tanh %889 : vector<2x16xf32>
    %891 = arith.subf %865, %890 : vector<2x16xf32>
    %892 = arith.mulf %883, %891 : vector<2x16xf32>
    %893 = arith.addf %890, %892 : vector<2x16xf32>
    %c14_238 = arith.constant 14 : index
    %c0_239 = arith.constant 0 : index
    %894 = vector.load %arg6[%c14_238, %c0_239] : memref<16x48xf32, #tpu.memory_space<vmem>>, vector<2x48xf32>
    %895 = arith.truncf %893 : vector<2x16xf32> to vector<2x16xbf16>
    %896 = vector.extract_strided_slice %894 {offsets = [0, 0], sizes = [2, 16], strides = [1, 1]} : vector<2x48xf32> to vector<2x16xf32>
    %cst_240 = arith.constant dense<0.000000e+00> : vector<2x16xf32>
    %897 = tpu.matmul %895, %19, %cst_240 {dimension_numbers = #tpu.dot_dimension_numbers<[1], [0], [0], [1], [0, 0, 1, 1], [], []>} : vector<2x16xbf16>, vector<16x16xbf16>, vector<2x16xf32> -> vector<2x16xf32>
    %898 = arith.addf %896, %897 : vector<2x16xf32>
    %899 = arith.negf %898 : vector<2x16xf32>
    %900 = math.exp %899 : vector<2x16xf32>
    %cst_241 = arith.constant 1.000000e+00 : f32
    %901 = vector.broadcast %cst_241 : f32 to vector<2x16xf32>
    %902 = arith.addf %901, %900 : vector<2x16xf32>
    %903 = arith.divf %901, %902 : vector<2x16xf32>
    %904 = vector.extract_strided_slice %894 {offsets = [0, 16], sizes = [2, 16], strides = [1, 1]} : vector<2x48xf32> to vector<2x16xf32>
    %cst_242 = arith.constant dense<0.000000e+00> : vector<2x16xf32>
    %905 = tpu.matmul %895, %20, %cst_242 {dimension_numbers = #tpu.dot_dimension_numbers<[1], [0], [0], [1], [0, 0, 1, 1], [], []>} : vector<2x16xbf16>, vector<16x16xbf16>, vector<2x16xf32> -> vector<2x16xf32>
    %906 = arith.addf %904, %905 : vector<2x16xf32>
    %907 = arith.negf %906 : vector<2x16xf32>
    %908 = math.exp %907 : vector<2x16xf32>
    %cst_243 = arith.constant 1.000000e+00 : f32
    %909 = vector.broadcast %cst_243 : f32 to vector<2x16xf32>
    %910 = arith.addf %909, %908 : vector<2x16xf32>
    %911 = arith.divf %909, %910 : vector<2x16xf32>
    %912 = vector.extract_strided_slice %894 {offsets = [0, 32], sizes = [2, 16], strides = [1, 1]} : vector<2x48xf32> to vector<2x16xf32>
    %cst_244 = arith.constant dense<0.000000e+00> : vector<2x16xf32>
    %913 = tpu.matmul %895, %21, %cst_244 {dimension_numbers = #tpu.dot_dimension_numbers<[1], [0], [0], [1], [0, 0, 1, 1], [], []>} : vector<2x16xbf16>, vector<16x16xbf16>, vector<2x16xf32> -> vector<2x16xf32>
    %914 = vector.broadcast %2 : vector<1x16xf32> to vector<2x16xf32>
    %915 = arith.addf %913, %914 : vector<2x16xf32>
    %916 = arith.mulf %903, %915 : vector<2x16xf32>
    %917 = arith.addf %912, %916 : vector<2x16xf32>
    %918 = math.tanh %917 : vector<2x16xf32>
    %919 = arith.subf %893, %918 : vector<2x16xf32>
    %920 = arith.mulf %911, %919 : vector<2x16xf32>
    %921 = arith.addf %918, %920 : vector<2x16xf32>
    %c6_245 = arith.constant 6 : index
    %c0_246 = arith.constant 0 : index
    %922 = vector.load %arg7[%c6_245, %c0_246] : memref<10x16xf32, #tpu.memory_space<vmem>>, vector<2x16xf32>
    tpu.vector_store %arg7[%c6_245, %c0_246], %921 {strides = array<i32>} : memref<10x16xf32, #tpu.memory_space<vmem>>, vector<2x16xf32>,
    %c0_247 = arith.constant 0 : index
    %c0_248 = arith.constant 0 : index
    %923 = vector.load %arg6[%c0_247, %c0_248] : memref<16x48xf32, #tpu.memory_space<vmem>>, vector<2x48xf32>
    %924 = arith.truncf %921 : vector<2x16xf32> to vector<2x16xbf16>
    %925 = vector.extract_strided_slice %923 {offsets = [0, 0], sizes = [2, 16], strides = [1, 1]} : vector<2x48xf32> to vector<2x16xf32>
    %cst_249 = arith.constant dense<0.000000e+00> : vector<2x16xf32>
    %926 = tpu.matmul %924, %19, %cst_249 {dimension_numbers = #tpu.dot_dimension_numbers<[1], [0], [0], [1], [0, 0, 1, 1], [], []>} : vector<2x16xbf16>, vector<16x16xbf16>, vector<2x16xf32> -> vector<2x16xf32>
    %927 = arith.addf %925, %926 : vector<2x16xf32>
    %928 = arith.negf %927 : vector<2x16xf32>
    %929 = math.exp %928 : vector<2x16xf32>
    %cst_250 = arith.constant 1.000000e+00 : f32
    %930 = vector.broadcast %cst_250 : f32 to vector<2x16xf32>
    %931 = arith.addf %930, %929 : vector<2x16xf32>
    %932 = arith.divf %930, %931 : vector<2x16xf32>
    %933 = vector.extract_strided_slice %923 {offsets = [0, 16], sizes = [2, 16], strides = [1, 1]} : vector<2x48xf32> to vector<2x16xf32>
    %cst_251 = arith.constant dense<0.000000e+00> : vector<2x16xf32>
    %934 = tpu.matmul %924, %20, %cst_251 {dimension_numbers = #tpu.dot_dimension_numbers<[1], [0], [0], [1], [0, 0, 1, 1], [], []>} : vector<2x16xbf16>, vector<16x16xbf16>, vector<2x16xf32> -> vector<2x16xf32>
    %935 = arith.addf %933, %934 : vector<2x16xf32>
    %936 = arith.negf %935 : vector<2x16xf32>
    %937 = math.exp %936 : vector<2x16xf32>
    %cst_252 = arith.constant 1.000000e+00 : f32
    %938 = vector.broadcast %cst_252 : f32 to vector<2x16xf32>
    %939 = arith.addf %938, %937 : vector<2x16xf32>
    %940 = arith.divf %938, %939 : vector<2x16xf32>
    %941 = vector.extract_strided_slice %923 {offsets = [0, 32], sizes = [2, 16], strides = [1, 1]} : vector<2x48xf32> to vector<2x16xf32>
    %cst_253 = arith.constant dense<0.000000e+00> : vector<2x16xf32>
    %942 = tpu.matmul %924, %21, %cst_253 {dimension_numbers = #tpu.dot_dimension_numbers<[1], [0], [0], [1], [0, 0, 1, 1], [], []>} : vector<2x16xbf16>, vector<16x16xbf16>, vector<2x16xf32> -> vector<2x16xf32>
    %943 = vector.broadcast %2 : vector<1x16xf32> to vector<2x16xf32>
    %944 = arith.addf %942, %943 : vector<2x16xf32>
    %945 = arith.mulf %932, %944 : vector<2x16xf32>
    %946 = arith.addf %941, %945 : vector<2x16xf32>
    %947 = math.tanh %946 : vector<2x16xf32>
    %948 = arith.subf %921, %947 : vector<2x16xf32>
    %949 = arith.mulf %940, %948 : vector<2x16xf32>
    %950 = arith.addf %947, %949 : vector<2x16xf32>
    %c2_254 = arith.constant 2 : index
    %c0_255 = arith.constant 0 : index
    %951 = vector.load %arg6[%c2_254, %c0_255] : memref<16x48xf32, #tpu.memory_space<vmem>>, vector<2x48xf32>
    %952 = arith.truncf %950 : vector<2x16xf32> to vector<2x16xbf16>
    %953 = vector.extract_strided_slice %951 {offsets = [0, 0], sizes = [2, 16], strides = [1, 1]} : vector<2x48xf32> to vector<2x16xf32>
    %cst_256 = arith.constant dense<0.000000e+00> : vector<2x16xf32>
    %954 = tpu.matmul %952, %19, %cst_256 {dimension_numbers = #tpu.dot_dimension_numbers<[1], [0], [0], [1], [0, 0, 1, 1], [], []>} : vector<2x16xbf16>, vector<16x16xbf16>, vector<2x16xf32> -> vector<2x16xf32>
    %955 = arith.addf %953, %954 : vector<2x16xf32>
    %956 = arith.negf %955 : vector<2x16xf32>
    %957 = math.exp %956 : vector<2x16xf32>
    %cst_257 = arith.constant 1.000000e+00 : f32
    %958 = vector.broadcast %cst_257 : f32 to vector<2x16xf32>
    %959 = arith.addf %958, %957 : vector<2x16xf32>
    %960 = arith.divf %958, %959 : vector<2x16xf32>
    %961 = vector.extract_strided_slice %951 {offsets = [0, 16], sizes = [2, 16], strides = [1, 1]} : vector<2x48xf32> to vector<2x16xf32>
    %cst_258 = arith.constant dense<0.000000e+00> : vector<2x16xf32>
    %962 = tpu.matmul %952, %20, %cst_258 {dimension_numbers = #tpu.dot_dimension_numbers<[1], [0], [0], [1], [0, 0, 1, 1], [], []>} : vector<2x16xbf16>, vector<16x16xbf16>, vector<2x16xf32> -> vector<2x16xf32>
    %963 = arith.addf %961, %962 : vector<2x16xf32>
    %964 = arith.negf %963 : vector<2x16xf32>
    %965 = math.exp %964 : vector<2x16xf32>
    %cst_259 = arith.constant 1.000000e+00 : f32
    %966 = vector.broadcast %cst_259 : f32 to vector<2x16xf32>
    %967 = arith.addf %966, %965 : vector<2x16xf32>
    %968 = arith.divf %966, %967 : vector<2x16xf32>
    %969 = vector.extract_strided_slice %951 {offsets = [0, 32], sizes = [2, 16], strides = [1, 1]} : vector<2x48xf32> to vector<2x16xf32>
    %cst_260 = arith.constant dense<0.000000e+00> : vector<2x16xf32>
    %970 = tpu.matmul %952, %21, %cst_260 {dimension_numbers = #tpu.dot_dimension_numbers<[1], [0], [0], [1], [0, 0, 1, 1], [], []>} : vector<2x16xbf16>, vector<16x16xbf16>, vector<2x16xf32> -> vector<2x16xf32>
    %971 = vector.broadcast %2 : vector<1x16xf32> to vector<2x16xf32>
    %972 = arith.addf %970, %971 : vector<2x16xf32>
    %973 = arith.mulf %960, %972 : vector<2x16xf32>
    %974 = arith.addf %969, %973 : vector<2x16xf32>
    %975 = math.tanh %974 : vector<2x16xf32>
    %976 = arith.subf %950, %975 : vector<2x16xf32>
    %977 = arith.mulf %968, %976 : vector<2x16xf32>
    %978 = arith.addf %975, %977 : vector<2x16xf32>
    %c4_261 = arith.constant 4 : index
    %c0_262 = arith.constant 0 : index
    %979 = vector.load %arg6[%c4_261, %c0_262] : memref<16x48xf32, #tpu.memory_space<vmem>>, vector<2x48xf32>
    %980 = arith.truncf %978 : vector<2x16xf32> to vector<2x16xbf16>
    %981 = vector.extract_strided_slice %979 {offsets = [0, 0], sizes = [2, 16], strides = [1, 1]} : vector<2x48xf32> to vector<2x16xf32>
    %cst_263 = arith.constant dense<0.000000e+00> : vector<2x16xf32>
    %982 = tpu.matmul %980, %19, %cst_263 {dimension_numbers = #tpu.dot_dimension_numbers<[1], [0], [0], [1], [0, 0, 1, 1], [], []>} : vector<2x16xbf16>, vector<16x16xbf16>, vector<2x16xf32> -> vector<2x16xf32>
    %983 = arith.addf %981, %982 : vector<2x16xf32>
    %984 = arith.negf %983 : vector<2x16xf32>
    %985 = math.exp %984 : vector<2x16xf32>
    %cst_264 = arith.constant 1.000000e+00 : f32
    %986 = vector.broadcast %cst_264 : f32 to vector<2x16xf32>
    %987 = arith.addf %986, %985 : vector<2x16xf32>
    %988 = arith.divf %986, %987 : vector<2x16xf32>
    %989 = vector.extract_strided_slice %979 {offsets = [0, 16], sizes = [2, 16], strides = [1, 1]} : vector<2x48xf32> to vector<2x16xf32>
    %cst_265 = arith.constant dense<0.000000e+00> : vector<2x16xf32>
    %990 = tpu.matmul %980, %20, %cst_265 {dimension_numbers = #tpu.dot_dimension_numbers<[1], [0], [0], [1], [0, 0, 1, 1], [], []>} : vector<2x16xbf16>, vector<16x16xbf16>, vector<2x16xf32> -> vector<2x16xf32>
    %991 = arith.addf %989, %990 : vector<2x16xf32>
    %992 = arith.negf %991 : vector<2x16xf32>
    %993 = math.exp %992 : vector<2x16xf32>
    %cst_266 = arith.constant 1.000000e+00 : f32
    %994 = vector.broadcast %cst_266 : f32 to vector<2x16xf32>
    %995 = arith.addf %994, %993 : vector<2x16xf32>
    %996 = arith.divf %994, %995 : vector<2x16xf32>
    %997 = vector.extract_strided_slice %979 {offsets = [0, 32], sizes = [2, 16], strides = [1, 1]} : vector<2x48xf32> to vector<2x16xf32>
    %cst_267 = arith.constant dense<0.000000e+00> : vector<2x16xf32>
    %998 = tpu.matmul %980, %21, %cst_267 {dimension_numbers = #tpu.dot_dimension_numbers<[1], [0], [0], [1], [0, 0, 1, 1], [], []>} : vector<2x16xbf16>, vector<16x16xbf16>, vector<2x16xf32> -> vector<2x16xf32>
    %999 = vector.broadcast %2 : vector<1x16xf32> to vector<2x16xf32>
    %1000 = arith.addf %998, %999 : vector<2x16xf32>
    %1001 = arith.mulf %988, %1000 : vector<2x16xf32>
    %1002 = arith.addf %997, %1001 : vector<2x16xf32>
    %1003 = math.tanh %1002 : vector<2x16xf32>
    %1004 = arith.subf %978, %1003 : vector<2x16xf32>
    %1005 = arith.mulf %996, %1004 : vector<2x16xf32>
    %1006 = arith.addf %1003, %1005 : vector<2x16xf32>
    %c6_268 = arith.constant 6 : index
    %c0_269 = arith.constant 0 : index
    %1007 = vector.load %arg6[%c6_268, %c0_269] : memref<16x48xf32, #tpu.memory_space<vmem>>, vector<2x48xf32>
    %1008 = arith.truncf %1006 : vector<2x16xf32> to vector<2x16xbf16>
    %1009 = vector.extract_strided_slice %1007 {offsets = [0, 0], sizes = [2, 16], strides = [1, 1]} : vector<2x48xf32> to vector<2x16xf32>
    %cst_270 = arith.constant dense<0.000000e+00> : vector<2x16xf32>
    %1010 = tpu.matmul %1008, %19, %cst_270 {dimension_numbers = #tpu.dot_dimension_numbers<[1], [0], [0], [1], [0, 0, 1, 1], [], []>} : vector<2x16xbf16>, vector<16x16xbf16>, vector<2x16xf32> -> vector<2x16xf32>
    %1011 = arith.addf %1009, %1010 : vector<2x16xf32>
    %1012 = arith.negf %1011 : vector<2x16xf32>
    %1013 = math.exp %1012 : vector<2x16xf32>
    %cst_271 = arith.constant 1.000000e+00 : f32
    %1014 = vector.broadcast %cst_271 : f32 to vector<2x16xf32>
    %1015 = arith.addf %1014, %1013 : vector<2x16xf32>
    %1016 = arith.divf %1014, %1015 : vector<2x16xf32>
    %1017 = vector.extract_strided_slice %1007 {offsets = [0, 16], sizes = [2, 16], strides = [1, 1]} : vector<2x48xf32> to vector<2x16xf32>
    %cst_272 = arith.constant dense<0.000000e+00> : vector<2x16xf32>
    %1018 = tpu.matmul %1008, %20, %cst_272 {dimension_numbers = #tpu.dot_dimension_numbers<[1], [0], [0], [1], [0, 0, 1, 1], [], []>} : vector<2x16xbf16>, vector<16x16xbf16>, vector<2x16xf32> -> vector<2x16xf32>
    %1019 = arith.addf %1017, %1018 : vector<2x16xf32>
    %1020 = arith.negf %1019 : vector<2x16xf32>
    %1021 = math.exp %1020 : vector<2x16xf32>
    %cst_273 = arith.constant 1.000000e+00 : f32
    %1022 = vector.broadcast %cst_273 : f32 to vector<2x16xf32>
    %1023 = arith.addf %1022, %1021 : vector<2x16xf32>
    %1024 = arith.divf %1022, %1023 : vector<2x16xf32>
    %1025 = vector.extract_strided_slice %1007 {offsets = [0, 32], sizes = [2, 16], strides = [1, 1]} : vector<2x48xf32> to vector<2x16xf32>
    %cst_274 = arith.constant dense<0.000000e+00> : vector<2x16xf32>
    %1026 = tpu.matmul %1008, %21, %cst_274 {dimension_numbers = #tpu.dot_dimension_numbers<[1], [0], [0], [1], [0, 0, 1, 1], [], []>} : vector<2x16xbf16>, vector<16x16xbf16>, vector<2x16xf32> -> vector<2x16xf32>
    %1027 = vector.broadcast %2 : vector<1x16xf32> to vector<2x16xf32>
    %1028 = arith.addf %1026, %1027 : vector<2x16xf32>
    %1029 = arith.mulf %1016, %1028 : vector<2x16xf32>
    %1030 = arith.addf %1025, %1029 : vector<2x16xf32>
    %1031 = math.tanh %1030 : vector<2x16xf32>
    %1032 = arith.subf %1006, %1031 : vector<2x16xf32>
    %1033 = arith.mulf %1024, %1032 : vector<2x16xf32>
    %1034 = arith.addf %1031, %1033 : vector<2x16xf32>
    %c8_275 = arith.constant 8 : index
    %c0_276 = arith.constant 0 : index
    %1035 = vector.load %arg6[%c8_275, %c0_276] : memref<16x48xf32, #tpu.memory_space<vmem>>, vector<2x48xf32>
    %1036 = arith.truncf %1034 : vector<2x16xf32> to vector<2x16xbf16>
    %1037 = vector.extract_strided_slice %1035 {offsets = [0, 0], sizes = [2, 16], strides = [1, 1]} : vector<2x48xf32> to vector<2x16xf32>
    %cst_277 = arith.constant dense<0.000000e+00> : vector<2x16xf32>
    %1038 = tpu.matmul %1036, %19, %cst_277 {dimension_numbers = #tpu.dot_dimension_numbers<[1], [0], [0], [1], [0, 0, 1, 1], [], []>} : vector<2x16xbf16>, vector<16x16xbf16>, vector<2x16xf32> -> vector<2x16xf32>
    %1039 = arith.addf %1037, %1038 : vector<2x16xf32>
    %1040 = arith.negf %1039 : vector<2x16xf32>
    %1041 = math.exp %1040 : vector<2x16xf32>
    %cst_278 = arith.constant 1.000000e+00 : f32
    %1042 = vector.broadcast %cst_278 : f32 to vector<2x16xf32>
    %1043 = arith.addf %1042, %1041 : vector<2x16xf32>
    %1044 = arith.divf %1042, %1043 : vector<2x16xf32>
    %1045 = vector.extract_strided_slice %1035 {offsets = [0, 16], sizes = [2, 16], strides = [1, 1]} : vector<2x48xf32> to vector<2x16xf32>
    %cst_279 = arith.constant dense<0.000000e+00> : vector<2x16xf32>
    %1046 = tpu.matmul %1036, %20, %cst_279 {dimension_numbers = #tpu.dot_dimension_numbers<[1], [0], [0], [1], [0, 0, 1, 1], [], []>} : vector<2x16xbf16>, vector<16x16xbf16>, vector<2x16xf32> -> vector<2x16xf32>
    %1047 = arith.addf %1045, %1046 : vector<2x16xf32>
    %1048 = arith.negf %1047 : vector<2x16xf32>
    %1049 = math.exp %1048 : vector<2x16xf32>
    %cst_280 = arith.constant 1.000000e+00 : f32
    %1050 = vector.broadcast %cst_280 : f32 to vector<2x16xf32>
    %1051 = arith.addf %1050, %1049 : vector<2x16xf32>
    %1052 = arith.divf %1050, %1051 : vector<2x16xf32>
    %1053 = vector.extract_strided_slice %1035 {offsets = [0, 32], sizes = [2, 16], strides = [1, 1]} : vector<2x48xf32> to vector<2x16xf32>
    %cst_281 = arith.constant dense<0.000000e+00> : vector<2x16xf32>
    %1054 = tpu.matmul %1036, %21, %cst_281 {dimension_numbers = #tpu.dot_dimension_numbers<[1], [0], [0], [1], [0, 0, 1, 1], [], []>} : vector<2x16xbf16>, vector<16x16xbf16>, vector<2x16xf32> -> vector<2x16xf32>
    %1055 = vector.broadcast %2 : vector<1x16xf32> to vector<2x16xf32>
    %1056 = arith.addf %1054, %1055 : vector<2x16xf32>
    %1057 = arith.mulf %1044, %1056 : vector<2x16xf32>
    %1058 = arith.addf %1053, %1057 : vector<2x16xf32>
    %1059 = math.tanh %1058 : vector<2x16xf32>
    %1060 = arith.subf %1034, %1059 : vector<2x16xf32>
    %1061 = arith.mulf %1052, %1060 : vector<2x16xf32>
    %1062 = arith.addf %1059, %1061 : vector<2x16xf32>
    %c10_282 = arith.constant 10 : index
    %c0_283 = arith.constant 0 : index
    %1063 = vector.load %arg6[%c10_282, %c0_283] : memref<16x48xf32, #tpu.memory_space<vmem>>, vector<2x48xf32>
    %1064 = arith.truncf %1062 : vector<2x16xf32> to vector<2x16xbf16>
    %1065 = vector.extract_strided_slice %1063 {offsets = [0, 0], sizes = [2, 16], strides = [1, 1]} : vector<2x48xf32> to vector<2x16xf32>
    %cst_284 = arith.constant dense<0.000000e+00> : vector<2x16xf32>
    %1066 = tpu.matmul %1064, %19, %cst_284 {dimension_numbers = #tpu.dot_dimension_numbers<[1], [0], [0], [1], [0, 0, 1, 1], [], []>} : vector<2x16xbf16>, vector<16x16xbf16>, vector<2x16xf32> -> vector<2x16xf32>
    %1067 = arith.addf %1065, %1066 : vector<2x16xf32>
    %1068 = arith.negf %1067 : vector<2x16xf32>
    %1069 = math.exp %1068 : vector<2x16xf32>
    %cst_285 = arith.constant 1.000000e+00 : f32
    %1070 = vector.broadcast %cst_285 : f32 to vector<2x16xf32>
    %1071 = arith.addf %1070, %1069 : vector<2x16xf32>
    %1072 = arith.divf %1070, %1071 : vector<2x16xf32>
    %1073 = vector.extract_strided_slice %1063 {offsets = [0, 16], sizes = [2, 16], strides = [1, 1]} : vector<2x48xf32> to vector<2x16xf32>
    %cst_286 = arith.constant dense<0.000000e+00> : vector<2x16xf32>
    %1074 = tpu.matmul %1064, %20, %cst_286 {dimension_numbers = #tpu.dot_dimension_numbers<[1], [0], [0], [1], [0, 0, 1, 1], [], []>} : vector<2x16xbf16>, vector<16x16xbf16>, vector<2x16xf32> -> vector<2x16xf32>
    %1075 = arith.addf %1073, %1074 : vector<2x16xf32>
    %1076 = arith.negf %1075 : vector<2x16xf32>
    %1077 = math.exp %1076 : vector<2x16xf32>
    %cst_287 = arith.constant 1.000000e+00 : f32
    %1078 = vector.broadcast %cst_287 : f32 to vector<2x16xf32>
    %1079 = arith.addf %1078, %1077 : vector<2x16xf32>
    %1080 = arith.divf %1078, %1079 : vector<2x16xf32>
    %1081 = vector.extract_strided_slice %1063 {offsets = [0, 32], sizes = [2, 16], strides = [1, 1]} : vector<2x48xf32> to vector<2x16xf32>
    %cst_288 = arith.constant dense<0.000000e+00> : vector<2x16xf32>
    %1082 = tpu.matmul %1064, %21, %cst_288 {dimension_numbers = #tpu.dot_dimension_numbers<[1], [0], [0], [1], [0, 0, 1, 1], [], []>} : vector<2x16xbf16>, vector<16x16xbf16>, vector<2x16xf32> -> vector<2x16xf32>
    %1083 = vector.broadcast %2 : vector<1x16xf32> to vector<2x16xf32>
    %1084 = arith.addf %1082, %1083 : vector<2x16xf32>
    %1085 = arith.mulf %1072, %1084 : vector<2x16xf32>
    %1086 = arith.addf %1081, %1085 : vector<2x16xf32>
    %1087 = math.tanh %1086 : vector<2x16xf32>
    %1088 = arith.subf %1062, %1087 : vector<2x16xf32>
    %1089 = arith.mulf %1080, %1088 : vector<2x16xf32>
    %1090 = arith.addf %1087, %1089 : vector<2x16xf32>
    %c12_289 = arith.constant 12 : index
    %c0_290 = arith.constant 0 : index
    %1091 = vector.load %arg6[%c12_289, %c0_290] : memref<16x48xf32, #tpu.memory_space<vmem>>, vector<2x48xf32>
    %1092 = arith.truncf %1090 : vector<2x16xf32> to vector<2x16xbf16>
    %1093 = vector.extract_strided_slice %1091 {offsets = [0, 0], sizes = [2, 16], strides = [1, 1]} : vector<2x48xf32> to vector<2x16xf32>
    %cst_291 = arith.constant dense<0.000000e+00> : vector<2x16xf32>
    %1094 = tpu.matmul %1092, %19, %cst_291 {dimension_numbers = #tpu.dot_dimension_numbers<[1], [0], [0], [1], [0, 0, 1, 1], [], []>} : vector<2x16xbf16>, vector<16x16xbf16>, vector<2x16xf32> -> vector<2x16xf32>
    %1095 = arith.addf %1093, %1094 : vector<2x16xf32>
    %1096 = arith.negf %1095 : vector<2x16xf32>
    %1097 = math.exp %1096 : vector<2x16xf32>
    %cst_292 = arith.constant 1.000000e+00 : f32
    %1098 = vector.broadcast %cst_292 : f32 to vector<2x16xf32>
    %1099 = arith.addf %1098, %1097 : vector<2x16xf32>
    %1100 = arith.divf %1098, %1099 : vector<2x16xf32>
    %1101 = vector.extract_strided_slice %1091 {offsets = [0, 16], sizes = [2, 16], strides = [1, 1]} : vector<2x48xf32> to vector<2x16xf32>
    %cst_293 = arith.constant dense<0.000000e+00> : vector<2x16xf32>
    %1102 = tpu.matmul %1092, %20, %cst_293 {dimension_numbers = #tpu.dot_dimension_numbers<[1], [0], [0], [1], [0, 0, 1, 1], [], []>} : vector<2x16xbf16>, vector<16x16xbf16>, vector<2x16xf32> -> vector<2x16xf32>
    %1103 = arith.addf %1101, %1102 : vector<2x16xf32>
    %1104 = arith.negf %1103 : vector<2x16xf32>
    %1105 = math.exp %1104 : vector<2x16xf32>
    %cst_294 = arith.constant 1.000000e+00 : f32
    %1106 = vector.broadcast %cst_294 : f32 to vector<2x16xf32>
    %1107 = arith.addf %1106, %1105 : vector<2x16xf32>
    %1108 = arith.divf %1106, %1107 : vector<2x16xf32>
    %1109 = vector.extract_strided_slice %1091 {offsets = [0, 32], sizes = [2, 16], strides = [1, 1]} : vector<2x48xf32> to vector<2x16xf32>
    %cst_295 = arith.constant dense<0.000000e+00> : vector<2x16xf32>
    %1110 = tpu.matmul %1092, %21, %cst_295 {dimension_numbers = #tpu.dot_dimension_numbers<[1], [0], [0], [1], [0, 0, 1, 1], [], []>} : vector<2x16xbf16>, vector<16x16xbf16>, vector<2x16xf32> -> vector<2x16xf32>
    %1111 = vector.broadcast %2 : vector<1x16xf32> to vector<2x16xf32>
    %1112 = arith.addf %1110, %1111 : vector<2x16xf32>
    %1113 = arith.mulf %1100, %1112 : vector<2x16xf32>
    %1114 = arith.addf %1109, %1113 : vector<2x16xf32>
    %1115 = math.tanh %1114 : vector<2x16xf32>
    %1116 = arith.subf %1090, %1115 : vector<2x16xf32>
    %1117 = arith.mulf %1108, %1116 : vector<2x16xf32>
    %1118 = arith.addf %1115, %1117 : vector<2x16xf32>
    %c14_296 = arith.constant 14 : index
    %c0_297 = arith.constant 0 : index
    %1119 = vector.load %arg6[%c14_296, %c0_297] : memref<16x48xf32, #tpu.memory_space<vmem>>, vector<2x48xf32>
    %1120 = arith.truncf %1118 : vector<2x16xf32> to vector<2x16xbf16>
    %1121 = vector.extract_strided_slice %1119 {offsets = [0, 0], sizes = [2, 16], strides = [1, 1]} : vector<2x48xf32> to vector<2x16xf32>
    %cst_298 = arith.constant dense<0.000000e+00> : vector<2x16xf32>
    %1122 = tpu.matmul %1120, %19, %cst_298 {dimension_numbers = #tpu.dot_dimension_numbers<[1], [0], [0], [1], [0, 0, 1, 1], [], []>} : vector<2x16xbf16>, vector<16x16xbf16>, vector<2x16xf32> -> vector<2x16xf32>
    %1123 = arith.addf %1121, %1122 : vector<2x16xf32>
    %1124 = arith.negf %1123 : vector<2x16xf32>
    %1125 = math.exp %1124 : vector<2x16xf32>
    %cst_299 = arith.constant 1.000000e+00 : f32
    %1126 = vector.broadcast %cst_299 : f32 to vector<2x16xf32>
    %1127 = arith.addf %1126, %1125 : vector<2x16xf32>
    %1128 = arith.divf %1126, %1127 : vector<2x16xf32>
    %1129 = vector.extract_strided_slice %1119 {offsets = [0, 16], sizes = [2, 16], strides = [1, 1]} : vector<2x48xf32> to vector<2x16xf32>
    %cst_300 = arith.constant dense<0.000000e+00> : vector<2x16xf32>
    %1130 = tpu.matmul %1120, %20, %cst_300 {dimension_numbers = #tpu.dot_dimension_numbers<[1], [0], [0], [1], [0, 0, 1, 1], [], []>} : vector<2x16xbf16>, vector<16x16xbf16>, vector<2x16xf32> -> vector<2x16xf32>
    %1131 = arith.addf %1129, %1130 : vector<2x16xf32>
    %1132 = arith.negf %1131 : vector<2x16xf32>
    %1133 = math.exp %1132 : vector<2x16xf32>
    %cst_301 = arith.constant 1.000000e+00 : f32
    %1134 = vector.broadcast %cst_301 : f32 to vector<2x16xf32>
    %1135 = arith.addf %1134, %1133 : vector<2x16xf32>
    %1136 = arith.divf %1134, %1135 : vector<2x16xf32>
    %1137 = vector.extract_strided_slice %1119 {offsets = [0, 32], sizes = [2, 16], strides = [1, 1]} : vector<2x48xf32> to vector<2x16xf32>
    %cst_302 = arith.constant dense<0.000000e+00> : vector<2x16xf32>
    %1138 = tpu.matmul %1120, %21, %cst_302 {dimension_numbers = #tpu.dot_dimension_numbers<[1], [0], [0], [1], [0, 0, 1, 1], [], []>} : vector<2x16xbf16>, vector<16x16xbf16>, vector<2x16xf32> -> vector<2x16xf32>
    %1139 = vector.broadcast %2 : vector<1x16xf32> to vector<2x16xf32>
    %1140 = arith.addf %1138, %1139 : vector<2x16xf32>
    %1141 = arith.mulf %1128, %1140 : vector<2x16xf32>
    %1142 = arith.addf %1137, %1141 : vector<2x16xf32>
    %1143 = math.tanh %1142 : vector<2x16xf32>
    %1144 = arith.subf %1118, %1143 : vector<2x16xf32>
    %1145 = arith.mulf %1136, %1144 : vector<2x16xf32>
    %1146 = arith.addf %1143, %1145 : vector<2x16xf32>
    %c8_303 = arith.constant 8 : index
    %c0_304 = arith.constant 0 : index
    %1147 = vector.load %arg7[%c8_303, %c0_304] : memref<10x16xf32, #tpu.memory_space<vmem>>, vector<2x16xf32>
    tpu.vector_store %arg7[%c8_303, %c0_304], %1146 {strides = array<i32>} : memref<10x16xf32, #tpu.memory_space<vmem>>, vector<2x16xf32>,
    %c0_305 = arith.constant 0 : index
    %c0_306 = arith.constant 0 : index
    %1148 = vector.load %arg7[%c0_305, %c0_306] : memref<10x16xf32, #tpu.memory_space<vmem>>, vector<10x16xf32>
    %c0_307 = arith.constant 0 : index
    %c96_308 = arith.constant 96 : index
    %1149 = vector.load %arg3[%c0_307, %c96_308] : memref<16x120xbf16, #tpu.memory_space<vmem>>, vector<16x16xbf16>
    %1150 = arith.truncf %1148 : vector<10x16xf32> to vector<10x16xbf16>
    %cst_309 = arith.constant dense<0.000000e+00> : vector<10x16xf32>
    %1151 = tpu.matmul %1150, %1149, %cst_309 {dimension_numbers = #tpu.dot_dimension_numbers<[1], [0], [0], [1], [0, 0, 1, 1], [], []>} : vector<10x16xbf16>, vector<16x16xbf16>, vector<10x16xf32> -> vector<10x16xf32>
    %1152 = vector.broadcast %3 : vector<1x16xf32> to vector<10x16xf32>
    %1153 = arith.addf %1151, %1152 : vector<10x16xf32>
    %cst_310 = arith.constant 0.000000e+00 : f32
    %1154 = vector.broadcast %cst_310 : f32 to vector<10x16xf32>
    %1155 = arith.maximumf %1153, %1154 : vector<10x16xf32>
    %c0_311 = arith.constant 0 : index
    %c112 = arith.constant 112 : index
    %1156 = vector.load %arg3[%c0_311, %c112] : memref<16x120xbf16, #tpu.memory_space<vmem>>, vector<16x8xbf16>
    %1157 = arith.truncf %1155 : vector<10x16xf32> to vector<10x16xbf16>
    %cst_312 = arith.constant dense<0.000000e+00> : vector<10x8xf32>
    %1158 = tpu.matmul %1157, %1156, %cst_312 {dimension_numbers = #tpu.dot_dimension_numbers<[1], [0], [0], [1], [0, 0, 1, 1], [], []>} : vector<10x16xbf16>, vector<16x8xbf16>, vector<10x8xf32> -> vector<10x8xf32>
    %1159 = vector.broadcast %4 : vector<1x8xf32> to vector<10x8xf32>
    %1160 = arith.addf %1158, %1159 : vector<10x8xf32>
    %c0_313 = arith.constant 0 : index
    %c0_314 = arith.constant 0 : index
    %1161 = vector.load %arg5[%c0_313, %c0_314] : memref<10x8xf32, #tpu.memory_space<vmem>>, vector<10x8xf32>
    tpu.vector_store %arg5[%c0_313, %c0_314], %1160 {strides = array<i32>} : memref<10x8xf32, #tpu.memory_space<vmem>>, vector<10x8xf32>,
    return
  }
}

</mosaic_0001>

<bundles_post_ra>
// kernel: gru_model_forward.1
= control target key start
LH: loop header
LB: loop body
LE: loop exit
PB: predicated region body
PF: predicated region fallthrough
CT: control target
= control target key end

     0   :  { %vm47_vm0 = vcmask 1040384   ;;  %v8502_v0 = vmov 0.0   ;;  %vm8503_vm1 = vmmov 0   ;;  %s8505_s28 = smov 80   ;;  %vm43_vm2 = vcmask 146432   ;;  %s8506_s29 = smov 48   ;;  %s9486_s2 = inlined_call_operand.vmem [shape: bf16[18,16], index: 2, kind: input, shape index: {}]   ;;  %s9487_s0 = inlined_call_operand.vmem [shape: f32[16,18], index: 0, kind: input, shape index: {}]   ;;  %s9488_s3 = inlined_call_operand.vmem [shape: bf16[16,120], index: 3, kind: input, shape index: {}]   ;;  %s9489_s4 = inlined_call_operand.vmem [shape: f32[1,104], index: 4, kind: input, shape index: {}]   ;;  %s9490_s1 = inlined_call_operand.vmem [shape: f32[2,16], index: 1, kind: input, shape index: {}]   ;;  %s9491_s5 = inlined_call_operand.vmem [shape: f32[10,8], index: 5, kind: output, shape index: {}]  }
   0x1   :  { %7341 = vmatprep.subr.bf16.mxu0 %v8502_v0  ;;  %v8096_v1 = vld [vmem:[%s9486_s2 + $0x8] ss:$0 sps:$4 sm:$0x11]   ;;  %7345 = vmatprep.mubr.msk.bf16.mxu0 %vm8503_vm1, %v8502_v0  ;;  %v8097_v2 = vld [vmem:[%s9486_s2] sm:$0xff]   ;;  %s8504_s2 = smov 64   ;;  %s8507_s8 = smov 112  }
   0x2   :  { %7349 = vmatprep.subr.bf16.mxu1 %v8502_v0  ;;  %7351 = vmatprep.mubr.msk.bf16.mxu1 %vm8503_vm1, %v8502_v0  ;;  %v49_v3 = vsel %vm47_vm0, %v8096_v1, 0  ;;  %v22_v4 = vld [vmem:[%s9487_s0] sm:$0xff]  ;;  %v23_v5 = vld [vmem:[%s9487_s0 + $0x8] sm:$0xff]  ;;  %vm106_vm3 = vcmask 130048   ;;  %vm151_vm4 = vcmask 392192   ;;  %s8509_s11 = smov 16  }
   0x3   :  { %7342 = vmatpush3.bf16.msra.mxu0 %v49_v3  ;;  %v8098_v6 = vld [vmem:[%s9488_s3] sm:$0xff]   ;;  %v27_v7 = vpack.c.bf16 %v23_v5, %v22_v4  ;;  %s8510_s12 = smov 96   ;;  %vm1491_vm5 = vcmask 123904   ;;  %vm6874_vm6 = vcmask 64512   ;;  %vm6876_vm7 = vcmask 58368  }
   0x4   :  { %7343 = vmatprep.subr.bf16.mxu0 %v8502_v0  ;;  %217 = vrot.lane.b32.xlu1 %v8098_v6, %s8504_s2  ;;  %v6882_v8 = vld [vmem:[%s9489_s4] ss:$0 sm:$0xff] }
   0x5   :  { %164 = vrot.lane.b32.xlu0 %v8098_v6, %s8505_s28  ;;  %v8099_v9 = vld [vmem:[%s9488_s3] sm:$0xff]  }
   0x6   :  { %7350 = vmatpush3.bf16.msra.mxu1 %v8099_v9  ;;  %v8578_v10 = vld [vmem:[%s9490_s1] sm:$0x3]  ;;  %s8508_s1 = smov 32  }
   0x7   :  { %7344 = vmatpush3.bf16.msra.mxu0 %v8097_v2  ;;  %7355 = vmatprep.subr.bf16.mxu1 %v8502_v0  ;;  %v158_v12 = vpack.c.bf16 %v8578_v10, %v8578_v10 }
   0x8   :  { %7361 = vmatprep.subr.bf16.mxu0 %v8502_v0  ;;  %103 = vrot.lane.b32.xlu1 %v6882_v8, %s8507_s8 }
   0x9   :  { %271 = vrot.lane.b32.xlu0 %v8098_v6, %s8506_s29 }
   0xa   :  { %7346 = vmatmul.mubr.msk.bf16.vlgmr.msra.gmra.mxu0 %vm43_vm2, %v27_v7 }
   0xb   :  { %7363 = vmatprep.mubr.msk.bf16.mxu0 %vm8503_vm1, %v8502_v0 }
   0xd   :  { %274 = vrot.lane.b32.xlu0 %v6882_v8, %s8504_s2 }
  0x76   :  { %v8580_v11 = vpop.permute.xlu1 %217 }
  0x77   :  { %7362 = vmatpush3.bf16.msra.mxu0 %v8580_v11  ;;  %v8586_v13 = vpop.permute.xlu0 %164 }
  0x78   :  { %7373 = vmatprep.subr.bf16.mxu0 %v8502_v0 }
  0x7a   :  { %7364 = vmatmul.mubr.msk.bf16.vlgmr.msra.gmra.mxu0 %vm106_vm3, %v158_v12  ;;  %v104_v28 = vpop.permute.xlu1 %103 }
  0x7b   :  { %7374 = vmatpush3.bf16.msra.mxu0 %v8586_v13  ;;  %7375 = vmatprep.mubr.msk.bf16.mxu0 %vm8503_vm1, %v8502_v0  ;;  %v8598_v23 = vpop.permute.xlu0 %271 }
  0x7c   :  { %7385 = vmatprep.subr.bf16.mxu0 %v8502_v0 }
  0x7f   :  { %v8610_v48 = vpop.permute.xlu0 %274 }
  0xca   :  { %v85_v14 = vpop.f32.mrf.mxu0 }
  0xcb   :  { %v86_v16 = vadd.f32 %v6882_v8, %v85_v14 }
  0xcc   :  { %v7347_v15 = vpop.f32.mrf.mxu0 }
  0xcd   :  { %v92_v20 = vmax.f32 %v86_v16, 0.0 }
  0xce   :  { %v88_v17 = vpop.f32.mrf.mxu0 }
  0xcf   :  { %v89_v18 = vadd.f32 %v6882_v8, %v88_v17 }
  0xd0   :  { %v7348_v19 = vpop.f32.mrf.mxu0 }
  0xd1   :  { %v93_v21 = vmax.f32 %v89_v18, 0.0 }
  0xd3   :  { %v96_v22 = vpack.c.bf16 %v93_v21, %v92_v20 }
  0xd5   :  { %7352 = vmatmul.mubr.msk.bf16.vlgmr.msra.gmra.mxu1 %vm106_vm3, %v96_v22 }
  0xd6   :  { %7356 = vmatpush3.bf16.msra.mxu1 %v8586_v13  ;;  %7357 = vmatprep.mubr.msk.bf16.mxu1 %vm8503_vm1, %v8502_v0 }
  0xd7   :  { %7367 = vmatprep.subr.bf16.mxu1 %v8502_v0 }
  0xdd   :  { %7358 = vmatmul.mubr.msk.bf16.vlgmr.msra.gmra.mxu1 %vm106_vm3, %v158_v12 }
  0xde   :  { %7368 = vmatpush3.bf16.msra.mxu1 %v8598_v23  ;;  %7369 = vmatprep.mubr.msk.bf16.mxu1 %vm8503_vm1, %v8502_v0 }
  0xdf   :  { %7379 = vmatprep.subr.bf16.mxu1 %v8502_v0 }
  0xe5   :  { %7370 = vmatmul.mubr.msk.bf16.vlgmr.msra.gmra.mxu1 %vm106_vm3, %v158_v12 }
  0xe6   :  { %7380 = vmatpush3.bf16.msra.mxu1 %v8580_v11  ;;  %7381 = vmatprep.mubr.msk.bf16.mxu1 %vm8503_vm1, %v8502_v0 }
  0xe7   :  { %7391 = vmatprep.subr.bf16.mxu1 %v8502_v0 }
 0x13a   :  { %v254_v24 = vpop.f32.mrf.mxu0 }
 0x13c   :  { %v7365_v25 = vpop.f32.mrf.mxu0 }
 0x13e   :  { %v257_v26 = vpop.f32.mrf.mxu0 }
 0x140   :  { %v7366_v27 = vpop.f32.mrf.mxu0 }
 0x195   :  { %v144_v29 = vpop.f32.mrf.mxu1 }
 0x196   :  { %v145_v30 = vadd.f32 %v144_v29, %v104_v28 }
 0x197   :  { %v7353_v31 = vpop.f32.mrf.mxu1 }
 0x198   :  { %152 = vst.msk [vmem:[#allocation2] sm:$0xff] %vm151_vm4, %v145_v30 }
 0x199   :  { %v147_v32 = vpop.f32.mrf.mxu1 }
 0x19a   :  { %v148_v33 = vadd.f32 %v147_v32, %v104_v28 }
 0x19b   :  { %v7354_v34 = vpop.f32.mrf.mxu1 }
 0x19c   :  { %153 = vst.msk [vmem:[#allocation2 + $0x8] sm:$0xff] %vm151_vm4, %v148_v33 }
 0x19d   :  { %v204_v35 = vpop.f32.mrf.mxu1 }
 0x19f   :  { %v157_v36 = vld [vmem:[#allocation2] sm:$0x3]  ;;  %v7359_v37 = vpop.f32.mrf.mxu1  ;;  %v339_v6 = vld [vmem:[#allocation2 + $0x2] sm:$0x3] }
 0x1a0   :  { %v210_v38 = vadd.f32 %v204_v35, %v157_v36 }
 0x1a1   :  { %v207_v39 = vpop.f32.mrf.mxu1 }
 0x1a2   :  { %v6890_v40 = vmul.f32 -1.442695, %v210_v38 }
 0x1a3   :  { %v7360_v41 = vpop.f32.mrf.mxu1 }
 0x1a4   :  { %8101 = vpow2.f32 %v6890_v40 }
 0x1a5   :  { %v311_v42 = vpop.f32.mrf.mxu1 }
 0x1a6   :  { %v312_v49 = vadd.f32 %v311_v42, %v8610_v48 }
 0x1a7   :  { %v7371_v43 = vpop.f32.mrf.mxu1 }
 0x1a9   :  { %v314_v44 = vpop.f32.mrf.mxu1 }
 0x1ab   :  { %v7372_v45 = vpop.f32.mrf.mxu1 }
 0x1ac   :  { %v503_v45 = vld [vmem:[#allocation2 + $0x4] sm:$0x3] }
 0x1b1   :  { %v8102_v46 = vpop.eup %8101 }
 0x1b2   :  { %v214_v47 = vadd.f32 1.0, %v8102_v46 }
 0x1b4   :  { %8103 = vrcp.f32 %v214_v47 }
 0x1c1   :  { %v8104_v50 = vpop.eup %8103 }
 0x1c2   :  { %v317_v51 = vmul.f32 %v8104_v50, %v312_v49 }
 0x1c4   :  { %319 = vrot.lane.b32.xlu1 %v317_v51, %s8508_s1 }
 0x1c8   :  { %261 = vrot.lane.b32.xlu1 %v254_v24, %s8509_s11 }
 0x236   :  { %v320_v52 = vpop.permute.xlu1 %319 }
 0x237   :  { %v322_v53 = vadd.f32 %v320_v52, %v157_v36 }
 0x239   :  { %8105 = vtanh.f32 %v322_v53 }
 0x23a   :  { %v262_v57 = vpop.permute.xlu1 %261 }
 0x23b   :  { %v264_v58 = vadd.f32 %v262_v57, %v157_v36 }
 0x23d   :  { %v6892_v59 = vmul.f32 -1.442695, %v264_v58 }
 0x23f   :  { %8107 = vpow2.f32 %v6892_v59 }
 0x246   :  { %v8106_v54 = vpop.eup %8105 }
 0x247   :  { %325 = vrot.lane.b32.xlu0 %v8106_v54, %s8510_s12 }
 0x24c   :  { %v8108_v60 = vpop.eup %8107 }
 0x24d   :  { %v268_v61 = vadd.f32 1.0, %v8108_v60 }
 0x24f   :  { %8109 = vrcp.f32 %v268_v61 }
 0x25c   :  { %v8110_v62 = vpop.eup %8109 }
 0x2b9   :  { %v326_v55 = vpop.permute.xlu0 %325 }
 0x2ba   :  { %v328_v56 = vsub.f32 %v8578_v10, %v326_v55 }
 0x2bc   :  { %330 = vrot.lane.b32.xlu0 %v328_v56, %s8509_s11 }
 0x32e   :  { %v331_v63 = vpop.permute.xlu0 %330 }
 0x32f   :  { %v333_v1 = vmul.f32 %v8110_v62, %v331_v63 }
 0x331   :  { %335 = vrot.lane.b32.xlu1 %v333_v1, %s8509_s11 }
 0x3a3   :  { %v336_v2 = vpop.permute.xlu1 %335 }
 0x3a4   :  { %v338_v3 = vadd.f32 %v8106_v54, %v336_v2 }
 0x3a6   :  { %v340_v4 = vpack.c.bf16 %v338_v3, %v338_v3 }
 0x3a8   :  { %342 = vrot.lane.b32.xlu0 %v340_v4, %s8510_s12 }
 0x41a   :  { %v343_v5 = vpop.permute.xlu0 %342 }
 0x41b   :  { %7376 = vmatmul.mubr.msk.bf16.vlgmr.msra.gmra.mxu0 %vm106_vm3, %v343_v5  ;;  %7382 = vmatmul.mubr.msk.bf16.vlgmr.msra.gmra.mxu1 %vm106_vm3, %v343_v5 }
 0x41c   :  { %7386 = vmatpush3.bf16.msra.mxu0 %v8598_v23  ;;  %7392 = vmatpush3.bf16.msra.mxu1 %v8586_v13 }
 0x41d   :  { %7387 = vmatprep.mubr.msk.bf16.mxu0 %vm8503_vm1, %v8502_v0  ;;  %7397 = vmatprep.subr.bf16.mxu0 %v8502_v0 }
 0x41e   :  { %7393 = vmatprep.mubr.msk.bf16.mxu1 %vm8503_vm1, %v8502_v0  ;;  %7403 = vmatprep.subr.bf16.mxu1 %v8502_v0 }
 0x423   :  { %7388 = vmatmul.mubr.msk.bf16.vlgmr.msra.gmra.mxu0 %vm106_vm3, %v343_v5 }
 0x424   :  { %7398 = vmatpush3.bf16.msra.mxu0 %v8580_v11  ;;  %7399 = vmatprep.mubr.msk.bf16.mxu0 %vm8503_vm1, %v8502_v0 }
 0x425   :  { %7409 = vmatprep.subr.bf16.mxu0 %v8502_v0 }
 0x4db   :  { %v381_v7 = vpop.f32.mrf.mxu0  ;;  %v428_v8 = vpop.f32.mrf.mxu1 }
 0x4dc   :  { %v387_v9 = vadd.f32 %v381_v7, %v339_v6  ;;  %435 = vrot.lane.b32.xlu0 %v428_v8, %s8509_s11 }
 0x4dd   :  { %v7377_v10 = vpop.f32.mrf.mxu0  ;;  %v7383_v12 = vpop.f32.mrf.mxu1 }
 0x4de   :  { %v6895_v14 = vmul.f32 -1.442695, %v387_v9 }
 0x4df   :  { %v384_v15 = vpop.f32.mrf.mxu0  ;;  %v431_v16 = vpop.f32.mrf.mxu1 }
 0x4e0   :  { %8111 = vpow2.f32 %v6895_v14 }
 0x4e1   :  { %v7378_v17 = vpop.f32.mrf.mxu0  ;;  %v7384_v18 = vpop.f32.mrf.mxu1 }
 0x4e3   :  { %v479_v19 = vpop.f32.mrf.mxu0 }
 0x4e4   :  { %v480_v26 = vadd.f32 %v479_v19, %v8610_v48 }
 0x4e5   :  { %v7389_v20 = vpop.f32.mrf.mxu0 }
 0x4e7   :  { %v482_v21 = vpop.f32.mrf.mxu0 }
 0x4e8   :  { %v667_v21 = vld [vmem:[#allocation2 + $0x6] sm:$0x3] }
 0x4e9   :  { %v7390_v22 = vpop.f32.mrf.mxu0 }
 0x4ed   :  { %v8112_v24 = vpop.eup %8111 }
 0x4ee   :  { %v391_v25 = vadd.f32 1.0, %v8112_v24 }
 0x4f0   :  { %8113 = vrcp.f32 %v391_v25 }
 0x4fd   :  { %v8114_v27 = vpop.eup %8113 }
 0x4fe   :  { %v485_v28 = vmul.f32 %v8114_v27, %v480_v26 }
 0x500   :  { %487 = vrot.lane.b32.xlu1 %v485_v28, %s8508_s1 }
 0x54e   :  { %v436_v33 = vpop.permute.xlu0 %435 }
 0x54f   :  { %v438_v34 = vadd.f32 %v436_v33, %v339_v6 }
 0x551   :  { %v6897_v35 = vmul.f32 -1.442695, %v438_v34 }
 0x572   :  { %v488_v29 = vpop.permute.xlu1 %487 }
 0x573   :  { %v490_v30 = vadd.f32 %v488_v29, %v339_v6 }
 0x575   :  { %8115 = vtanh.f32 %v490_v30 }
 0x576   :  { %8117 = vpow2.f32 %v6897_v35 }
 0x582   :  { %v8116_v31 = vpop.eup %8115 }
 0x583   :  { %v492_v32 = vsub.f32 %v338_v3, %v8116_v31  ;;  %v8118_v36 = vpop.eup %8117 }
 0x584   :  { %v442_v37 = vadd.f32 1.0, %v8118_v36 }
 0x585   :  { %494 = vrot.lane.b32.xlu1 %v492_v32, %s8507_s8 }
 0x586   :  { %8119 = vrcp.f32 %v442_v37 }
 0x593   :  { %v8120_v38 = vpop.eup %8119 }
 0x5f7   :  { %v495_v39 = vpop.permute.xlu1 %494 }
 0x5f8   :  { %v497_v40 = vmul.f32 %v8120_v38, %v495_v39 }
 0x5fa   :  { %499 = vrot.lane.b32.xlu0 %v497_v40, %s8509_s11 }
 0x66c   :  { %v500_v41 = vpop.permute.xlu0 %499 }
 0x66d   :  { %v502_v42 = vadd.f32 %v8116_v31, %v500_v41 }
 0x66f   :  { %v504_v43 = vpack.c.bf16 %v502_v42, %v502_v42 }
 0x671   :  { %506 = vrot.lane.b32.xlu1 %v504_v43, %s8510_s12 }
 0x6e3   :  { %v507_v44 = vpop.permute.xlu1 %506 }
 0x6e4   :  { %7394 = vmatmul.mubr.msk.bf16.vlgmr.msra.gmra.mxu1 %vm106_vm3, %v507_v44  ;;  %7400 = vmatmul.mubr.msk.bf16.vlgmr.msra.gmra.mxu0 %vm106_vm3, %v507_v44 }
 0x6e5   :  { %7404 = vmatpush3.bf16.msra.mxu1 %v8598_v23  ;;  %7410 = vmatpush3.bf16.msra.mxu0 %v8586_v13 }
 0x6e6   :  { %7405 = vmatprep.mubr.msk.bf16.mxu1 %vm8503_vm1, %v8502_v0  ;;  %7415 = vmatprep.subr.bf16.mxu1 %v8502_v0 }
 0x6e7   :  { %7411 = vmatprep.mubr.msk.bf16.mxu0 %vm8503_vm1, %v8502_v0  ;;  %7421 = vmatprep.subr.bf16.mxu0 %v8502_v0 }
 0x6ec   :  { %7406 = vmatmul.mubr.msk.bf16.vlgmr.msra.gmra.mxu1 %vm106_vm3, %v507_v44 }
 0x6ed   :  { %7416 = vmatpush3.bf16.msra.mxu1 %v8580_v11  ;;  %7417 = vmatprep.mubr.msk.bf16.mxu1 %vm8503_vm1, %v8502_v0 }
 0x6ee   :  { %7427 = vmatprep.subr.bf16.mxu1 %v8502_v0 }
 0x7a4   :  { %v545_v46 = vpop.f32.mrf.mxu1  ;;  %v592_v47 = vpop.f32.mrf.mxu0 }
 0x7a5   :  { %v551_v49 = vadd.f32 %v545_v46, %v503_v45  ;;  %599 = vrot.lane.b32.xlu1 %v592_v47, %s8509_s11 }
 0x7a6   :  { %v7395_v50 = vpop.f32.mrf.mxu1  ;;  %v7401_v51 = vpop.f32.mrf.mxu0 }
 0x7a7   :  { %v6900_v52 = vmul.f32 -1.442695, %v551_v49 }
 0x7a8   :  { %v548_v53 = vpop.f32.mrf.mxu1  ;;  %v595_v54 = vpop.f32.mrf.mxu0 }
 0x7a9   :  { %8121 = vpow2.f32 %v6900_v52 }
 0x7aa   :  { %v7396_v55 = vpop.f32.mrf.mxu1  ;;  %v7402_v56 = vpop.f32.mrf.mxu0 }
 0x7ac   :  { %v643_v57 = vpop.f32.mrf.mxu1 }
 0x7ad   :  { %v644_v63 = vadd.f32 %v643_v57, %v8610_v48 }
 0x7ae   :  { %v7407_v58 = vpop.f32.mrf.mxu1 }
 0x7b0   :  { %v646_v59 = vpop.f32.mrf.mxu1 }
 0x7b1   :  { %v831_v59 = vld [vmem:[#allocation2 + $0x8] sm:$0x3] }
 0x7b2   :  { %v7408_v60 = vpop.f32.mrf.mxu1 }
 0x7b6   :  { %v8122_v61 = vpop.eup %8121 }
 0x7b7   :  { %v555_v62 = vadd.f32 1.0, %v8122_v61 }
 0x7b9   :  { %8123 = vrcp.f32 %v555_v62 }
 0x7c6   :  { %v8124_v1 = vpop.eup %8123 }
 0x7c7   :  { %v649_v2 = vmul.f32 %v8124_v1, %v644_v63 }
 0x7c9   :  { %651 = vrot.lane.b32.xlu0 %v649_v2, %s8508_s1 }
 0x817   :  { %v600_v7 = vpop.permute.xlu1 %599 }
 0x818   :  { %v602_v8 = vadd.f32 %v600_v7, %v503_v45 }
 0x81a   :  { %v6902_v9 = vmul.f32 -1.442695, %v602_v8 }
 0x83b   :  { %v652_v3 = vpop.permute.xlu0 %651 }
 0x83c   :  { %v654_v4 = vadd.f32 %v652_v3, %v503_v45 }
 0x83e   :  { %8125 = vtanh.f32 %v654_v4 }
 0x83f   :  { %8127 = vpow2.f32 %v6902_v9 }
 0x84b   :  { %v8126_v5 = vpop.eup %8125 }
 0x84c   :  { %v656_v6 = vsub.f32 %v502_v42, %v8126_v5  ;;  %v8128_v10 = vpop.eup %8127 }
 0x84d   :  { %v606_v12 = vadd.f32 1.0, %v8128_v10 }
 0x84e   :  { %658 = vrot.lane.b32.xlu0 %v656_v6, %s8507_s8 }
 0x84f   :  { %8129 = vrcp.f32 %v606_v12 }
 0x85c   :  { %v8130_v14 = vpop.eup %8129 }
 0x8c0   :  { %v659_v15 = vpop.permute.xlu0 %658 }
 0x8c1   :  { %v661_v16 = vmul.f32 %v8130_v14, %v659_v15 }
 0x8c3   :  { %663 = vrot.lane.b32.xlu1 %v661_v16, %s8509_s11 }
 0x935   :  { %v664_v17 = vpop.permute.xlu1 %663 }
 0x936   :  { %v666_v18 = vadd.f32 %v8126_v5, %v664_v17 }
 0x938   :  { %v668_v19 = vpack.c.bf16 %v666_v18, %v666_v18 }
 0x93a   :  { %670 = vrot.lane.b32.xlu0 %v668_v19, %s8510_s12 }
 0x9ac   :  { %v671_v20 = vpop.permute.xlu0 %670 }
 0x9ad   :  { %7412 = vmatmul.mubr.msk.bf16.vlgmr.msra.gmra.mxu0 %vm106_vm3, %v671_v20  ;;  %7418 = vmatmul.mubr.msk.bf16.vlgmr.msra.gmra.mxu1 %vm106_vm3, %v671_v20 }
 0x9ae   :  { %7422 = vmatpush3.bf16.msra.mxu0 %v8598_v23  ;;  %7428 = vmatpush3.bf16.msra.mxu1 %v8586_v13 }
 0x9af   :  { %7423 = vmatprep.mubr.msk.bf16.mxu0 %vm8503_vm1, %v8502_v0  ;;  %7433 = vmatprep.subr.bf16.mxu0 %v8502_v0 }
 0x9b0   :  { %7429 = vmatprep.mubr.msk.bf16.mxu1 %vm8503_vm1, %v8502_v0  ;;  %7439 = vmatprep.subr.bf16.mxu1 %v8502_v0 }
 0x9b5   :  { %7424 = vmatmul.mubr.msk.bf16.vlgmr.msra.gmra.mxu0 %vm106_vm3, %v671_v20 }
 0x9b6   :  { %7434 = vmatpush3.bf16.msra.mxu0 %v8580_v11  ;;  %7435 = vmatprep.mubr.msk.bf16.mxu0 %vm8503_vm1, %v8502_v0 }
 0x9b7   :  { %7445 = vmatprep.subr.bf16.mxu0 %v8502_v0 }
 0xa6d   :  { %v709_v22 = vpop.f32.mrf.mxu0  ;;  %v756_v24 = vpop.f32.mrf.mxu1 }
 0xa6e   :  { %v715_v25 = vadd.f32 %v709_v22, %v667_v21  ;;  %763 = vrot.lane.b32.xlu0 %v756_v24, %s8509_s11 }
 0xa6f   :  { %v7413_v26 = vpop.f32.mrf.mxu0  ;;  %v7419_v27 = vpop.f32.mrf.mxu1 }
 0xa70   :  { %v6905_v28 = vmul.f32 -1.442695, %v715_v25 }
 0xa71   :  { %v712_v29 = vpop.f32.mrf.mxu0  ;;  %v759_v30 = vpop.f32.mrf.mxu1 }
 0xa72   :  { %8131 = vpow2.f32 %v6905_v28 }
 0xa73   :  { %v7414_v31 = vpop.f32.mrf.mxu0  ;;  %v7420_v32 = vpop.f32.mrf.mxu1 }
 0xa75   :  { %v807_v33 = vpop.f32.mrf.mxu0 }
 0xa76   :  { %v808_v39 = vadd.f32 %v807_v33, %v8610_v48 }
 0xa77   :  { %v7425_v34 = vpop.f32.mrf.mxu0 }
 0xa79   :  { %v810_v35 = vpop.f32.mrf.mxu0 }
 0xa7a   :  { %v995_v35 = vld [vmem:[#allocation2 + $0xa] sm:$0x3] }
 0xa7b   :  { %v7426_v36 = vpop.f32.mrf.mxu0 }
 0xa7f   :  { %v8132_v37 = vpop.eup %8131 }
 0xa80   :  { %v719_v38 = vadd.f32 1.0, %v8132_v37 }
 0xa82   :  { %8133 = vrcp.f32 %v719_v38 }
 0xa8f   :  { %v8134_v40 = vpop.eup %8133 }
 0xa90   :  { %v813_v41 = vmul.f32 %v8134_v40, %v808_v39 }
 0xa92   :  { %815 = vrot.lane.b32.xlu1 %v813_v41, %s8508_s1 }
 0xae0   :  { %v764_v46 = vpop.permute.xlu0 %763 }
 0xae1   :  { %v766_v47 = vadd.f32 %v764_v46, %v667_v21 }
 0xae3   :  { %v6907_v49 = vmul.f32 -1.442695, %v766_v47 }
 0xb04   :  { %v816_v42 = vpop.permute.xlu1 %815 }
 0xb05   :  { %v818_v43 = vadd.f32 %v816_v42, %v667_v21 }
 0xb07   :  { %8135 = vtanh.f32 %v818_v43 }
 0xb08   :  { %8137 = vpow2.f32 %v6907_v49 }
 0xb14   :  { %v8136_v44 = vpop.eup %8135 }
 0xb15   :  { %v820_v45 = vsub.f32 %v666_v18, %v8136_v44  ;;  %v8138_v50 = vpop.eup %8137 }
 0xb16   :  { %v770_v51 = vadd.f32 1.0, %v8138_v50 }
 0xb17   :  { %822 = vrot.lane.b32.xlu1 %v820_v45, %s8507_s8 }
 0xb18   :  { %8139 = vrcp.f32 %v770_v51 }
 0xb25   :  { %v8140_v52 = vpop.eup %8139 }
 0xb89   :  { %v823_v53 = vpop.permute.xlu1 %822 }
 0xb8a   :  { %v825_v54 = vmul.f32 %v8140_v52, %v823_v53 }
 0xb8c   :  { %827 = vrot.lane.b32.xlu0 %v825_v54, %s8509_s11 }
 0xbfe   :  { %v828_v55 = vpop.permute.xlu0 %827 }
 0xbff   :  { %v830_v56 = vadd.f32 %v8136_v44, %v828_v55 }
 0xc01   :  { %v832_v57 = vpack.c.bf16 %v830_v56, %v830_v56 }
 0xc03   :  { %834 = vrot.lane.b32.xlu1 %v832_v57, %s8510_s12 }
 0xc75   :  { %v835_v58 = vpop.permute.xlu1 %834 }
 0xc76   :  { %7430 = vmatmul.mubr.msk.bf16.vlgmr.msra.gmra.mxu1 %vm106_vm3, %v835_v58  ;;  %7436 = vmatmul.mubr.msk.bf16.vlgmr.msra.gmra.mxu0 %vm106_vm3, %v835_v58 }
 0xc77   :  { %7440 = vmatpush3.bf16.msra.mxu1 %v8598_v23  ;;  %7446 = vmatpush3.bf16.msra.mxu0 %v8586_v13 }
 0xc78   :  { %7441 = vmatprep.mubr.msk.bf16.mxu1 %vm8503_vm1, %v8502_v0  ;;  %7451 = vmatprep.subr.bf16.mxu1 %v8502_v0 }
 0xc79   :  { %7447 = vmatprep.mubr.msk.bf16.mxu0 %vm8503_vm1, %v8502_v0  ;;  %7457 = vmatprep.subr.bf16.mxu0 %v8502_v0 }
 0xc7e   :  { %7442 = vmatmul.mubr.msk.bf16.vlgmr.msra.gmra.mxu1 %vm106_vm3, %v835_v58 }
 0xc7f   :  { %7452 = vmatpush3.bf16.msra.mxu1 %v8580_v11  ;;  %7453 = vmatprep.mubr.msk.bf16.mxu1 %vm8503_vm1, %v8502_v0 }
 0xc80   :  { %7463 = vmatprep.subr.bf16.mxu1 %v8502_v0 }
 0xd36   :  { %v873_v60 = vpop.f32.mrf.mxu1  ;;  %v920_v61 = vpop.f32.mrf.mxu0 }
 0xd37   :  { %v879_v62 = vadd.f32 %v873_v60, %v831_v59  ;;  %927 = vrot.lane.b32.xlu1 %v920_v61, %s8509_s11 }
 0xd38   :  { %v7431_v63 = vpop.f32.mrf.mxu1  ;;  %v7437_v1 = vpop.f32.mrf.mxu0 }
 0xd39   :  { %v6910_v2 = vmul.f32 -1.442695, %v879_v62 }
 0xd3a   :  { %v876_v3 = vpop.f32.mrf.mxu1  ;;  %v923_v4 = vpop.f32.mrf.mxu0 }
 0xd3b   :  { %8141 = vpow2.f32 %v6910_v2 }
 0xd3c   :  { %v7432_v5 = vpop.f32.mrf.mxu1  ;;  %v7438_v6 = vpop.f32.mrf.mxu0 }
 0xd3e   :  { %v971_v7 = vpop.f32.mrf.mxu1 }
 0xd3f   :  { %v972_v15 = vadd.f32 %v971_v7, %v8610_v48 }
 0xd40   :  { %v7443_v8 = vpop.f32.mrf.mxu1 }
 0xd42   :  { %v974_v9 = vpop.f32.mrf.mxu1 }
 0xd43   :  { %v1159_v9 = vld [vmem:[#allocation2 + $0xc] sm:$0x3] }
 0xd44   :  { %v7444_v10 = vpop.f32.mrf.mxu1 }
 0xd48   :  { %v8142_v12 = vpop.eup %8141 }
 0xd49   :  { %v883_v14 = vadd.f32 1.0, %v8142_v12 }
 0xd4b   :  { %8143 = vrcp.f32 %v883_v14 }
 0xd58   :  { %v8144_v16 = vpop.eup %8143 }
 0xd59   :  { %v977_v17 = vmul.f32 %v8144_v16, %v972_v15 }
 0xd5b   :  { %979 = vrot.lane.b32.xlu0 %v977_v17, %s8508_s1 }
 0xda9   :  { %v928_v22 = vpop.permute.xlu1 %927 }
 0xdaa   :  { %v930_v24 = vadd.f32 %v928_v22, %v831_v59 }
 0xdac   :  { %v6912_v25 = vmul.f32 -1.442695, %v930_v24 }
 0xdcd   :  { %v980_v18 = vpop.permute.xlu0 %979 }
 0xdce   :  { %v982_v19 = vadd.f32 %v980_v18, %v831_v59 }
 0xdd0   :  { %8145 = vtanh.f32 %v982_v19 }
 0xdd1   :  { %8147 = vpow2.f32 %v6912_v25 }
 0xddd   :  { %v8146_v20 = vpop.eup %8145 }
 0xdde   :  { %v984_v21 = vsub.f32 %v830_v56, %v8146_v20  ;;  %v8148_v26 = vpop.eup %8147 }
 0xddf   :  { %v934_v27 = vadd.f32 1.0, %v8148_v26 }
 0xde0   :  { %986 = vrot.lane.b32.xlu0 %v984_v21, %s8507_s8 }
 0xde1   :  { %8149 = vrcp.f32 %v934_v27 }
 0xdee   :  { %v8150_v28 = vpop.eup %8149 }
 0xe52   :  { %v987_v29 = vpop.permute.xlu0 %986 }
 0xe53   :  { %v989_v30 = vmul.f32 %v8150_v28, %v987_v29 }
 0xe55   :  { %991 = vrot.lane.b32.xlu1 %v989_v30, %s8509_s11 }
 0xec7   :  { %v992_v31 = vpop.permute.xlu1 %991 }
 0xec8   :  { %v994_v32 = vadd.f32 %v8146_v20, %v992_v31 }
 0xeca   :  { %v996_v33 = vpack.c.bf16 %v994_v32, %v994_v32 }
 0xecc   :  { %998 = vrot.lane.b32.xlu0 %v996_v33, %s8510_s12 }
 0xf3e   :  { %v999_v34 = vpop.permute.xlu0 %998 }
 0xf3f   :  { %7448 = vmatmul.mubr.msk.bf16.vlgmr.msra.gmra.mxu0 %vm106_vm3, %v999_v34  ;;  %7454 = vmatmul.mubr.msk.bf16.vlgmr.msra.gmra.mxu1 %vm106_vm3, %v999_v34 }
 0xf40   :  { %7458 = vmatpush3.bf16.msra.mxu0 %v8598_v23  ;;  %7464 = vmatpush3.bf16.msra.mxu1 %v8586_v13 }
 0xf41   :  { %7459 = vmatprep.mubr.msk.bf16.mxu0 %vm8503_vm1, %v8502_v0  ;;  %7469 = vmatprep.subr.bf16.mxu0 %v8502_v0 }
 0xf42   :  { %7465 = vmatprep.mubr.msk.bf16.mxu1 %vm8503_vm1, %v8502_v0  ;;  %7475 = vmatprep.subr.bf16.mxu1 %v8502_v0 }
 0xf47   :  { %7460 = vmatmul.mubr.msk.bf16.vlgmr.msra.gmra.mxu0 %vm106_vm3, %v999_v34 }
 0xf48   :  { %7470 = vmatpush3.bf16.msra.mxu0 %v8580_v11  ;;  %7471 = vmatprep.mubr.msk.bf16.mxu0 %vm8503_vm1, %v8502_v0 }
 0xf49   :  { %7481 = vmatprep.subr.bf16.mxu0 %v8502_v0 }
 0xfff   :  { %v1037_v36 = vpop.f32.mrf.mxu0  ;;  %v1084_v37 = vpop.f32.mrf.mxu1 }
0x1000   :  { %v1043_v38 = vadd.f32 %v1037_v36, %v995_v35  ;;  %1091 = vrot.lane.b32.xlu0 %v1084_v37, %s8509_s11 }
0x1001   :  { %v7449_v39 = vpop.f32.mrf.mxu0  ;;  %v7455_v40 = vpop.f32.mrf.mxu1 }
0x1002   :  { %v6915_v41 = vmul.f32 -1.442695, %v1043_v38 }
0x1003   :  { %v1040_v42 = vpop.f32.mrf.mxu0  ;;  %v1087_v43 = vpop.f32.mrf.mxu1 }
0x1004   :  { %8151 = vpow2.f32 %v6915_v41 }
0x1005   :  { %v7450_v44 = vpop.f32.mrf.mxu0  ;;  %v7456_v45 = vpop.f32.mrf.mxu1 }
0x1007   :  { %v1135_v46 = vpop.f32.mrf.mxu0 }
0x1008   :  { %v1136_v53 = vadd.f32 %v1135_v46, %v8610_v48 }
0x1009   :  { %v7461_v47 = vpop.f32.mrf.mxu0 }
0x100b   :  { %v1138_v49 = vpop.f32.mrf.mxu0 }
0x100c   :  { %v1323_v49 = vld [vmem:[#allocation2 + $0xe] sm:$0x3] }
0x100d   :  { %v7462_v50 = vpop.f32.mrf.mxu0 }
0x1011   :  { %v8152_v51 = vpop.eup %8151 }
0x1012   :  { %v1047_v52 = vadd.f32 1.0, %v8152_v51 }
0x1014   :  { %8153 = vrcp.f32 %v1047_v52 }
0x1021   :  { %v8154_v54 = vpop.eup %8153 }
0x1022   :  { %v1141_v55 = vmul.f32 %v8154_v54, %v1136_v53 }
0x1024   :  { %1143 = vrot.lane.b32.xlu1 %v1141_v55, %s8508_s1 }
0x1072   :  { %v1092_v60 = vpop.permute.xlu0 %1091 }
0x1073   :  { %v1094_v61 = vadd.f32 %v1092_v60, %v995_v35 }
0x1075   :  { %v6917_v62 = vmul.f32 -1.442695, %v1094_v61 }
0x1096   :  { %v1144_v56 = vpop.permute.xlu1 %1143 }
0x1097   :  { %v1146_v57 = vadd.f32 %v1144_v56, %v995_v35 }
0x1099   :  { %8155 = vtanh.f32 %v1146_v57 }
0x109a   :  { %8157 = vpow2.f32 %v6917_v62 }
0x10a6   :  { %v8156_v58 = vpop.eup %8155 }
0x10a7   :  { %v1148_v59 = vsub.f32 %v994_v32, %v8156_v58  ;;  %v8158_v63 = vpop.eup %8157 }
0x10a8   :  { %v1098_v1 = vadd.f32 1.0, %v8158_v63 }
0x10a9   :  { %1150 = vrot.lane.b32.xlu1 %v1148_v59, %s8507_s8 }
0x10aa   :  { %8159 = vrcp.f32 %v1098_v1 }
0x10b7   :  { %v8160_v2 = vpop.eup %8159 }
0x111b   :  { %v1151_v3 = vpop.permute.xlu1 %1150 }
0x111c   :  { %v1153_v4 = vmul.f32 %v8160_v2, %v1151_v3 }
0x111e   :  { %1155 = vrot.lane.b32.xlu0 %v1153_v4, %s8509_s11 }
0x1190   :  { %v1156_v5 = vpop.permute.xlu0 %1155 }
0x1191   :  { %v1158_v6 = vadd.f32 %v8156_v58, %v1156_v5 }
0x1193   :  { %v1160_v7 = vpack.c.bf16 %v1158_v6, %v1158_v6 }
0x1195   :  { %1162 = vrot.lane.b32.xlu1 %v1160_v7, %s8510_s12 }
0x1207   :  { %v1163_v8 = vpop.permute.xlu1 %1162 }
0x1208   :  { %7466 = vmatmul.mubr.msk.bf16.vlgmr.msra.gmra.mxu1 %vm106_vm3, %v1163_v8  ;;  %7472 = vmatmul.mubr.msk.bf16.vlgmr.msra.gmra.mxu0 %vm106_vm3, %v1163_v8 }
0x1209   :  { %7476 = vmatpush3.bf16.msra.mxu1 %v8598_v23  ;;  %7482 = vmatpush3.bf16.msra.mxu0 %v8586_v13 }
0x120a   :  { %7477 = vmatprep.mubr.msk.bf16.mxu1 %vm8503_vm1, %v8502_v0  ;;  %7487 = vmatprep.subr.bf16.mxu1 %v8502_v0 }
0x120b   :  { %7483 = vmatprep.mubr.msk.bf16.mxu0 %vm8503_vm1, %v8502_v0  ;;  %7493 = vmatprep.subr.bf16.mxu0 %v8502_v0 }
0x1210   :  { %7478 = vmatmul.mubr.msk.bf16.vlgmr.msra.gmra.mxu1 %vm106_vm3, %v1163_v8 }
0x1211   :  { %7488 = vmatpush3.bf16.msra.mxu1 %v8580_v11  ;;  %7489 = vmatprep.mubr.msk.bf16.mxu1 %vm8503_vm1, %v8502_v0 }
0x1212   :  { %7499 = vmatprep.subr.bf16.mxu1 %v8502_v0 }
0x12c8   :  { %v1201_v10 = vpop.f32.mrf.mxu1  ;;  %v1248_v12 = vpop.f32.mrf.mxu0 }
0x12c9   :  { %v1207_v14 = vadd.f32 %v1201_v10, %v1159_v9  ;;  %1255 = vrot.lane.b32.xlu1 %v1248_v12, %s8509_s11 }
0x12ca   :  { %v7467_v15 = vpop.f32.mrf.mxu1  ;;  %v7473_v16 = vpop.f32.mrf.mxu0 }
0x12cb   :  { %v6920_v17 = vmul.f32 -1.442695, %v1207_v14 }
0x12cc   :  { %v1204_v18 = vpop.f32.mrf.mxu1  ;;  %v1251_v19 = vpop.f32.mrf.mxu0 }
0x12cd   :  { %8161 = vpow2.f32 %v6920_v17 }
0x12ce   :  { %v7468_v20 = vpop.f32.mrf.mxu1  ;;  %v7474_v21 = vpop.f32.mrf.mxu0 }
0x12d0   :  { %v1299_v22 = vpop.f32.mrf.mxu1 }
0x12d1   :  { %v1300_v29 = vadd.f32 %v1299_v22, %v8610_v48 }
0x12d2   :  { %v7479_v24 = vpop.f32.mrf.mxu1 }
0x12d4   :  { %v1302_v25 = vpop.f32.mrf.mxu1 }
0x12d5   :  { %v1493_v25 = vld [vmem:[#allocation2] sm:$0x3] }
0x12d6   :  { %v7480_v26 = vpop.f32.mrf.mxu1 }
0x12da   :  { %v8162_v27 = vpop.eup %8161 }
0x12db   :  { %v1211_v28 = vadd.f32 1.0, %v8162_v27 }
0x12dd   :  { %8163 = vrcp.f32 %v1211_v28 }
0x12ea   :  { %v8164_v30 = vpop.eup %8163 }
0x12eb   :  { %v1305_v31 = vmul.f32 %v8164_v30, %v1300_v29 }
0x12ed   :  { %1307 = vrot.lane.b32.xlu0 %v1305_v31, %s8508_s1 }
0x133b   :  { %v1256_v36 = vpop.permute.xlu1 %1255 }
0x133c   :  { %v1258_v37 = vadd.f32 %v1256_v36, %v1159_v9 }
0x133e   :  { %v6922_v38 = vmul.f32 -1.442695, %v1258_v37 }
0x135f   :  { %v1308_v32 = vpop.permute.xlu0 %1307 }
0x1360   :  { %v1310_v33 = vadd.f32 %v1308_v32, %v1159_v9 }
0x1362   :  { %8165 = vtanh.f32 %v1310_v33 }
0x1363   :  { %8167 = vpow2.f32 %v6922_v38 }
0x136f   :  { %v8166_v34 = vpop.eup %8165 }
0x1370   :  { %v1312_v35 = vsub.f32 %v1158_v6, %v8166_v34  ;;  %v8168_v39 = vpop.eup %8167 }
0x1371   :  { %v1262_v40 = vadd.f32 1.0, %v8168_v39 }
0x1372   :  { %1314 = vrot.lane.b32.xlu0 %v1312_v35, %s8507_s8 }
0x1373   :  { %8169 = vrcp.f32 %v1262_v40 }
0x1380   :  { %v8170_v41 = vpop.eup %8169 }
0x13e4   :  { %v1315_v42 = vpop.permute.xlu0 %1314 }
0x13e5   :  { %v1317_v43 = vmul.f32 %v8170_v41, %v1315_v42 }
0x13e7   :  { %1319 = vrot.lane.b32.xlu1 %v1317_v43, %s8509_s11 }
0x1459   :  { %v1320_v44 = vpop.permute.xlu1 %1319 }
0x145a   :  { %v1322_v45 = vadd.f32 %v8166_v34, %v1320_v44 }
0x145c   :  { %v1324_v46 = vpack.c.bf16 %v1322_v45, %v1322_v45 }
0x145e   :  { %1326 = vrot.lane.b32.xlu0 %v1324_v46, %s8510_s12 }
0x14d0   :  { %v1327_v47 = vpop.permute.xlu0 %1326 }
0x14d1   :  { %7484 = vmatmul.mubr.msk.bf16.vlgmr.msra.gmra.mxu0 %vm106_vm3, %v1327_v47  ;;  %7490 = vmatmul.mubr.msk.bf16.vlgmr.msra.gmra.mxu1 %vm106_vm3, %v1327_v47 }
0x14d2   :  { %7494 = vmatpush3.bf16.msra.mxu0 %v8598_v23  ;;  %7500 = vmatpush3.bf16.msra.mxu1 %v8586_v13 }
0x14d3   :  { %7495 = vmatprep.mubr.msk.bf16.mxu0 %vm8503_vm1, %v8502_v0  ;;  %7505 = vmatprep.subr.bf16.mxu0 %v8502_v0 }
0x14d4   :  { %7501 = vmatprep.mubr.msk.bf16.mxu1 %vm8503_vm1, %v8502_v0  ;;  %7511 = vmatprep.subr.bf16.mxu1 %v8502_v0 }
0x14d9   :  { %7496 = vmatmul.mubr.msk.bf16.vlgmr.msra.gmra.mxu0 %vm106_vm3, %v1327_v47 }
0x14da   :  { %7506 = vmatpush3.bf16.msra.mxu0 %v8580_v11  ;;  %7507 = vmatprep.mubr.msk.bf16.mxu0 %vm8503_vm1, %v8502_v0 }
0x14db   :  { %7517 = vmatprep.subr.bf16.mxu0 %v8502_v0 }
0x1591   :  { %v1365_v50 = vpop.f32.mrf.mxu0  ;;  %v1412_v51 = vpop.f32.mrf.mxu1 }
0x1592   :  { %v1371_v52 = vadd.f32 %v1365_v50, %v1323_v49  ;;  %1419 = vrot.lane.b32.xlu0 %v1412_v51, %s8509_s11 }
0x1593   :  { %v7485_v53 = vpop.f32.mrf.mxu0  ;;  %v7491_v54 = vpop.f32.mrf.mxu1 }
0x1594   :  { %v6925_v55 = vmul.f32 -1.442695, %v1371_v52 }
0x1595   :  { %v1368_v56 = vpop.f32.mrf.mxu0  ;;  %v1415_v57 = vpop.f32.mrf.mxu1 }
0x1596   :  { %8171 = vpow2.f32 %v6925_v55 }
0x1597   :  { %v7486_v58 = vpop.f32.mrf.mxu0  ;;  %v7492_v59 = vpop.f32.mrf.mxu1 }
0x1599   :  { %v1463_v60 = vpop.f32.mrf.mxu0 }
0x159a   :  { %v1464_v3 = vadd.f32 %v1463_v60, %v8610_v48 }
0x159b   :  { %v7497_v61 = vpop.f32.mrf.mxu0 }
0x159d   :  { %v1466_v62 = vpop.f32.mrf.mxu0 }
0x159e   :  { %v1657_v62 = vld [vmem:[#allocation2 + $0x2] sm:$0x3] }
0x159f   :  { %v7498_v63 = vpop.f32.mrf.mxu0 }
0x15a3   :  { %v8172_v1 = vpop.eup %8171 }
0x15a4   :  { %v1375_v2 = vadd.f32 1.0, %v8172_v1 }
0x15a6   :  { %8173 = vrcp.f32 %v1375_v2 }
0x15b3   :  { %v8174_v4 = vpop.eup %8173 }
0x15b4   :  { %v1469_v5 = vmul.f32 %v8174_v4, %v1464_v3 }
0x15b6   :  { %1471 = vrot.lane.b32.xlu1 %v1469_v5, %s8508_s1 }
0x1604   :  { %v1420_v10 = vpop.permute.xlu0 %1419 }
0x1605   :  { %v1422_v12 = vadd.f32 %v1420_v10, %v1323_v49 }
0x1607   :  { %v6927_v14 = vmul.f32 -1.442695, %v1422_v12 }
0x1628   :  { %v1472_v6 = vpop.permute.xlu1 %1471 }
0x1629   :  { %v1474_v7 = vadd.f32 %v1472_v6, %v1323_v49 }
0x162b   :  { %8175 = vtanh.f32 %v1474_v7 }
0x162c   :  { %8177 = vpow2.f32 %v6927_v14 }
0x1638   :  { %v8176_v8 = vpop.eup %8175 }
0x1639   :  { %v1476_v9 = vsub.f32 %v1322_v45, %v8176_v8  ;;  %v8178_v15 = vpop.eup %8177 }
0x163a   :  { %v1426_v16 = vadd.f32 1.0, %v8178_v15 }
0x163b   :  { %1478 = vrot.lane.b32.xlu1 %v1476_v9, %s8507_s8 }
0x163c   :  { %8179 = vrcp.f32 %v1426_v16 }
0x1649   :  { %v8180_v17 = vpop.eup %8179 }
0x16ad   :  { %v1479_v18 = vpop.permute.xlu1 %1478 }
0x16ae   :  { %v1481_v19 = vmul.f32 %v8180_v17, %v1479_v18 }
0x16b0   :  { %1483 = vrot.lane.b32.xlu0 %v1481_v19, %s8509_s11 }
0x1722   :  { %v1484_v20 = vpop.permute.xlu0 %1483 }
0x1723   :  { %v8766_v21 = vadd.f32 %v8176_v8, %v1484_v20 }
0x1725   :  { %v1494_v22 = vpack.c.bf16 %v8766_v21, %v8766_v21 }
0x1727   :  { %1496 = vrot.lane.b32.xlu1 %v1494_v22, %s8510_s12 }
0x1799   :  { %v1497_v24 = vpop.permute.xlu1 %1496 }
0x179a   :  { %7502 = vmatmul.mubr.msk.bf16.vlgmr.msra.gmra.mxu1 %vm106_vm3, %v1497_v24  ;;  %7508 = vmatmul.mubr.msk.bf16.vlgmr.msra.gmra.mxu0 %vm106_vm3, %v1497_v24 }
0x179b   :  { %7512 = vmatpush3.bf16.msra.mxu1 %v8598_v23  ;;  %7518 = vmatpush3.bf16.msra.mxu0 %v8586_v13 }
0x179c   :  { %7513 = vmatprep.mubr.msk.bf16.mxu1 %vm8503_vm1, %v8502_v0  ;;  %7523 = vmatprep.subr.bf16.mxu1 %v8502_v0 }
0x179d   :  { %7519 = vmatprep.mubr.msk.bf16.mxu0 %vm8503_vm1, %v8502_v0  ;;  %7529 = vmatprep.subr.bf16.mxu0 %v8502_v0 }
0x17a2   :  { %7514 = vmatmul.mubr.msk.bf16.vlgmr.msra.gmra.mxu1 %vm106_vm3, %v1497_v24 }
0x17a3   :  { %7524 = vmatpush3.bf16.msra.mxu1 %v8580_v11  ;;  %7525 = vmatprep.mubr.msk.bf16.mxu1 %vm8503_vm1, %v8502_v0 }
0x17a4   :  { %7535 = vmatprep.subr.bf16.mxu1 %v8502_v0 }
0x185a   :  { %v1535_v26 = vpop.f32.mrf.mxu1  ;;  %v1582_v27 = vpop.f32.mrf.mxu0 }
0x185b   :  { %v1541_v28 = vadd.f32 %v1535_v26, %v1493_v25  ;;  %1589 = vrot.lane.b32.xlu1 %v1582_v27, %s8509_s11 }
0x185c   :  { %v7503_v29 = vpop.f32.mrf.mxu1  ;;  %v7509_v30 = vpop.f32.mrf.mxu0 }
0x185d   :  { %v6930_v31 = vmul.f32 -1.442695, %v1541_v28 }
0x185e   :  { %v1538_v32 = vpop.f32.mrf.mxu1  ;;  %v1585_v33 = vpop.f32.mrf.mxu0 }
0x185f   :  { %8181 = vpow2.f32 %v6930_v31 }
0x1860   :  { %v7504_v34 = vpop.f32.mrf.mxu1  ;;  %v7510_v35 = vpop.f32.mrf.mxu0 }
0x1862   :  { %v1633_v36 = vpop.f32.mrf.mxu1 }
0x1863   :  { %v1634_v42 = vadd.f32 %v1633_v36, %v8610_v48 }
0x1864   :  { %v7515_v37 = vpop.f32.mrf.mxu1 }
0x1866   :  { %v1636_v38 = vpop.f32.mrf.mxu1 }
0x1868   :  { %v7516_v39 = vpop.f32.mrf.mxu1 }
0x1869   :  { %v1821_v39 = vld [vmem:[#allocation2 + $0x4] sm:$0x3] }
0x186c   :  { %v8182_v40 = vpop.eup %8181 }
0x186d   :  { %v1545_v41 = vadd.f32 1.0, %v8182_v40 }
0x186f   :  { %8183 = vrcp.f32 %v1545_v41 }
0x187c   :  { %v8184_v43 = vpop.eup %8183 }
0x187d   :  { %v1639_v44 = vmul.f32 %v8184_v43, %v1634_v42 }
0x187f   :  { %1641 = vrot.lane.b32.xlu0 %v1639_v44, %s8508_s1 }
0x18cd   :  { %v1590_v50 = vpop.permute.xlu1 %1589 }
0x18ce   :  { %v1592_v51 = vadd.f32 %v1590_v50, %v1493_v25 }
0x18d0   :  { %v6932_v52 = vmul.f32 -1.442695, %v1592_v51 }
0x18f1   :  { %v1642_v45 = vpop.permute.xlu0 %1641 }
0x18f2   :  { %v1644_v46 = vadd.f32 %v1642_v45, %v1493_v25 }
0x18f4   :  { %8185 = vtanh.f32 %v1644_v46 }
0x18f5   :  { %8187 = vpow2.f32 %v6932_v52 }
0x1901   :  { %v8186_v47 = vpop.eup %8185 }
0x1902   :  { %v1646_v49 = vsub.f32 %v8766_v21, %v8186_v47  ;;  %v8188_v53 = vpop.eup %8187 }
0x1903   :  { %v1596_v54 = vadd.f32 1.0, %v8188_v53 }
0x1904   :  { %1648 = vrot.lane.b32.xlu0 %v1646_v49, %s8507_s8 }
0x1905   :  { %8189 = vrcp.f32 %v1596_v54 }
0x1912   :  { %v8190_v55 = vpop.eup %8189 }
0x1976   :  { %v1649_v56 = vpop.permute.xlu0 %1648 }
0x1977   :  { %v1651_v57 = vmul.f32 %v8190_v55, %v1649_v56 }
0x1979   :  { %1653 = vrot.lane.b32.xlu1 %v1651_v57, %s8509_s11 }
0x19eb   :  { %v1654_v58 = vpop.permute.xlu1 %1653 }
0x19ec   :  { %v1656_v59 = vadd.f32 %v8186_v47, %v1654_v58 }
0x19ee   :  { %v1658_v60 = vpack.c.bf16 %v1656_v59, %v1656_v59 }
0x19f0   :  { %1660 = vrot.lane.b32.xlu0 %v1658_v60, %s8510_s12 }
0x1a62   :  { %v1661_v61 = vpop.permute.xlu0 %1660 }
0x1a63   :  { %7520 = vmatmul.mubr.msk.bf16.vlgmr.msra.gmra.mxu0 %vm106_vm3, %v1661_v61  ;;  %7526 = vmatmul.mubr.msk.bf16.vlgmr.msra.gmra.mxu1 %vm106_vm3, %v1661_v61 }
0x1a64   :  { %7530 = vmatpush3.bf16.msra.mxu0 %v8598_v23  ;;  %7536 = vmatpush3.bf16.msra.mxu1 %v8586_v13 }
0x1a65   :  { %7531 = vmatprep.mubr.msk.bf16.mxu0 %vm8503_vm1, %v8502_v0  ;;  %7541 = vmatprep.subr.bf16.mxu0 %v8502_v0 }
0x1a66   :  { %7537 = vmatprep.mubr.msk.bf16.mxu1 %vm8503_vm1, %v8502_v0  ;;  %7547 = vmatprep.subr.bf16.mxu1 %v8502_v0 }
0x1a6b   :  { %7532 = vmatmul.mubr.msk.bf16.vlgmr.msra.gmra.mxu0 %vm106_vm3, %v1661_v61 }
0x1a6c   :  { %7542 = vmatpush3.bf16.msra.mxu0 %v8580_v11  ;;  %7543 = vmatprep.mubr.msk.bf16.mxu0 %vm8503_vm1, %v8502_v0 }
0x1a6d   :  { %7553 = vmatprep.subr.bf16.mxu0 %v8502_v0 }
0x1b23   :  { %v1699_v63 = vpop.f32.mrf.mxu0  ;;  %v1746_v1 = vpop.f32.mrf.mxu1 }
0x1b24   :  { %v1705_v2 = vadd.f32 %v1699_v63, %v1657_v62  ;;  %1753 = vrot.lane.b32.xlu0 %v1746_v1, %s8509_s11 }
0x1b25   :  { %v7521_v3 = vpop.f32.mrf.mxu0  ;;  %v7527_v4 = vpop.f32.mrf.mxu1 }
0x1b26   :  { %v6935_v5 = vmul.f32 -1.442695, %v1705_v2 }
0x1b27   :  { %v1702_v6 = vpop.f32.mrf.mxu0  ;;  %v1749_v7 = vpop.f32.mrf.mxu1 }
0x1b28   :  { %8191 = vpow2.f32 %v6935_v5 }
0x1b29   :  { %v7522_v8 = vpop.f32.mrf.mxu0  ;;  %v7528_v9 = vpop.f32.mrf.mxu1 }
0x1b2b   :  { %v1797_v10 = vpop.f32.mrf.mxu0 }
0x1b2c   :  { %v1798_v18 = vadd.f32 %v1797_v10, %v8610_v48 }
0x1b2d   :  { %v7533_v12 = vpop.f32.mrf.mxu0 }
0x1b2f   :  { %v1800_v14 = vpop.f32.mrf.mxu0 }
0x1b31   :  { %v7534_v15 = vpop.f32.mrf.mxu0 }
0x1b32   :  { %v1985_v15 = vld [vmem:[#allocation2 + $0x6] sm:$0x3] }
0x1b35   :  { %v8192_v16 = vpop.eup %8191 }
0x1b36   :  { %v1709_v17 = vadd.f32 1.0, %v8192_v16 }
0x1b38   :  { %8193 = vrcp.f32 %v1709_v17 }
0x1b45   :  { %v8194_v19 = vpop.eup %8193 }
0x1b46   :  { %v1803_v20 = vmul.f32 %v8194_v19, %v1798_v18 }
0x1b48   :  { %1805 = vrot.lane.b32.xlu1 %v1803_v20, %s8508_s1 }
0x1b96   :  { %v1754_v27 = vpop.permute.xlu0 %1753 }
0x1b97   :  { %v1756_v28 = vadd.f32 %v1754_v27, %v1657_v62 }
0x1b99   :  { %v6937_v29 = vmul.f32 -1.442695, %v1756_v28 }
0x1bba   :  { %v1806_v22 = vpop.permute.xlu1 %1805 }
0x1bbb   :  { %v1808_v24 = vadd.f32 %v1806_v22, %v1657_v62 }
0x1bbd   :  { %8195 = vtanh.f32 %v1808_v24 }
0x1bbe   :  { %8197 = vpow2.f32 %v6937_v29 }
0x1bca   :  { %v8196_v25 = vpop.eup %8195 }
0x1bcb   :  { %v1810_v26 = vsub.f32 %v1656_v59, %v8196_v25  ;;  %v8198_v30 = vpop.eup %8197 }
0x1bcc   :  { %v1760_v31 = vadd.f32 1.0, %v8198_v30 }
0x1bcd   :  { %1812 = vrot.lane.b32.xlu1 %v1810_v26, %s8507_s8 }
0x1bce   :  { %8199 = vrcp.f32 %v1760_v31 }
0x1bdb   :  { %v8200_v32 = vpop.eup %8199 }
0x1c3f   :  { %v1813_v33 = vpop.permute.xlu1 %1812 }
0x1c40   :  { %v1815_v34 = vmul.f32 %v8200_v32, %v1813_v33 }
0x1c42   :  { %1817 = vrot.lane.b32.xlu0 %v1815_v34, %s8509_s11 }
0x1cb4   :  { %v1818_v35 = vpop.permute.xlu0 %1817 }
0x1cb5   :  { %v1820_v36 = vadd.f32 %v8196_v25, %v1818_v35 }
0x1cb7   :  { %v1822_v37 = vpack.c.bf16 %v1820_v36, %v1820_v36 }
0x1cb9   :  { %1824 = vrot.lane.b32.xlu1 %v1822_v37, %s8510_s12 }
0x1d2b   :  { %v1825_v38 = vpop.permute.xlu1 %1824 }
0x1d2c   :  { %7538 = vmatmul.mubr.msk.bf16.vlgmr.msra.gmra.mxu1 %vm106_vm3, %v1825_v38  ;;  %7544 = vmatmul.mubr.msk.bf16.vlgmr.msra.gmra.mxu0 %vm106_vm3, %v1825_v38 }
0x1d2d   :  { %7548 = vmatpush3.bf16.msra.mxu1 %v8598_v23  ;;  %7554 = vmatpush3.bf16.msra.mxu0 %v8586_v13 }
0x1d2e   :  { %7549 = vmatprep.mubr.msk.bf16.mxu1 %vm8503_vm1, %v8502_v0  ;;  %7559 = vmatprep.subr.bf16.mxu1 %v8502_v0 }
0x1d2f   :  { %7555 = vmatprep.mubr.msk.bf16.mxu0 %vm8503_vm1, %v8502_v0  ;;  %7565 = vmatprep.subr.bf16.mxu0 %v8502_v0 }
0x1d34   :  { %7550 = vmatmul.mubr.msk.bf16.vlgmr.msra.gmra.mxu1 %vm106_vm3, %v1825_v38 }
0x1d35   :  { %7560 = vmatpush3.bf16.msra.mxu1 %v8580_v11  ;;  %7561 = vmatprep.mubr.msk.bf16.mxu1 %vm8503_vm1, %v8502_v0 }
0x1d36   :  { %7571 = vmatprep.subr.bf16.mxu1 %v8502_v0 }
0x1dec   :  { %v1863_v40 = vpop.f32.mrf.mxu1  ;;  %v1910_v41 = vpop.f32.mrf.mxu0 }
0x1ded   :  { %v1869_v42 = vadd.f32 %v1863_v40, %v1821_v39  ;;  %1917 = vrot.lane.b32.xlu1 %v1910_v41, %s8509_s11 }
0x1dee   :  { %v7539_v43 = vpop.f32.mrf.mxu1  ;;  %v7545_v44 = vpop.f32.mrf.mxu0 }
0x1def   :  { %v6940_v45 = vmul.f32 -1.442695, %v1869_v42 }
0x1df0   :  { %v1866_v46 = vpop.f32.mrf.mxu1  ;;  %v1913_v47 = vpop.f32.mrf.mxu0 }
0x1df1   :  { %8201 = vpow2.f32 %v6940_v45 }
0x1df2   :  { %v7540_v49 = vpop.f32.mrf.mxu1  ;;  %v7546_v50 = vpop.f32.mrf.mxu0 }
0x1df4   :  { %v1961_v51 = vpop.f32.mrf.mxu1 }
0x1df5   :  { %v1962_v57 = vadd.f32 %v1961_v51, %v8610_v48 }
0x1df6   :  { %v7551_v52 = vpop.f32.mrf.mxu1 }
0x1df8   :  { %v1964_v53 = vpop.f32.mrf.mxu1 }
0x1dfa   :  { %v7552_v54 = vpop.f32.mrf.mxu1 }
0x1dfb   :  { %v2149_v54 = vld [vmem:[#allocation2 + $0x8] sm:$0x3] }
0x1dfe   :  { %v8202_v55 = vpop.eup %8201 }
0x1dff   :  { %v1873_v56 = vadd.f32 1.0, %v8202_v55 }
0x1e01   :  { %8203 = vrcp.f32 %v1873_v56 }
0x1e0e   :  { %v8204_v58 = vpop.eup %8203 }
0x1e0f   :  { %v1967_v59 = vmul.f32 %v8204_v58, %v1962_v57 }
0x1e11   :  { %1969 = vrot.lane.b32.xlu0 %v1967_v59, %s8508_s1 }
0x1e5f   :  { %v1918_v1 = vpop.permute.xlu1 %1917 }
0x1e60   :  { %v1920_v2 = vadd.f32 %v1918_v1, %v1821_v39 }
0x1e62   :  { %v6942_v3 = vmul.f32 -1.442695, %v1920_v2 }
0x1e83   :  { %v1970_v60 = vpop.permute.xlu0 %1969 }
0x1e84   :  { %v1972_v61 = vadd.f32 %v1970_v60, %v1821_v39 }
0x1e86   :  { %8205 = vtanh.f32 %v1972_v61 }
0x1e87   :  { %8207 = vpow2.f32 %v6942_v3 }
0x1e93   :  { %v8206_v62 = vpop.eup %8205 }
0x1e94   :  { %v1974_v63 = vsub.f32 %v1820_v36, %v8206_v62  ;;  %v8208_v4 = vpop.eup %8207 }
0x1e95   :  { %v1924_v5 = vadd.f32 1.0, %v8208_v4 }
0x1e96   :  { %1976 = vrot.lane.b32.xlu0 %v1974_v63, %s8507_s8 }
0x1e97   :  { %8209 = vrcp.f32 %v1924_v5 }
0x1ea4   :  { %v8210_v6 = vpop.eup %8209 }
0x1f08   :  { %v1977_v7 = vpop.permute.xlu0 %1976 }
0x1f09   :  { %v1979_v8 = vmul.f32 %v8210_v6, %v1977_v7 }
0x1f0b   :  { %1981 = vrot.lane.b32.xlu1 %v1979_v8, %s8509_s11 }
0x1f7d   :  { %v1982_v9 = vpop.permute.xlu1 %1981 }
0x1f7e   :  { %v1984_v10 = vadd.f32 %v8206_v62, %v1982_v9 }
0x1f80   :  { %v1986_v12 = vpack.c.bf16 %v1984_v10, %v1984_v10 }
0x1f82   :  { %1988 = vrot.lane.b32.xlu0 %v1986_v12, %s8510_s12 }
0x1ff4   :  { %v1989_v14 = vpop.permute.xlu0 %1988 }
0x1ff5   :  { %7556 = vmatmul.mubr.msk.bf16.vlgmr.msra.gmra.mxu0 %vm106_vm3, %v1989_v14  ;;  %7562 = vmatmul.mubr.msk.bf16.vlgmr.msra.gmra.mxu1 %vm106_vm3, %v1989_v14 }
0x1ff6   :  { %7566 = vmatpush3.bf16.msra.mxu0 %v8598_v23  ;;  %7572 = vmatpush3.bf16.msra.mxu1 %v8586_v13 }
0x1ff7   :  { %7567 = vmatprep.mubr.msk.bf16.mxu0 %vm8503_vm1, %v8502_v0  ;;  %7577 = vmatprep.subr.bf16.mxu0 %v8502_v0 }
0x1ff8   :  { %7573 = vmatprep.mubr.msk.bf16.mxu1 %vm8503_vm1, %v8502_v0  ;;  %7583 = vmatprep.subr.bf16.mxu1 %v8502_v0 }
0x1ffd   :  { %7568 = vmatmul.mubr.msk.bf16.vlgmr.msra.gmra.mxu0 %vm106_vm3, %v1989_v14 }
0x1ffe   :  { %7578 = vmatpush3.bf16.msra.mxu0 %v8580_v11  ;;  %7579 = vmatprep.mubr.msk.bf16.mxu0 %vm8503_vm1, %v8502_v0 }
0x1fff   :  { %7589 = vmatprep.subr.bf16.mxu0 %v8502_v0 }
0x20b5   :  { %v2027_v16 = vpop.f32.mrf.mxu0  ;;  %v2074_v17 = vpop.f32.mrf.mxu1 }
0x20b6   :  { %v2033_v18 = vadd.f32 %v2027_v16, %v1985_v15  ;;  %2081 = vrot.lane.b32.xlu0 %v2074_v17, %s8509_s11 }
0x20b7   :  { %v7557_v19 = vpop.f32.mrf.mxu0  ;;  %v7563_v20 = vpop.f32.mrf.mxu1 }
0x20b8   :  { %v6945_v22 = vmul.f32 -1.442695, %v2033_v18 }
0x20b9   :  { %v2030_v24 = vpop.f32.mrf.mxu0  ;;  %v2077_v25 = vpop.f32.mrf.mxu1 }
0x20ba   :  { %8211 = vpow2.f32 %v6945_v22 }
0x20bb   :  { %v7558_v26 = vpop.f32.mrf.mxu0  ;;  %v7564_v27 = vpop.f32.mrf.mxu1 }
0x20bd   :  { %v2125_v28 = vpop.f32.mrf.mxu0 }
0x20be   :  { %v2126_v34 = vadd.f32 %v2125_v28, %v8610_v48 }
0x20bf   :  { %v7569_v29 = vpop.f32.mrf.mxu0 }
0x20c1   :  { %v2128_v30 = vpop.f32.mrf.mxu0 }
0x20c3   :  { %v7570_v31 = vpop.f32.mrf.mxu0 }
0x20c4   :  { %v2313_v31 = vld [vmem:[#allocation2 + $0xa] sm:$0x3] }
0x20c7   :  { %v8212_v32 = vpop.eup %8211 }
0x20c8   :  { %v2037_v33 = vadd.f32 1.0, %v8212_v32 }
0x20ca   :  { %8213 = vrcp.f32 %v2037_v33 }
0x20d7   :  { %v8214_v35 = vpop.eup %8213 }
0x20d8   :  { %v2131_v36 = vmul.f32 %v8214_v35, %v2126_v34 }
0x20da   :  { %2133 = vrot.lane.b32.xlu1 %v2131_v36, %s8508_s1 }
0x2128   :  { %v2082_v41 = vpop.permute.xlu0 %2081 }
0x2129   :  { %v2084_v42 = vadd.f32 %v2082_v41, %v1985_v15 }
0x212b   :  { %v6947_v43 = vmul.f32 -1.442695, %v2084_v42 }
0x214c   :  { %v2134_v37 = vpop.permute.xlu1 %2133 }
0x214d   :  { %v2136_v38 = vadd.f32 %v2134_v37, %v1985_v15 }
0x214f   :  { %8215 = vtanh.f32 %v2136_v38 }
0x2150   :  { %8217 = vpow2.f32 %v6947_v43 }
0x215c   :  { %v8216_v39 = vpop.eup %8215 }
0x215d   :  { %v2138_v40 = vsub.f32 %v1984_v10, %v8216_v39  ;;  %v8218_v44 = vpop.eup %8217 }
0x215e   :  { %v2088_v45 = vadd.f32 1.0, %v8218_v44 }
0x215f   :  { %2140 = vrot.lane.b32.xlu1 %v2138_v40, %s8507_s8 }
0x2160   :  { %8219 = vrcp.f32 %v2088_v45 }
0x216d   :  { %v8220_v46 = vpop.eup %8219 }
0x21d1   :  { %v2141_v47 = vpop.permute.xlu1 %2140 }
0x21d2   :  { %v2143_v49 = vmul.f32 %v8220_v46, %v2141_v47 }
0x21d4   :  { %2145 = vrot.lane.b32.xlu0 %v2143_v49, %s8509_s11 }
0x2246   :  { %v2146_v50 = vpop.permute.xlu0 %2145 }
0x2247   :  { %v2148_v51 = vadd.f32 %v8216_v39, %v2146_v50 }
0x2249   :  { %v2150_v52 = vpack.c.bf16 %v2148_v51, %v2148_v51 }
0x224b   :  { %2152 = vrot.lane.b32.xlu1 %v2150_v52, %s8510_s12 }
0x22bd   :  { %v2153_v53 = vpop.permute.xlu1 %2152 }
0x22be   :  { %7574 = vmatmul.mubr.msk.bf16.vlgmr.msra.gmra.mxu1 %vm106_vm3, %v2153_v53  ;;  %7580 = vmatmul.mubr.msk.bf16.vlgmr.msra.gmra.mxu0 %vm106_vm3, %v2153_v53 }
0x22bf   :  { %7584 = vmatpush3.bf16.msra.mxu1 %v8598_v23  ;;  %7590 = vmatpush3.bf16.msra.mxu0 %v8586_v13 }
0x22c0   :  { %7585 = vmatprep.mubr.msk.bf16.mxu1 %vm8503_vm1, %v8502_v0  ;;  %7595 = vmatprep.subr.bf16.mxu1 %v8502_v0 }
0x22c1   :  { %7591 = vmatprep.mubr.msk.bf16.mxu0 %vm8503_vm1, %v8502_v0  ;;  %7601 = vmatprep.subr.bf16.mxu0 %v8502_v0 }
0x22c6   :  { %7586 = vmatmul.mubr.msk.bf16.vlgmr.msra.gmra.mxu1 %vm106_vm3, %v2153_v53 }
0x22c7   :  { %7596 = vmatpush3.bf16.msra.mxu1 %v8580_v11  ;;  %7597 = vmatprep.mubr.msk.bf16.mxu1 %vm8503_vm1, %v8502_v0 }
0x22c8   :  { %7607 = vmatprep.subr.bf16.mxu1 %v8502_v0 }
0x237e   :  { %v2191_v55 = vpop.f32.mrf.mxu1  ;;  %v2238_v56 = vpop.f32.mrf.mxu0 }
0x237f   :  { %v2197_v57 = vadd.f32 %v2191_v55, %v2149_v54  ;;  %2245 = vrot.lane.b32.xlu1 %v2238_v56, %s8509_s11 }
0x2380   :  { %v7575_v58 = vpop.f32.mrf.mxu1  ;;  %v7581_v59 = vpop.f32.mrf.mxu0 }
0x2381   :  { %v6950_v60 = vmul.f32 -1.442695, %v2197_v57 }
0x2382   :  { %v2194_v61 = vpop.f32.mrf.mxu1  ;;  %v2241_v62 = vpop.f32.mrf.mxu0 }
0x2383   :  { %8221 = vpow2.f32 %v6950_v60 }
0x2384   :  { %v7576_v63 = vpop.f32.mrf.mxu1  ;;  %v7582_v1 = vpop.f32.mrf.mxu0 }
0x2386   :  { %v2289_v2 = vpop.f32.mrf.mxu1 }
0x2387   :  { %v2290_v8 = vadd.f32 %v2289_v2, %v8610_v48 }
0x2388   :  { %v7587_v3 = vpop.f32.mrf.mxu1 }
0x238a   :  { %v2292_v4 = vpop.f32.mrf.mxu1 }
0x238c   :  { %v7588_v5 = vpop.f32.mrf.mxu1 }
0x238d   :  { %v2477_v5 = vld [vmem:[#allocation2 + $0xc] sm:$0x3] }
0x2390   :  { %v8222_v6 = vpop.eup %8221 }
0x2391   :  { %v2201_v7 = vadd.f32 1.0, %v8222_v6 }
0x2393   :  { %8223 = vrcp.f32 %v2201_v7 }
0x23a0   :  { %v8224_v9 = vpop.eup %8223 }
0x23a1   :  { %v2295_v10 = vmul.f32 %v8224_v9, %v2290_v8 }
0x23a3   :  { %2297 = vrot.lane.b32.xlu0 %v2295_v10, %s8508_s1 }
0x23f1   :  { %v2246_v17 = vpop.permute.xlu1 %2245 }
0x23f2   :  { %v2248_v18 = vadd.f32 %v2246_v17, %v2149_v54 }
0x23f4   :  { %v6952_v19 = vmul.f32 -1.442695, %v2248_v18 }
0x2415   :  { %v2298_v12 = vpop.permute.xlu0 %2297 }
0x2416   :  { %v2300_v14 = vadd.f32 %v2298_v12, %v2149_v54 }
0x2418   :  { %8225 = vtanh.f32 %v2300_v14 }
0x2419   :  { %8227 = vpow2.f32 %v6952_v19 }
0x2425   :  { %v8226_v15 = vpop.eup %8225 }
0x2426   :  { %v2302_v16 = vsub.f32 %v2148_v51, %v8226_v15  ;;  %v8228_v20 = vpop.eup %8227 }
0x2427   :  { %v2252_v22 = vadd.f32 1.0, %v8228_v20 }
0x2428   :  { %2304 = vrot.lane.b32.xlu0 %v2302_v16, %s8507_s8 }
0x2429   :  { %8229 = vrcp.f32 %v2252_v22 }
0x2436   :  { %v8230_v24 = vpop.eup %8229 }
0x249a   :  { %v2305_v25 = vpop.permute.xlu0 %2304 }
0x249b   :  { %v2307_v26 = vmul.f32 %v8230_v24, %v2305_v25 }
0x249d   :  { %2309 = vrot.lane.b32.xlu1 %v2307_v26, %s8509_s11 }
0x250f   :  { %v2310_v27 = vpop.permute.xlu1 %2309 }
0x2510   :  { %v2312_v28 = vadd.f32 %v8226_v15, %v2310_v27 }
0x2512   :  { %v2314_v29 = vpack.c.bf16 %v2312_v28, %v2312_v28 }
0x2514   :  { %2316 = vrot.lane.b32.xlu0 %v2314_v29, %s8510_s12 }
0x2586   :  { %v2317_v30 = vpop.permute.xlu0 %2316 }
0x2587   :  { %7592 = vmatmul.mubr.msk.bf16.vlgmr.msra.gmra.mxu0 %vm106_vm3, %v2317_v30  ;;  %7598 = vmatmul.mubr.msk.bf16.vlgmr.msra.gmra.mxu1 %vm106_vm3, %v2317_v30 }
0x2588   :  { %7602 = vmatpush3.bf16.msra.mxu0 %v8598_v23  ;;  %7608 = vmatpush3.bf16.msra.mxu1 %v8586_v13 }
0x2589   :  { %7603 = vmatprep.mubr.msk.bf16.mxu0 %vm8503_vm1, %v8502_v0  ;;  %7613 = vmatprep.subr.bf16.mxu0 %v8502_v0 }
0x258a   :  { %7609 = vmatprep.mubr.msk.bf16.mxu1 %vm8503_vm1, %v8502_v0  ;;  %7619 = vmatprep.subr.bf16.mxu1 %v8502_v0 }
0x258f   :  { %7604 = vmatmul.mubr.msk.bf16.vlgmr.msra.gmra.mxu0 %vm106_vm3, %v2317_v30 }
0x2590   :  { %7614 = vmatpush3.bf16.msra.mxu0 %v8580_v11  ;;  %7615 = vmatprep.mubr.msk.bf16.mxu0 %vm8503_vm1, %v8502_v0 }
0x2591   :  { %7625 = vmatprep.subr.bf16.mxu0 %v8502_v0 }
0x2647   :  { %v2355_v32 = vpop.f32.mrf.mxu0  ;;  %v2402_v33 = vpop.f32.mrf.mxu1 }
0x2648   :  { %v2361_v34 = vadd.f32 %v2355_v32, %v2313_v31  ;;  %2409 = vrot.lane.b32.xlu0 %v2402_v33, %s8509_s11 }
0x2649   :  { %v7593_v35 = vpop.f32.mrf.mxu0  ;;  %v7599_v36 = vpop.f32.mrf.mxu1 }
0x264a   :  { %v6955_v37 = vmul.f32 -1.442695, %v2361_v34 }
0x264b   :  { %v2358_v38 = vpop.f32.mrf.mxu0  ;;  %v2405_v39 = vpop.f32.mrf.mxu1 }
0x264c   :  { %8231 = vpow2.f32 %v6955_v37 }
0x264d   :  { %v7594_v40 = vpop.f32.mrf.mxu0  ;;  %v7600_v41 = vpop.f32.mrf.mxu1 }
0x264f   :  { %v2453_v42 = vpop.f32.mrf.mxu0 }
0x2650   :  { %v2454_v49 = vadd.f32 %v2453_v42, %v8610_v48 }
0x2651   :  { %v7605_v43 = vpop.f32.mrf.mxu0 }
0x2653   :  { %v2456_v44 = vpop.f32.mrf.mxu0 }
0x2655   :  { %v7606_v45 = vpop.f32.mrf.mxu0 }
0x2656   :  { %v2641_v45 = vld [vmem:[#allocation2 + $0xe] sm:$0x3] }
0x2659   :  { %v8232_v46 = vpop.eup %8231 }
0x265a   :  { %v2365_v47 = vadd.f32 1.0, %v8232_v46 }
0x265c   :  { %8233 = vrcp.f32 %v2365_v47 }
0x2669   :  { %v8234_v50 = vpop.eup %8233 }
0x266a   :  { %v2459_v51 = vmul.f32 %v8234_v50, %v2454_v49 }
0x266c   :  { %2461 = vrot.lane.b32.xlu1 %v2459_v51, %s8508_s1 }
0x26ba   :  { %v2410_v56 = vpop.permute.xlu0 %2409 }
0x26bb   :  { %v2412_v57 = vadd.f32 %v2410_v56, %v2313_v31 }
0x26bd   :  { %v6957_v58 = vmul.f32 -1.442695, %v2412_v57 }
0x26de   :  { %v2462_v52 = vpop.permute.xlu1 %2461 }
0x26df   :  { %v2464_v53 = vadd.f32 %v2462_v52, %v2313_v31 }
0x26e1   :  { %8235 = vtanh.f32 %v2464_v53 }
0x26e2   :  { %8237 = vpow2.f32 %v6957_v58 }
0x26ee   :  { %v8236_v54 = vpop.eup %8235 }
0x26ef   :  { %v2466_v55 = vsub.f32 %v2312_v28, %v8236_v54  ;;  %v8238_v59 = vpop.eup %8237 }
0x26f0   :  { %v2416_v60 = vadd.f32 1.0, %v8238_v59 }
0x26f1   :  { %2468 = vrot.lane.b32.xlu1 %v2466_v55, %s8507_s8 }
0x26f2   :  { %8239 = vrcp.f32 %v2416_v60 }
0x26ff   :  { %v8240_v61 = vpop.eup %8239 }
0x2763   :  { %v2469_v62 = vpop.permute.xlu1 %2468 }
0x2764   :  { %v2471_v63 = vmul.f32 %v8240_v61, %v2469_v62 }
0x2766   :  { %2473 = vrot.lane.b32.xlu0 %v2471_v63, %s8509_s11 }
0x27d8   :  { %v2474_v1 = vpop.permute.xlu0 %2473 }
0x27d9   :  { %v2476_v2 = vadd.f32 %v8236_v54, %v2474_v1 }
0x27db   :  { %v2478_v3 = vpack.c.bf16 %v2476_v2, %v2476_v2 }
0x27dd   :  { %2480 = vrot.lane.b32.xlu1 %v2478_v3, %s8510_s12 }
0x284f   :  { %v2481_v4 = vpop.permute.xlu1 %2480 }
0x2850   :  { %7610 = vmatmul.mubr.msk.bf16.vlgmr.msra.gmra.mxu1 %vm106_vm3, %v2481_v4  ;;  %7616 = vmatmul.mubr.msk.bf16.vlgmr.msra.gmra.mxu0 %vm106_vm3, %v2481_v4 }
0x2851   :  { %7620 = vmatpush3.bf16.msra.mxu1 %v8598_v23  ;;  %7626 = vmatpush3.bf16.msra.mxu0 %v8586_v13 }
0x2852   :  { %7621 = vmatprep.mubr.msk.bf16.mxu1 %vm8503_vm1, %v8502_v0  ;;  %7631 = vmatprep.subr.bf16.mxu1 %v8502_v0 }
0x2853   :  { %7627 = vmatprep.mubr.msk.bf16.mxu0 %vm8503_vm1, %v8502_v0  ;;  %7637 = vmatprep.subr.bf16.mxu0 %v8502_v0 }
0x2858   :  { %7622 = vmatmul.mubr.msk.bf16.vlgmr.msra.gmra.mxu1 %vm106_vm3, %v2481_v4 }
0x2859   :  { %7632 = vmatpush3.bf16.msra.mxu1 %v8580_v11  ;;  %7633 = vmatprep.mubr.msk.bf16.mxu1 %vm8503_vm1, %v8502_v0 }
0x285a   :  { %7643 = vmatprep.subr.bf16.mxu1 %v8502_v0 }
0x2910   :  { %v2519_v6 = vpop.f32.mrf.mxu1  ;;  %v2566_v7 = vpop.f32.mrf.mxu0 }
0x2911   :  { %v2525_v8 = vadd.f32 %v2519_v6, %v2477_v5  ;;  %2573 = vrot.lane.b32.xlu1 %v2566_v7, %s8509_s11 }
0x2912   :  { %v7611_v9 = vpop.f32.mrf.mxu1  ;;  %v7617_v10 = vpop.f32.mrf.mxu0 }
0x2913   :  { %v6960_v12 = vmul.f32 -1.442695, %v2525_v8 }
0x2914   :  { %v2522_v14 = vpop.f32.mrf.mxu1  ;;  %v2569_v15 = vpop.f32.mrf.mxu0 }
0x2915   :  { %8241 = vpow2.f32 %v6960_v12 }
0x2916   :  { %v7612_v16 = vpop.f32.mrf.mxu1  ;;  %v7618_v17 = vpop.f32.mrf.mxu0 }
0x2918   :  { %v2617_v18 = vpop.f32.mrf.mxu1 }
0x2919   :  { %v2618_v26 = vadd.f32 %v2617_v18, %v8610_v48 }
0x291a   :  { %v7623_v19 = vpop.f32.mrf.mxu1 }
0x291c   :  { %v2620_v20 = vpop.f32.mrf.mxu1 }
0x291e   :  { %v7624_v22 = vpop.f32.mrf.mxu1 }
0x291f   :  { %v2810_v22 = vld [vmem:[#allocation2] sm:$0x3] }
0x2922   :  { %v8242_v24 = vpop.eup %8241 }
0x2923   :  { %v2529_v25 = vadd.f32 1.0, %v8242_v24 }
0x2925   :  { %8243 = vrcp.f32 %v2529_v25 }
0x2932   :  { %v8244_v27 = vpop.eup %8243 }
0x2933   :  { %v2623_v28 = vmul.f32 %v8244_v27, %v2618_v26 }
0x2935   :  { %2625 = vrot.lane.b32.xlu0 %v2623_v28, %s8508_s1 }
0x2983   :  { %v2574_v33 = vpop.permute.xlu1 %2573 }
0x2984   :  { %v2576_v34 = vadd.f32 %v2574_v33, %v2477_v5 }
0x2986   :  { %v6962_v35 = vmul.f32 -1.442695, %v2576_v34 }
0x29a7   :  { %v2626_v29 = vpop.permute.xlu0 %2625 }
0x29a8   :  { %v2628_v30 = vadd.f32 %v2626_v29, %v2477_v5 }
0x29aa   :  { %8245 = vtanh.f32 %v2628_v30 }
0x29ab   :  { %8247 = vpow2.f32 %v6962_v35 }
0x29b7   :  { %v8246_v31 = vpop.eup %8245 }
0x29b8   :  { %v2630_v32 = vsub.f32 %v2476_v2, %v8246_v31  ;;  %v8248_v36 = vpop.eup %8247 }
0x29b9   :  { %v2580_v37 = vadd.f32 1.0, %v8248_v36 }
0x29ba   :  { %2632 = vrot.lane.b32.xlu0 %v2630_v32, %s8507_s8 }
0x29bb   :  { %8249 = vrcp.f32 %v2580_v37 }
0x29c8   :  { %v8250_v38 = vpop.eup %8249 }
0x2a2c   :  { %v2633_v39 = vpop.permute.xlu0 %2632 }
0x2a2d   :  { %v2635_v40 = vmul.f32 %v8250_v38, %v2633_v39 }
0x2a2f   :  { %2637 = vrot.lane.b32.xlu1 %v2635_v40, %s8509_s11 }
0x2aa1   :  { %v2638_v41 = vpop.permute.xlu1 %2637 }
0x2aa2   :  { %v2640_v42 = vadd.f32 %v8246_v31, %v2638_v41 }
0x2aa4   :  { %v2642_v43 = vpack.c.bf16 %v2640_v42, %v2640_v42 }
0x2aa6   :  { %2644 = vrot.lane.b32.xlu0 %v2642_v43, %s8510_s12 }
0x2b18   :  { %v2645_v44 = vpop.permute.xlu0 %2644 }
0x2b19   :  { %7628 = vmatmul.mubr.msk.bf16.vlgmr.msra.gmra.mxu0 %vm106_vm3, %v2645_v44  ;;  %7634 = vmatmul.mubr.msk.bf16.vlgmr.msra.gmra.mxu1 %vm106_vm3, %v2645_v44 }
0x2b1a   :  { %7638 = vmatpush3.bf16.msra.mxu0 %v8598_v23  ;;  %7644 = vmatpush3.bf16.msra.mxu1 %v8586_v13 }
0x2b1b   :  { %7639 = vmatprep.mubr.msk.bf16.mxu0 %vm8503_vm1, %v8502_v0  ;;  %7649 = vmatprep.subr.bf16.mxu0 %v8502_v0 }
0x2b1c   :  { %7645 = vmatprep.mubr.msk.bf16.mxu1 %vm8503_vm1, %v8502_v0  ;;  %7655 = vmatprep.subr.bf16.mxu1 %v8502_v0 }
0x2b21   :  { %7640 = vmatmul.mubr.msk.bf16.vlgmr.msra.gmra.mxu0 %vm106_vm3, %v2645_v44 }
0x2b22   :  { %7650 = vmatpush3.bf16.msra.mxu0 %v8580_v11  ;;  %7651 = vmatprep.mubr.msk.bf16.mxu0 %vm8503_vm1, %v8502_v0 }
0x2b23   :  { %7661 = vmatprep.subr.bf16.mxu0 %v8502_v0 }
0x2bd9   :  { %v2683_v46 = vpop.f32.mrf.mxu0  ;;  %v2730_v47 = vpop.f32.mrf.mxu1 }
0x2bda   :  { %v2689_v49 = vadd.f32 %v2683_v46, %v2641_v45  ;;  %2737 = vrot.lane.b32.xlu0 %v2730_v47, %s8509_s11 }
0x2bdb   :  { %v7629_v50 = vpop.f32.mrf.mxu0  ;;  %v7635_v51 = vpop.f32.mrf.mxu1 }
0x2bdc   :  { %v6965_v52 = vmul.f32 -1.442695, %v2689_v49 }
0x2bdd   :  { %v2686_v53 = vpop.f32.mrf.mxu0  ;;  %v2733_v54 = vpop.f32.mrf.mxu1 }
0x2bde   :  { %8251 = vpow2.f32 %v6965_v52 }
0x2bdf   :  { %v7630_v55 = vpop.f32.mrf.mxu0  ;;  %v7636_v56 = vpop.f32.mrf.mxu1 }
0x2be1   :  { %v2781_v57 = vpop.f32.mrf.mxu0 }
0x2be2   :  { %v2782_v63 = vadd.f32 %v2781_v57, %v8610_v48 }
0x2be3   :  { %v7641_v58 = vpop.f32.mrf.mxu0 }
0x2be5   :  { %v2784_v59 = vpop.f32.mrf.mxu0 }
0x2be7   :  { %v7642_v60 = vpop.f32.mrf.mxu0 }
0x2be8   :  { %v2974_v60 = vld [vmem:[#allocation2 + $0x2] sm:$0x3] }
0x2beb   :  { %v8252_v61 = vpop.eup %8251 }
0x2bec   :  { %v2693_v62 = vadd.f32 1.0, %v8252_v61 }
0x2bee   :  { %8253 = vrcp.f32 %v2693_v62 }
0x2bfb   :  { %v8254_v1 = vpop.eup %8253 }
0x2bfc   :  { %v2787_v2 = vmul.f32 %v8254_v1, %v2782_v63 }
0x2bfe   :  { %2789 = vrot.lane.b32.xlu1 %v2787_v2, %s8508_s1 }
0x2c4c   :  { %v2738_v7 = vpop.permute.xlu0 %2737 }
0x2c4d   :  { %v2740_v8 = vadd.f32 %v2738_v7, %v2641_v45 }
0x2c4f   :  { %v6967_v9 = vmul.f32 -1.442695, %v2740_v8 }
0x2c70   :  { %v2790_v3 = vpop.permute.xlu1 %2789 }
0x2c71   :  { %v2792_v4 = vadd.f32 %v2790_v3, %v2641_v45 }
0x2c73   :  { %8255 = vtanh.f32 %v2792_v4 }
0x2c74   :  { %8257 = vpow2.f32 %v6967_v9 }
0x2c80   :  { %v8256_v5 = vpop.eup %8255 }
0x2c81   :  { %v2794_v6 = vsub.f32 %v2640_v42, %v8256_v5  ;;  %v8258_v10 = vpop.eup %8257 }
0x2c82   :  { %v2744_v12 = vadd.f32 1.0, %v8258_v10 }
0x2c83   :  { %2796 = vrot.lane.b32.xlu1 %v2794_v6, %s8507_s8 }
0x2c84   :  { %8259 = vrcp.f32 %v2744_v12 }
0x2c91   :  { %v8260_v14 = vpop.eup %8259 }
0x2cf5   :  { %v2797_v15 = vpop.permute.xlu1 %2796 }
0x2cf6   :  { %v2799_v16 = vmul.f32 %v8260_v14, %v2797_v15 }
0x2cf8   :  { %2801 = vrot.lane.b32.xlu0 %v2799_v16, %s8509_s11 }
0x2d6a   :  { %v2802_v17 = vpop.permute.xlu0 %2801 }
0x2d6b   :  { %v8939_v18 = vadd.f32 %v8256_v5, %v2802_v17 }
0x2d6d   :  { %v2811_v19 = vpack.c.bf16 %v8939_v18, %v8939_v18 }
0x2d6f   :  { %2813 = vrot.lane.b32.xlu1 %v2811_v19, %s8510_s12 }
0x2de1   :  { %v2814_v20 = vpop.permute.xlu1 %2813 }
0x2de2   :  { %7646 = vmatmul.mubr.msk.bf16.vlgmr.msra.gmra.mxu1 %vm106_vm3, %v2814_v20  ;;  %7652 = vmatmul.mubr.msk.bf16.vlgmr.msra.gmra.mxu0 %vm106_vm3, %v2814_v20 }
0x2de3   :  { %7656 = vmatpush3.bf16.msra.mxu1 %v8598_v23  ;;  %7662 = vmatpush3.bf16.msra.mxu0 %v8586_v13 }
0x2de4   :  { %7657 = vmatprep.mubr.msk.bf16.mxu1 %vm8503_vm1, %v8502_v0  ;;  %7667 = vmatprep.subr.bf16.mxu1 %v8502_v0 }
0x2de5   :  { %7663 = vmatprep.mubr.msk.bf16.mxu0 %vm8503_vm1, %v8502_v0  ;;  %7673 = vmatprep.subr.bf16.mxu0 %v8502_v0 }
0x2dea   :  { %7658 = vmatmul.mubr.msk.bf16.vlgmr.msra.gmra.mxu1 %vm106_vm3, %v2814_v20 }
0x2deb   :  { %7668 = vmatpush3.bf16.msra.mxu1 %v8580_v11  ;;  %7669 = vmatprep.mubr.msk.bf16.mxu1 %vm8503_vm1, %v8502_v0 }
0x2dec   :  { %7679 = vmatprep.subr.bf16.mxu1 %v8502_v0 }
0x2ea2   :  { %v2852_v24 = vpop.f32.mrf.mxu1  ;;  %v2899_v25 = vpop.f32.mrf.mxu0 }
0x2ea3   :  { %v2858_v26 = vadd.f32 %v2852_v24, %v2810_v22  ;;  %2906 = vrot.lane.b32.xlu1 %v2899_v25, %s8509_s11 }
0x2ea4   :  { %v7647_v27 = vpop.f32.mrf.mxu1  ;;  %v7653_v28 = vpop.f32.mrf.mxu0 }
0x2ea5   :  { %v6970_v29 = vmul.f32 -1.442695, %v2858_v26 }
0x2ea6   :  { %v2855_v30 = vpop.f32.mrf.mxu1  ;;  %v2902_v31 = vpop.f32.mrf.mxu0 }
0x2ea7   :  { %8261 = vpow2.f32 %v6970_v29 }
0x2ea8   :  { %v7648_v32 = vpop.f32.mrf.mxu1  ;;  %v7654_v33 = vpop.f32.mrf.mxu0 }
0x2eaa   :  { %v2950_v34 = vpop.f32.mrf.mxu1 }
0x2eab   :  { %v2951_v40 = vadd.f32 %v2950_v34, %v8610_v48 }
0x2eac   :  { %v7659_v35 = vpop.f32.mrf.mxu1 }
0x2eae   :  { %v2953_v36 = vpop.f32.mrf.mxu1 }
0x2eb0   :  { %v7660_v37 = vpop.f32.mrf.mxu1 }
0x2eb4   :  { %v8262_v38 = vpop.eup %8261 }
0x2eb5   :  { %v2862_v39 = vadd.f32 1.0, %v8262_v38  ;;  %v3138_v38 = vld [vmem:[#allocation2 + $0x4] sm:$0x3] }
0x2eb7   :  { %8263 = vrcp.f32 %v2862_v39 }
0x2ec4   :  { %v8264_v41 = vpop.eup %8263 }
0x2ec5   :  { %v2956_v42 = vmul.f32 %v8264_v41, %v2951_v40 }
0x2ec7   :  { %2958 = vrot.lane.b32.xlu0 %v2956_v42, %s8508_s1 }
0x2f15   :  { %v2907_v47 = vpop.permute.xlu1 %2906 }
0x2f16   :  { %v2909_v49 = vadd.f32 %v2907_v47, %v2810_v22 }
0x2f18   :  { %v6972_v50 = vmul.f32 -1.442695, %v2909_v49 }
0x2f39   :  { %v2959_v43 = vpop.permute.xlu0 %2958 }
0x2f3a   :  { %v2961_v44 = vadd.f32 %v2959_v43, %v2810_v22 }
0x2f3c   :  { %8265 = vtanh.f32 %v2961_v44 }
0x2f3d   :  { %8267 = vpow2.f32 %v6972_v50 }
0x2f49   :  { %v8266_v45 = vpop.eup %8265 }
0x2f4a   :  { %v2963_v46 = vsub.f32 %v8939_v18, %v8266_v45  ;;  %v8268_v51 = vpop.eup %8267 }
0x2f4b   :  { %v2913_v52 = vadd.f32 1.0, %v8268_v51 }
0x2f4c   :  { %2965 = vrot.lane.b32.xlu0 %v2963_v46, %s8507_s8 }
0x2f4d   :  { %8269 = vrcp.f32 %v2913_v52 }
0x2f5a   :  { %v8270_v53 = vpop.eup %8269 }
0x2fbe   :  { %v2966_v54 = vpop.permute.xlu0 %2965 }
0x2fbf   :  { %v2968_v55 = vmul.f32 %v8270_v53, %v2966_v54 }
0x2fc1   :  { %2970 = vrot.lane.b32.xlu1 %v2968_v55, %s8509_s11 }
0x3033   :  { %v2971_v56 = vpop.permute.xlu1 %2970 }
0x3034   :  { %v2973_v57 = vadd.f32 %v8266_v45, %v2971_v56 }
0x3036   :  { %v2975_v58 = vpack.c.bf16 %v2973_v57, %v2973_v57 }
0x3038   :  { %2977 = vrot.lane.b32.xlu0 %v2975_v58, %s8510_s12 }
0x30aa   :  { %v2978_v59 = vpop.permute.xlu0 %2977 }
0x30ab   :  { %7664 = vmatmul.mubr.msk.bf16.vlgmr.msra.gmra.mxu0 %vm106_vm3, %v2978_v59  ;;  %7670 = vmatmul.mubr.msk.bf16.vlgmr.msra.gmra.mxu1 %vm106_vm3, %v2978_v59 }
0x30ac   :  { %7674 = vmatpush3.bf16.msra.mxu0 %v8598_v23  ;;  %7680 = vmatpush3.bf16.msra.mxu1 %v8586_v13 }
0x30ad   :  { %7675 = vmatprep.mubr.msk.bf16.mxu0 %vm8503_vm1, %v8502_v0  ;;  %7685 = vmatprep.subr.bf16.mxu0 %v8502_v0 }
0x30ae   :  { %7681 = vmatprep.mubr.msk.bf16.mxu1 %vm8503_vm1, %v8502_v0  ;;  %7691 = vmatprep.subr.bf16.mxu1 %v8502_v0 }
0x30b3   :  { %7676 = vmatmul.mubr.msk.bf16.vlgmr.msra.gmra.mxu0 %vm106_vm3, %v2978_v59 }
0x30b4   :  { %7686 = vmatpush3.bf16.msra.mxu0 %v8580_v11  ;;  %7687 = vmatprep.mubr.msk.bf16.mxu0 %vm8503_vm1, %v8502_v0 }
0x30b5   :  { %7697 = vmatprep.subr.bf16.mxu0 %v8502_v0 }
0x316b   :  { %v3016_v61 = vpop.f32.mrf.mxu0  ;;  %v3063_v62 = vpop.f32.mrf.mxu1 }
0x316c   :  { %v3022_v63 = vadd.f32 %v3016_v61, %v2974_v60  ;;  %3070 = vrot.lane.b32.xlu0 %v3063_v62, %s8509_s11 }
0x316d   :  { %v7665_v1 = vpop.f32.mrf.mxu0  ;;  %v7671_v2 = vpop.f32.mrf.mxu1 }
0x316e   :  { %v6975_v3 = vmul.f32 -1.442695, %v3022_v63 }
0x316f   :  { %v3019_v4 = vpop.f32.mrf.mxu0  ;;  %v3066_v5 = vpop.f32.mrf.mxu1 }
0x3170   :  { %8271 = vpow2.f32 %v6975_v3 }
0x3171   :  { %v7666_v6 = vpop.f32.mrf.mxu0  ;;  %v7672_v7 = vpop.f32.mrf.mxu1 }
0x3173   :  { %v3114_v8 = vpop.f32.mrf.mxu0 }
0x3174   :  { %v3115_v16 = vadd.f32 %v3114_v8, %v8610_v48 }
0x3175   :  { %v7677_v9 = vpop.f32.mrf.mxu0 }
0x3177   :  { %v3117_v10 = vpop.f32.mrf.mxu0 }
0x3179   :  { %v7678_v12 = vpop.f32.mrf.mxu0 }
0x317d   :  { %v8272_v14 = vpop.eup %8271 }
0x317e   :  { %v3026_v15 = vadd.f32 1.0, %v8272_v14  ;;  %v3302_v14 = vld [vmem:[#allocation2 + $0x6] sm:$0x3] }
0x3180   :  { %8273 = vrcp.f32 %v3026_v15 }
0x318d   :  { %v8274_v17 = vpop.eup %8273 }
0x318e   :  { %v3120_v19 = vmul.f32 %v8274_v17, %v3115_v16 }
0x3190   :  { %3122 = vrot.lane.b32.xlu1 %v3120_v19, %s8508_s1 }
0x31de   :  { %v3071_v26 = vpop.permute.xlu0 %3070 }
0x31df   :  { %v3073_v27 = vadd.f32 %v3071_v26, %v2974_v60 }
0x31e1   :  { %v6977_v28 = vmul.f32 -1.442695, %v3073_v27 }
0x3202   :  { %v3123_v20 = vpop.permute.xlu1 %3122 }
0x3203   :  { %v3125_v22 = vadd.f32 %v3123_v20, %v2974_v60 }
0x3205   :  { %8275 = vtanh.f32 %v3125_v22 }
0x3206   :  { %8277 = vpow2.f32 %v6977_v28 }
0x3212   :  { %v8276_v24 = vpop.eup %8275 }
0x3213   :  { %v3127_v25 = vsub.f32 %v2973_v57, %v8276_v24  ;;  %v8278_v29 = vpop.eup %8277 }
0x3214   :  { %v3077_v30 = vadd.f32 1.0, %v8278_v29 }
0x3215   :  { %3129 = vrot.lane.b32.xlu1 %v3127_v25, %s8507_s8 }
0x3216   :  { %8279 = vrcp.f32 %v3077_v30 }
0x3223   :  { %v8280_v31 = vpop.eup %8279 }
0x3287   :  { %v3130_v32 = vpop.permute.xlu1 %3129 }
0x3288   :  { %v3132_v33 = vmul.f32 %v8280_v31, %v3130_v32 }
0x328a   :  { %3134 = vrot.lane.b32.xlu0 %v3132_v33, %s8509_s11 }
0x32fc   :  { %v3135_v34 = vpop.permute.xlu0 %3134 }
0x32fd   :  { %v3137_v35 = vadd.f32 %v8276_v24, %v3135_v34 }
0x32ff   :  { %v3139_v36 = vpack.c.bf16 %v3137_v35, %v3137_v35 }
0x3301   :  { %3141 = vrot.lane.b32.xlu1 %v3139_v36, %s8510_s12 }
0x3373   :  { %v3142_v37 = vpop.permute.xlu1 %3141 }
0x3374   :  { %7682 = vmatmul.mubr.msk.bf16.vlgmr.msra.gmra.mxu1 %vm106_vm3, %v3142_v37  ;;  %7688 = vmatmul.mubr.msk.bf16.vlgmr.msra.gmra.mxu0 %vm106_vm3, %v3142_v37 }
0x3375   :  { %7692 = vmatpush3.bf16.msra.mxu1 %v8598_v23  ;;  %7698 = vmatpush3.bf16.msra.mxu0 %v8586_v13 }
0x3376   :  { %7693 = vmatprep.mubr.msk.bf16.mxu1 %vm8503_vm1, %v8502_v0  ;;  %7703 = vmatprep.subr.bf16.mxu1 %v8502_v0 }
0x3377   :  { %7699 = vmatprep.mubr.msk.bf16.mxu0 %vm8503_vm1, %v8502_v0  ;;  %7709 = vmatprep.subr.bf16.mxu0 %v8502_v0 }
0x337c   :  { %7694 = vmatmul.mubr.msk.bf16.vlgmr.msra.gmra.mxu1 %vm106_vm3, %v3142_v37 }
0x337d   :  { %7704 = vmatpush3.bf16.msra.mxu1 %v8580_v11  ;;  %7705 = vmatprep.mubr.msk.bf16.mxu1 %vm8503_vm1, %v8502_v0 }
0x337e   :  { %7715 = vmatprep.subr.bf16.mxu1 %v8502_v0 }
0x3434   :  { %v3180_v39 = vpop.f32.mrf.mxu1  ;;  %v3227_v40 = vpop.f32.mrf.mxu0 }
0x3435   :  { %v3186_v41 = vadd.f32 %v3180_v39, %v3138_v38  ;;  %3234 = vrot.lane.b32.xlu1 %v3227_v40, %s8509_s11 }
0x3436   :  { %v7683_v42 = vpop.f32.mrf.mxu1  ;;  %v7689_v43 = vpop.f32.mrf.mxu0 }
0x3437   :  { %v6980_v44 = vmul.f32 -1.442695, %v3186_v41 }
0x3438   :  { %v3183_v45 = vpop.f32.mrf.mxu1  ;;  %v3230_v46 = vpop.f32.mrf.mxu0 }
0x3439   :  { %8281 = vpow2.f32 %v6980_v44 }
0x343a   :  { %v7684_v47 = vpop.f32.mrf.mxu1  ;;  %v7690_v49 = vpop.f32.mrf.mxu0 }
0x343c   :  { %v3278_v50 = vpop.f32.mrf.mxu1 }
0x343d   :  { %v3279_v56 = vadd.f32 %v3278_v50, %v8610_v48 }
0x343e   :  { %v7695_v51 = vpop.f32.mrf.mxu1 }
0x3440   :  { %v3281_v52 = vpop.f32.mrf.mxu1 }
0x3442   :  { %v7696_v53 = vpop.f32.mrf.mxu1 }
0x3446   :  { %v8282_v54 = vpop.eup %8281 }
0x3447   :  { %v3190_v55 = vadd.f32 1.0, %v8282_v54  ;;  %v3466_v54 = vld [vmem:[#allocation2 + $0x8] sm:$0x3] }
0x3449   :  { %8283 = vrcp.f32 %v3190_v55 }
0x3456   :  { %v8284_v57 = vpop.eup %8283 }
0x3457   :  { %v3284_v58 = vmul.f32 %v8284_v57, %v3279_v56 }
0x3459   :  { %3286 = vrot.lane.b32.xlu0 %v3284_v58, %s8508_s1 }
0x34a7   :  { %v3235_v63 = vpop.permute.xlu1 %3234 }
0x34a8   :  { %v3237_v1 = vadd.f32 %v3235_v63, %v3138_v38 }
0x34aa   :  { %v6982_v2 = vmul.f32 -1.442695, %v3237_v1 }
0x34cb   :  { %v3287_v59 = vpop.permute.xlu0 %3286 }
0x34cc   :  { %v3289_v60 = vadd.f32 %v3287_v59, %v3138_v38 }
0x34ce   :  { %8285 = vtanh.f32 %v3289_v60 }
0x34cf   :  { %8287 = vpow2.f32 %v6982_v2 }
0x34db   :  { %v8286_v61 = vpop.eup %8285 }
0x34dc   :  { %v3291_v62 = vsub.f32 %v3137_v35, %v8286_v61  ;;  %v8288_v3 = vpop.eup %8287 }
0x34dd   :  { %v3241_v4 = vadd.f32 1.0, %v8288_v3 }
0x34de   :  { %3293 = vrot.lane.b32.xlu0 %v3291_v62, %s8507_s8 }
0x34df   :  { %8289 = vrcp.f32 %v3241_v4 }
0x34ec   :  { %v8290_v5 = vpop.eup %8289 }
0x3550   :  { %v3294_v6 = vpop.permute.xlu0 %3293 }
0x3551   :  { %v3296_v7 = vmul.f32 %v8290_v5, %v3294_v6 }
0x3553   :  { %3298 = vrot.lane.b32.xlu1 %v3296_v7, %s8509_s11 }
0x35c5   :  { %v3299_v8 = vpop.permute.xlu1 %3298 }
0x35c6   :  { %v3301_v9 = vadd.f32 %v8286_v61, %v3299_v8 }
0x35c8   :  { %v3303_v10 = vpack.c.bf16 %v3301_v9, %v3301_v9 }
0x35ca   :  { %3305 = vrot.lane.b32.xlu0 %v3303_v10, %s8510_s12 }
0x363c   :  { %v3306_v12 = vpop.permute.xlu0 %3305 }
0x363d   :  { %7700 = vmatmul.mubr.msk.bf16.vlgmr.msra.gmra.mxu0 %vm106_vm3, %v3306_v12  ;;  %7706 = vmatmul.mubr.msk.bf16.vlgmr.msra.gmra.mxu1 %vm106_vm3, %v3306_v12 }
0x363e   :  { %7710 = vmatpush3.bf16.msra.mxu0 %v8598_v23  ;;  %7716 = vmatpush3.bf16.msra.mxu1 %v8586_v13 }
0x363f   :  { %7711 = vmatprep.mubr.msk.bf16.mxu0 %vm8503_vm1, %v8502_v0  ;;  %7721 = vmatprep.subr.bf16.mxu0 %v8502_v0 }
0x3640   :  { %7717 = vmatprep.mubr.msk.bf16.mxu1 %vm8503_vm1, %v8502_v0  ;;  %7727 = vmatprep.subr.bf16.mxu1 %v8502_v0 }
0x3645   :  { %7712 = vmatmul.mubr.msk.bf16.vlgmr.msra.gmra.mxu0 %vm106_vm3, %v3306_v12 }
0x3646   :  { %7722 = vmatpush3.bf16.msra.mxu0 %v8580_v11  ;;  %7723 = vmatprep.mubr.msk.bf16.mxu0 %vm8503_vm1, %v8502_v0 }
0x3647   :  { %7733 = vmatprep.subr.bf16.mxu0 %v8502_v0 }
0x36fd   :  { %v3344_v15 = vpop.f32.mrf.mxu0  ;;  %v3391_v16 = vpop.f32.mrf.mxu1 }
0x36fe   :  { %v3350_v17 = vadd.f32 %v3344_v15, %v3302_v14  ;;  %3398 = vrot.lane.b32.xlu0 %v3391_v16, %s8509_s11 }
0x36ff   :  { %v7701_v19 = vpop.f32.mrf.mxu0  ;;  %v7707_v20 = vpop.f32.mrf.mxu1 }
0x3700   :  { %v6985_v22 = vmul.f32 -1.442695, %v3350_v17 }
0x3701   :  { %v3347_v24 = vpop.f32.mrf.mxu0  ;;  %v3394_v25 = vpop.f32.mrf.mxu1 }
0x3702   :  { %8291 = vpow2.f32 %v6985_v22 }
0x3703   :  { %v7702_v26 = vpop.f32.mrf.mxu0  ;;  %v7708_v27 = vpop.f32.mrf.mxu1 }
0x3705   :  { %v3442_v28 = vpop.f32.mrf.mxu0 }
0x3706   :  { %v3443_v34 = vadd.f32 %v3442_v28, %v8610_v48 }
0x3707   :  { %v7713_v29 = vpop.f32.mrf.mxu0 }
0x3709   :  { %v3445_v30 = vpop.f32.mrf.mxu0 }
0x370b   :  { %v7714_v31 = vpop.f32.mrf.mxu0 }
0x370f   :  { %v8292_v32 = vpop.eup %8291 }
0x3710   :  { %v3354_v33 = vadd.f32 1.0, %v8292_v32  ;;  %v3630_v32 = vld [vmem:[#allocation2 + $0xa] sm:$0x3] }
0x3712   :  { %8293 = vrcp.f32 %v3354_v33 }
0x371f   :  { %v8294_v35 = vpop.eup %8293 }
0x3720   :  { %v3448_v36 = vmul.f32 %v8294_v35, %v3443_v34 }
0x3722   :  { %3450 = vrot.lane.b32.xlu1 %v3448_v36, %s8508_s1 }
0x3770   :  { %v3399_v41 = vpop.permute.xlu0 %3398 }
0x3771   :  { %v3401_v42 = vadd.f32 %v3399_v41, %v3302_v14 }
0x3773   :  { %v6987_v43 = vmul.f32 -1.442695, %v3401_v42 }
0x3794   :  { %v3451_v37 = vpop.permute.xlu1 %3450 }
0x3795   :  { %v3453_v38 = vadd.f32 %v3451_v37, %v3302_v14 }
0x3797   :  { %8295 = vtanh.f32 %v3453_v38 }
0x3798   :  { %8297 = vpow2.f32 %v6987_v43 }
0x37a4   :  { %v8296_v39 = vpop.eup %8295 }
0x37a5   :  { %v3455_v40 = vsub.f32 %v3301_v9, %v8296_v39  ;;  %v8298_v44 = vpop.eup %8297 }
0x37a6   :  { %v3405_v45 = vadd.f32 1.0, %v8298_v44 }
0x37a7   :  { %3457 = vrot.lane.b32.xlu1 %v3455_v40, %s8507_s8 }
0x37a8   :  { %8299 = vrcp.f32 %v3405_v45 }
0x37b5   :  { %v8300_v46 = vpop.eup %8299 }
0x3819   :  { %v3458_v47 = vpop.permute.xlu1 %3457 }
0x381a   :  { %v3460_v49 = vmul.f32 %v8300_v46, %v3458_v47 }
0x381c   :  { %3462 = vrot.lane.b32.xlu0 %v3460_v49, %s8509_s11 }
0x388e   :  { %v3463_v50 = vpop.permute.xlu0 %3462 }
0x388f   :  { %v3465_v51 = vadd.f32 %v8296_v39, %v3463_v50 }
0x3891   :  { %v3467_v52 = vpack.c.bf16 %v3465_v51, %v3465_v51 }
0x3893   :  { %3469 = vrot.lane.b32.xlu1 %v3467_v52, %s8510_s12 }
0x3905   :  { %v3470_v53 = vpop.permute.xlu1 %3469 }
0x3906   :  { %7718 = vmatmul.mubr.msk.bf16.vlgmr.msra.gmra.mxu1 %vm106_vm3, %v3470_v53  ;;  %7724 = vmatmul.mubr.msk.bf16.vlgmr.msra.gmra.mxu0 %vm106_vm3, %v3470_v53 }
0x3907   :  { %7728 = vmatpush3.bf16.msra.mxu1 %v8598_v23  ;;  %7734 = vmatpush3.bf16.msra.mxu0 %v8586_v13 }
0x3908   :  { %7729 = vmatprep.mubr.msk.bf16.mxu1 %vm8503_vm1, %v8502_v0  ;;  %7739 = vmatprep.subr.bf16.mxu1 %v8502_v0 }
0x3909   :  { %7735 = vmatprep.mubr.msk.bf16.mxu0 %vm8503_vm1, %v8502_v0  ;;  %7745 = vmatprep.subr.bf16.mxu0 %v8502_v0 }
0x390e   :  { %7730 = vmatmul.mubr.msk.bf16.vlgmr.msra.gmra.mxu1 %vm106_vm3, %v3470_v53 }
0x390f   :  { %7740 = vmatpush3.bf16.msra.mxu1 %v8580_v11  ;;  %7741 = vmatprep.mubr.msk.bf16.mxu1 %vm8503_vm1, %v8502_v0 }
0x3910   :  { %7751 = vmatprep.subr.bf16.mxu1 %v8502_v0 }
0x39c6   :  { %v3508_v55 = vpop.f32.mrf.mxu1  ;;  %v3555_v56 = vpop.f32.mrf.mxu0 }
0x39c7   :  { %v3514_v57 = vadd.f32 %v3508_v55, %v3466_v54  ;;  %3562 = vrot.lane.b32.xlu1 %v3555_v56, %s8509_s11 }
0x39c8   :  { %v7719_v58 = vpop.f32.mrf.mxu1  ;;  %v7725_v59 = vpop.f32.mrf.mxu0 }
0x39c9   :  { %v6990_v60 = vmul.f32 -1.442695, %v3514_v57 }
0x39ca   :  { %v3511_v61 = vpop.f32.mrf.mxu1  ;;  %v3558_v62 = vpop.f32.mrf.mxu0 }
0x39cb   :  { %8301 = vpow2.f32 %v6990_v60 }
0x39cc   :  { %v7720_v63 = vpop.f32.mrf.mxu1  ;;  %v7726_v1 = vpop.f32.mrf.mxu0 }
0x39ce   :  { %v3606_v2 = vpop.f32.mrf.mxu1 }
0x39cf   :  { %v3607_v8 = vadd.f32 %v3606_v2, %v8610_v48 }
0x39d0   :  { %v7731_v3 = vpop.f32.mrf.mxu1 }
0x39d2   :  { %v3609_v4 = vpop.f32.mrf.mxu1 }
0x39d4   :  { %v7732_v5 = vpop.f32.mrf.mxu1 }
0x39d8   :  { %v8302_v6 = vpop.eup %8301 }
0x39d9   :  { %v3518_v7 = vadd.f32 1.0, %v8302_v6  ;;  %v3794_v6 = vld [vmem:[#allocation2 + $0xc] sm:$0x3] }
0x39db   :  { %8303 = vrcp.f32 %v3518_v7 }
0x39e8   :  { %v8304_v9 = vpop.eup %8303 }
0x39e9   :  { %v3612_v10 = vmul.f32 %v8304_v9, %v3607_v8 }
0x39eb   :  { %3614 = vrot.lane.b32.xlu0 %v3612_v10, %s8508_s1 }
0x3a39   :  { %v3563_v17 = vpop.permute.xlu1 %3562 }
0x3a3a   :  { %v3565_v19 = vadd.f32 %v3563_v17, %v3466_v54 }
0x3a3c   :  { %v6992_v20 = vmul.f32 -1.442695, %v3565_v19 }
0x3a5d   :  { %v3615_v12 = vpop.permute.xlu0 %3614 }
0x3a5e   :  { %v3617_v14 = vadd.f32 %v3615_v12, %v3466_v54 }
0x3a60   :  { %8305 = vtanh.f32 %v3617_v14 }
0x3a61   :  { %8307 = vpow2.f32 %v6992_v20 }
0x3a6d   :  { %v8306_v15 = vpop.eup %8305 }
0x3a6e   :  { %v3619_v16 = vsub.f32 %v3465_v51, %v8306_v15  ;;  %v8308_v22 = vpop.eup %8307 }
0x3a6f   :  { %v3569_v24 = vadd.f32 1.0, %v8308_v22 }
0x3a70   :  { %3621 = vrot.lane.b32.xlu0 %v3619_v16, %s8507_s8 }
0x3a71   :  { %8309 = vrcp.f32 %v3569_v24 }
0x3a7e   :  { %v8310_v25 = vpop.eup %8309 }
0x3ae2   :  { %v3622_v26 = vpop.permute.xlu0 %3621 }
0x3ae3   :  { %v3624_v27 = vmul.f32 %v8310_v25, %v3622_v26 }
0x3ae5   :  { %3626 = vrot.lane.b32.xlu1 %v3624_v27, %s8509_s11 }
0x3b57   :  { %v3627_v28 = vpop.permute.xlu1 %3626 }
0x3b58   :  { %v3629_v29 = vadd.f32 %v8306_v15, %v3627_v28 }
0x3b5a   :  { %v3631_v30 = vpack.c.bf16 %v3629_v29, %v3629_v29 }
0x3b5c   :  { %3633 = vrot.lane.b32.xlu0 %v3631_v30, %s8510_s12 }
0x3bce   :  { %v3634_v31 = vpop.permute.xlu0 %3633 }
0x3bcf   :  { %7736 = vmatmul.mubr.msk.bf16.vlgmr.msra.gmra.mxu0 %vm106_vm3, %v3634_v31  ;;  %7742 = vmatmul.mubr.msk.bf16.vlgmr.msra.gmra.mxu1 %vm106_vm3, %v3634_v31 }
0x3bd0   :  { %7746 = vmatpush3.bf16.msra.mxu0 %v8598_v23  ;;  %7752 = vmatpush3.bf16.msra.mxu1 %v8586_v13 }
0x3bd1   :  { %7747 = vmatprep.mubr.msk.bf16.mxu0 %vm8503_vm1, %v8502_v0  ;;  %7757 = vmatprep.subr.bf16.mxu0 %v8502_v0 }
0x3bd2   :  { %7753 = vmatprep.mubr.msk.bf16.mxu1 %vm8503_vm1, %v8502_v0  ;;  %7763 = vmatprep.subr.bf16.mxu1 %v8502_v0 }
0x3bd7   :  { %7748 = vmatmul.mubr.msk.bf16.vlgmr.msra.gmra.mxu0 %vm106_vm3, %v3634_v31 }
0x3bd8   :  { %7758 = vmatpush3.bf16.msra.mxu0 %v8580_v11  ;;  %7759 = vmatprep.mubr.msk.bf16.mxu0 %vm8503_vm1, %v8502_v0 }
0x3bd9   :  { %7769 = vmatprep.subr.bf16.mxu0 %v8502_v0 }
0x3c8f   :  { %v3672_v33 = vpop.f32.mrf.mxu0  ;;  %v3719_v34 = vpop.f32.mrf.mxu1 }
0x3c90   :  { %v3678_v35 = vadd.f32 %v3672_v33, %v3630_v32  ;;  %3726 = vrot.lane.b32.xlu0 %v3719_v34, %s8509_s11 }
0x3c91   :  { %v7737_v36 = vpop.f32.mrf.mxu0  ;;  %v7743_v37 = vpop.f32.mrf.mxu1 }
0x3c92   :  { %v6995_v38 = vmul.f32 -1.442695, %v3678_v35 }
0x3c93   :  { %v3675_v39 = vpop.f32.mrf.mxu0  ;;  %v3722_v40 = vpop.f32.mrf.mxu1 }
0x3c94   :  { %8311 = vpow2.f32 %v6995_v38 }
0x3c95   :  { %v7738_v41 = vpop.f32.mrf.mxu0  ;;  %v7744_v42 = vpop.f32.mrf.mxu1 }
0x3c97   :  { %v3770_v43 = vpop.f32.mrf.mxu0 }
0x3c98   :  { %v3771_v50 = vadd.f32 %v3770_v43, %v8610_v48 }
0x3c99   :  { %v7749_v44 = vpop.f32.mrf.mxu0 }
0x3c9b   :  { %v3773_v45 = vpop.f32.mrf.mxu0 }
0x3c9d   :  { %v7750_v46 = vpop.f32.mrf.mxu0 }
0x3ca1   :  { %v8312_v47 = vpop.eup %8311 }
0x3ca2   :  { %v3682_v49 = vadd.f32 1.0, %v8312_v47  ;;  %v3958_v47 = vld [vmem:[#allocation2 + $0xe] sm:$0x3] }
0x3ca4   :  { %8313 = vrcp.f32 %v3682_v49 }
0x3cb1   :  { %v8314_v51 = vpop.eup %8313 }
0x3cb2   :  { %v3776_v52 = vmul.f32 %v8314_v51, %v3771_v50 }
0x3cb4   :  { %3778 = vrot.lane.b32.xlu1 %v3776_v52, %s8508_s1 }
0x3d02   :  { %v3727_v57 = vpop.permute.xlu0 %3726 }
0x3d03   :  { %v3729_v58 = vadd.f32 %v3727_v57, %v3630_v32 }
0x3d05   :  { %v6997_v59 = vmul.f32 -1.442695, %v3729_v58 }
0x3d26   :  { %v3779_v53 = vpop.permute.xlu1 %3778 }
0x3d27   :  { %v3781_v54 = vadd.f32 %v3779_v53, %v3630_v32 }
0x3d29   :  { %8315 = vtanh.f32 %v3781_v54 }
0x3d2a   :  { %8317 = vpow2.f32 %v6997_v59 }
0x3d36   :  { %v8316_v55 = vpop.eup %8315 }
0x3d37   :  { %v3783_v56 = vsub.f32 %v3629_v29, %v8316_v55  ;;  %v8318_v60 = vpop.eup %8317 }
0x3d38   :  { %v3733_v61 = vadd.f32 1.0, %v8318_v60 }
0x3d39   :  { %3785 = vrot.lane.b32.xlu1 %v3783_v56, %s8507_s8 }
0x3d3a   :  { %8319 = vrcp.f32 %v3733_v61 }
0x3d47   :  { %v8320_v62 = vpop.eup %8319 }
0x3dab   :  { %v3786_v63 = vpop.permute.xlu1 %3785 }
0x3dac   :  { %v3788_v1 = vmul.f32 %v8320_v62, %v3786_v63 }
0x3dae   :  { %3790 = vrot.lane.b32.xlu0 %v3788_v1, %s8509_s11 }
0x3e20   :  { %v3791_v2 = vpop.permute.xlu0 %3790 }
0x3e21   :  { %v3793_v3 = vadd.f32 %v8316_v55, %v3791_v2 }
0x3e23   :  { %v3795_v4 = vpack.c.bf16 %v3793_v3, %v3793_v3 }
0x3e25   :  { %3797 = vrot.lane.b32.xlu1 %v3795_v4, %s8510_s12 }
0x3e97   :  { %v3798_v5 = vpop.permute.xlu1 %3797 }
0x3e98   :  { %7754 = vmatmul.mubr.msk.bf16.vlgmr.msra.gmra.mxu1 %vm106_vm3, %v3798_v5  ;;  %7760 = vmatmul.mubr.msk.bf16.vlgmr.msra.gmra.mxu0 %vm106_vm3, %v3798_v5 }
0x3e99   :  { %7764 = vmatpush3.bf16.msra.mxu1 %v8598_v23  ;;  %7770 = vmatpush3.bf16.msra.mxu0 %v8586_v13 }
0x3e9a   :  { %7765 = vmatprep.mubr.msk.bf16.mxu1 %vm8503_vm1, %v8502_v0  ;;  %7775 = vmatprep.subr.bf16.mxu1 %v8502_v0 }
0x3e9b   :  { %7771 = vmatprep.mubr.msk.bf16.mxu0 %vm8503_vm1, %v8502_v0  ;;  %7781 = vmatprep.subr.bf16.mxu0 %v8502_v0 }
0x3ea0   :  { %7766 = vmatmul.mubr.msk.bf16.vlgmr.msra.gmra.mxu1 %vm106_vm3, %v3798_v5 }
0x3ea1   :  { %7776 = vmatpush3.bf16.msra.mxu1 %v8580_v11  ;;  %7777 = vmatprep.mubr.msk.bf16.mxu1 %vm8503_vm1, %v8502_v0 }
0x3ea2   :  { %7787 = vmatprep.subr.bf16.mxu1 %v8502_v0 }
0x3f58   :  { %v3836_v7 = vpop.f32.mrf.mxu1  ;;  %v3883_v8 = vpop.f32.mrf.mxu0 }
0x3f59   :  { %v3842_v9 = vadd.f32 %v3836_v7, %v3794_v6  ;;  %3890 = vrot.lane.b32.xlu1 %v3883_v8, %s8509_s11 }
0x3f5a   :  { %v7755_v10 = vpop.f32.mrf.mxu1  ;;  %v7761_v12 = vpop.f32.mrf.mxu0 }
0x3f5b   :  { %v7000_v14 = vmul.f32 -1.442695, %v3842_v9 }
0x3f5c   :  { %v3839_v15 = vpop.f32.mrf.mxu1  ;;  %v3886_v16 = vpop.f32.mrf.mxu0 }
0x3f5d   :  { %8321 = vpow2.f32 %v7000_v14 }
0x3f5e   :  { %v7756_v17 = vpop.f32.mrf.mxu1  ;;  %v7762_v19 = vpop.f32.mrf.mxu0 }
0x3f60   :  { %v3934_v20 = vpop.f32.mrf.mxu1 }
0x3f61   :  { %v3935_v28 = vadd.f32 %v3934_v20, %v8610_v48 }
0x3f62   :  { %v7767_v22 = vpop.f32.mrf.mxu1 }
0x3f64   :  { %v3937_v24 = vpop.f32.mrf.mxu1 }
0x3f66   :  { %v7768_v25 = vpop.f32.mrf.mxu1 }
0x3f6a   :  { %v8322_v26 = vpop.eup %8321 }
0x3f6b   :  { %v3846_v27 = vadd.f32 1.0, %v8322_v26  ;;  %v4127_v26 = vld [vmem:[#allocation2] sm:$0x3] }
0x3f6d   :  { %8323 = vrcp.f32 %v3846_v27 }
0x3f7a   :  { %v8324_v29 = vpop.eup %8323 }
0x3f7b   :  { %v3940_v30 = vmul.f32 %v8324_v29, %v3935_v28 }
0x3f7d   :  { %3942 = vrot.lane.b32.xlu0 %v3940_v30, %s8508_s1 }
0x3fcb   :  { %v3891_v35 = vpop.permute.xlu1 %3890 }
0x3fcc   :  { %v3893_v36 = vadd.f32 %v3891_v35, %v3794_v6 }
0x3fce   :  { %v7002_v37 = vmul.f32 -1.442695, %v3893_v36 }
0x3fef   :  { %v3943_v31 = vpop.permute.xlu0 %3942 }
0x3ff0   :  { %v3945_v32 = vadd.f32 %v3943_v31, %v3794_v6 }
0x3ff2   :  { %8325 = vtanh.f32 %v3945_v32 }
0x3ff3   :  { %8327 = vpow2.f32 %v7002_v37 }
0x3fff   :  { %v8326_v33 = vpop.eup %8325 }
0x4000   :  { %v3947_v34 = vsub.f32 %v3793_v3, %v8326_v33  ;;  %v8328_v38 = vpop.eup %8327 }
0x4001   :  { %v3897_v39 = vadd.f32 1.0, %v8328_v38 }
0x4002   :  { %3949 = vrot.lane.b32.xlu0 %v3947_v34, %s8507_s8 }
0x4003   :  { %8329 = vrcp.f32 %v3897_v39 }
0x4010   :  { %v8330_v40 = vpop.eup %8329 }
0x4074   :  { %v3950_v41 = vpop.permute.xlu0 %3949 }
0x4075   :  { %v3952_v42 = vmul.f32 %v8330_v40, %v3950_v41 }
0x4077   :  { %3954 = vrot.lane.b32.xlu1 %v3952_v42, %s8509_s11 }
0x40e9   :  { %v3955_v43 = vpop.permute.xlu1 %3954 }
0x40ea   :  { %v3957_v44 = vadd.f32 %v8326_v33, %v3955_v43 }
0x40ec   :  { %v3959_v45 = vpack.c.bf16 %v3957_v44, %v3957_v44 }
0x40ee   :  { %3961 = vrot.lane.b32.xlu0 %v3959_v45, %s8510_s12 }
0x4160   :  { %v3962_v46 = vpop.permute.xlu0 %3961 }
0x4161   :  { %7772 = vmatmul.mubr.msk.bf16.vlgmr.msra.gmra.mxu0 %vm106_vm3, %v3962_v46  ;;  %7778 = vmatmul.mubr.msk.bf16.vlgmr.msra.gmra.mxu1 %vm106_vm3, %v3962_v46 }
0x4162   :  { %7782 = vmatpush3.bf16.msra.mxu0 %v8598_v23  ;;  %7788 = vmatpush3.bf16.msra.mxu1 %v8586_v13 }
0x4163   :  { %7783 = vmatprep.mubr.msk.bf16.mxu0 %vm8503_vm1, %v8502_v0  ;;  %7793 = vmatprep.subr.bf16.mxu0 %v8502_v0 }
0x4164   :  { %7789 = vmatprep.mubr.msk.bf16.mxu1 %vm8503_vm1, %v8502_v0  ;;  %7799 = vmatprep.subr.bf16.mxu1 %v8502_v0 }
0x4169   :  { %7784 = vmatmul.mubr.msk.bf16.vlgmr.msra.gmra.mxu0 %vm106_vm3, %v3962_v46 }
0x416a   :  { %7794 = vmatpush3.bf16.msra.mxu0 %v8580_v11  ;;  %7795 = vmatprep.mubr.msk.bf16.mxu0 %vm8503_vm1, %v8502_v0 }
0x416b   :  { %7805 = vmatprep.subr.bf16.mxu0 %v8502_v0 }
0x4221   :  { %v4000_v49 = vpop.f32.mrf.mxu0  ;;  %v4047_v50 = vpop.f32.mrf.mxu1 }
0x4222   :  { %v4006_v51 = vadd.f32 %v4000_v49, %v3958_v47  ;;  %4054 = vrot.lane.b32.xlu0 %v4047_v50, %s8509_s11 }
0x4223   :  { %v7773_v52 = vpop.f32.mrf.mxu0  ;;  %v7779_v53 = vpop.f32.mrf.mxu1 }
0x4224   :  { %v7005_v54 = vmul.f32 -1.442695, %v4006_v51 }
0x4225   :  { %v4003_v55 = vpop.f32.mrf.mxu0  ;;  %v4050_v56 = vpop.f32.mrf.mxu1 }
0x4226   :  { %8331 = vpow2.f32 %v7005_v54 }
0x4227   :  { %v7774_v57 = vpop.f32.mrf.mxu0  ;;  %v7780_v58 = vpop.f32.mrf.mxu1 }
0x4229   :  { %v4098_v59 = vpop.f32.mrf.mxu0 }
0x422a   :  { %v4099_v2 = vadd.f32 %v4098_v59, %v8610_v48 }
0x422b   :  { %v7785_v60 = vpop.f32.mrf.mxu0 }
0x422d   :  { %v4101_v61 = vpop.f32.mrf.mxu0 }
0x422f   :  { %v7786_v62 = vpop.f32.mrf.mxu0 }
0x4233   :  { %v8332_v63 = vpop.eup %8331 }
0x4234   :  { %v4010_v1 = vadd.f32 1.0, %v8332_v63  ;;  %v4291_v63 = vld [vmem:[#allocation2 + $0x2] sm:$0x3] }
0x4236   :  { %8333 = vrcp.f32 %v4010_v1 }
0x4243   :  { %v8334_v3 = vpop.eup %8333 }
0x4244   :  { %v4104_v4 = vmul.f32 %v8334_v3, %v4099_v2 }
0x4246   :  { %4106 = vrot.lane.b32.xlu1 %v4104_v4, %s8508_s1 }
0x4294   :  { %v4055_v9 = vpop.permute.xlu0 %4054 }
0x4295   :  { %v4057_v10 = vadd.f32 %v4055_v9, %v3958_v47 }
0x4297   :  { %v7007_v12 = vmul.f32 -1.442695, %v4057_v10 }
0x42b8   :  { %v4107_v5 = vpop.permute.xlu1 %4106 }
0x42b9   :  { %v4109_v6 = vadd.f32 %v4107_v5, %v3958_v47 }
0x42bb   :  { %8335 = vtanh.f32 %v4109_v6 }
0x42bc   :  { %8337 = vpow2.f32 %v7007_v12 }
0x42c8   :  { %v8336_v7 = vpop.eup %8335 }
0x42c9   :  { %v4111_v8 = vsub.f32 %v3957_v44, %v8336_v7  ;;  %v8338_v14 = vpop.eup %8337 }
0x42ca   :  { %v4061_v15 = vadd.f32 1.0, %v8338_v14 }
0x42cb   :  { %4113 = vrot.lane.b32.xlu1 %v4111_v8, %s8507_s8 }
0x42cc   :  { %8339 = vrcp.f32 %v4061_v15 }
0x42d9   :  { %v8340_v16 = vpop.eup %8339 }
0x433d   :  { %v4114_v17 = vpop.permute.xlu1 %4113 }
0x433e   :  { %v4116_v19 = vmul.f32 %v8340_v16, %v4114_v17 }
0x4340   :  { %4118 = vrot.lane.b32.xlu0 %v4116_v19, %s8509_s11 }
0x43b2   :  { %v4119_v20 = vpop.permute.xlu0 %4118 }
0x43b3   :  { %v9112_v22 = vadd.f32 %v8336_v7, %v4119_v20 }
0x43b5   :  { %v4128_v24 = vpack.c.bf16 %v9112_v22, %v9112_v22 }
0x43b7   :  { %4130 = vrot.lane.b32.xlu1 %v4128_v24, %s8510_s12 }
0x4429   :  { %v4131_v25 = vpop.permute.xlu1 %4130 }
0x442a   :  { %7790 = vmatmul.mubr.msk.bf16.vlgmr.msra.gmra.mxu1 %vm106_vm3, %v4131_v25  ;;  %7796 = vmatmul.mubr.msk.bf16.vlgmr.msra.gmra.mxu0 %vm106_vm3, %v4131_v25 }
0x442b   :  { %7800 = vmatpush3.bf16.msra.mxu1 %v8598_v23  ;;  %7806 = vmatpush3.bf16.msra.mxu0 %v8586_v13 }
0x442c   :  { %7801 = vmatprep.mubr.msk.bf16.mxu1 %vm8503_vm1, %v8502_v0  ;;  %7811 = vmatprep.subr.bf16.mxu1 %v8502_v0 }
0x442d   :  { %7807 = vmatprep.mubr.msk.bf16.mxu0 %vm8503_vm1, %v8502_v0  ;;  %7817 = vmatprep.subr.bf16.mxu0 %v8502_v0 }
0x4432   :  { %7802 = vmatmul.mubr.msk.bf16.vlgmr.msra.gmra.mxu1 %vm106_vm3, %v4131_v25 }
0x4433   :  { %7812 = vmatpush3.bf16.msra.mxu1 %v8580_v11  ;;  %7813 = vmatprep.mubr.msk.bf16.mxu1 %vm8503_vm1, %v8502_v0 }
0x4434   :  { %7823 = vmatprep.subr.bf16.mxu1 %v8502_v0 }
0x44ea   :  { %v4169_v27 = vpop.f32.mrf.mxu1  ;;  %v4216_v28 = vpop.f32.mrf.mxu0 }
0x44eb   :  { %v4175_v29 = vadd.f32 %v4169_v27, %v4127_v26  ;;  %4223 = vrot.lane.b32.xlu1 %v4216_v28, %s8509_s11 }
0x44ec   :  { %v7791_v30 = vpop.f32.mrf.mxu1  ;;  %v7797_v31 = vpop.f32.mrf.mxu0 }
0x44ed   :  { %v7010_v32 = vmul.f32 -1.442695, %v4175_v29 }
0x44ee   :  { %v4172_v33 = vpop.f32.mrf.mxu1  ;;  %v4219_v34 = vpop.f32.mrf.mxu0 }
0x44ef   :  { %8341 = vpow2.f32 %v7010_v32 }
0x44f0   :  { %v7792_v35 = vpop.f32.mrf.mxu1  ;;  %v7798_v36 = vpop.f32.mrf.mxu0 }
0x44f2   :  { %v4267_v37 = vpop.f32.mrf.mxu1 }
0x44f3   :  { %v4268_v43 = vadd.f32 %v4267_v37, %v8610_v48 }
0x44f4   :  { %v7803_v38 = vpop.f32.mrf.mxu1 }
0x44f6   :  { %v4270_v39 = vpop.f32.mrf.mxu1 }
0x44f8   :  { %v7804_v40 = vpop.f32.mrf.mxu1 }
0x44fc   :  { %v8342_v41 = vpop.eup %8341 }
0x44fd   :  { %v4179_v42 = vadd.f32 1.0, %v8342_v41 }
0x44ff   :  { %8343 = vrcp.f32 %v4179_v42  ;;  %v4455_v42 = vld [vmem:[#allocation2 + $0x4] sm:$0x3] }
0x450c   :  { %v8344_v44 = vpop.eup %8343 }
0x450d   :  { %v4273_v45 = vmul.f32 %v8344_v44, %v4268_v43 }
0x450f   :  { %4275 = vrot.lane.b32.xlu0 %v4273_v45, %s8508_s1 }
0x455d   :  { %v4224_v51 = vpop.permute.xlu1 %4223 }
0x455e   :  { %v4226_v52 = vadd.f32 %v4224_v51, %v4127_v26 }
0x4560   :  { %v7012_v53 = vmul.f32 -1.442695, %v4226_v52 }
0x4581   :  { %v4276_v46 = vpop.permute.xlu0 %4275 }
0x4582   :  { %v4278_v47 = vadd.f32 %v4276_v46, %v4127_v26 }
0x4584   :  { %8345 = vtanh.f32 %v4278_v47 }
0x4585   :  { %8347 = vpow2.f32 %v7012_v53 }
0x4591   :  { %v8346_v49 = vpop.eup %8345 }
0x4592   :  { %v4280_v50 = vsub.f32 %v9112_v22, %v8346_v49  ;;  %v8348_v54 = vpop.eup %8347 }
0x4593   :  { %v4230_v55 = vadd.f32 1.0, %v8348_v54 }
0x4594   :  { %4282 = vrot.lane.b32.xlu0 %v4280_v50, %s8507_s8 }
0x4595   :  { %8349 = vrcp.f32 %v4230_v55 }
0x45a2   :  { %v8350_v56 = vpop.eup %8349 }
0x4606   :  { %v4283_v57 = vpop.permute.xlu0 %4282 }
0x4607   :  { %v4285_v58 = vmul.f32 %v8350_v56, %v4283_v57 }
0x4609   :  { %4287 = vrot.lane.b32.xlu1 %v4285_v58, %s8509_s11 }
0x467b   :  { %v4288_v59 = vpop.permute.xlu1 %4287 }
0x467c   :  { %v4290_v60 = vadd.f32 %v8346_v49, %v4288_v59 }
0x467e   :  { %v4292_v61 = vpack.c.bf16 %v4290_v60, %v4290_v60 }
0x4680   :  { %4294 = vrot.lane.b32.xlu0 %v4292_v61, %s8510_s12 }
0x46f2   :  { %v4295_v62 = vpop.permute.xlu0 %4294 }
0x46f3   :  { %7808 = vmatmul.mubr.msk.bf16.vlgmr.msra.gmra.mxu0 %vm106_vm3, %v4295_v62  ;;  %7814 = vmatmul.mubr.msk.bf16.vlgmr.msra.gmra.mxu1 %vm106_vm3, %v4295_v62 }
0x46f4   :  { %7818 = vmatpush3.bf16.msra.mxu0 %v8598_v23  ;;  %7824 = vmatpush3.bf16.msra.mxu1 %v8586_v13 }
0x46f5   :  { %7819 = vmatprep.mubr.msk.bf16.mxu0 %vm8503_vm1, %v8502_v0  ;;  %7829 = vmatprep.subr.bf16.mxu0 %v8502_v0 }
0x46f6   :  { %7825 = vmatprep.mubr.msk.bf16.mxu1 %vm8503_vm1, %v8502_v0  ;;  %7835 = vmatprep.subr.bf16.mxu1 %v8502_v0 }
0x46fb   :  { %7820 = vmatmul.mubr.msk.bf16.vlgmr.msra.gmra.mxu0 %vm106_vm3, %v4295_v62 }
0x46fc   :  { %7830 = vmatpush3.bf16.msra.mxu0 %v8580_v11  ;;  %7831 = vmatprep.mubr.msk.bf16.mxu0 %vm8503_vm1, %v8502_v0 }
0x46fd   :  { %7841 = vmatprep.subr.bf16.mxu0 %v8502_v0 }
0x47b3   :  { %v4333_v1 = vpop.f32.mrf.mxu0  ;;  %v4380_v2 = vpop.f32.mrf.mxu1 }
0x47b4   :  { %v4339_v3 = vadd.f32 %v4333_v1, %v4291_v63  ;;  %4387 = vrot.lane.b32.xlu0 %v4380_v2, %s8509_s11 }
0x47b5   :  { %v7809_v4 = vpop.f32.mrf.mxu0  ;;  %v7815_v5 = vpop.f32.mrf.mxu1 }
0x47b6   :  { %v7015_v6 = vmul.f32 -1.442695, %v4339_v3 }
0x47b7   :  { %v4336_v7 = vpop.f32.mrf.mxu0  ;;  %v4383_v8 = vpop.f32.mrf.mxu1 }
0x47b8   :  { %8351 = vpow2.f32 %v7015_v6 }
0x47b9   :  { %v7810_v9 = vpop.f32.mrf.mxu0  ;;  %v7816_v10 = vpop.f32.mrf.mxu1 }
0x47bb   :  { %v4431_v12 = vpop.f32.mrf.mxu0 }
0x47bc   :  { %v4432_v20 = vadd.f32 %v4431_v12, %v8610_v48 }
0x47bd   :  { %v7821_v14 = vpop.f32.mrf.mxu0 }
0x47bf   :  { %v4434_v15 = vpop.f32.mrf.mxu0 }
0x47c1   :  { %v7822_v16 = vpop.f32.mrf.mxu0 }
0x47c5   :  { %v8352_v17 = vpop.eup %8351 }
0x47c6   :  { %v4343_v19 = vadd.f32 1.0, %v8352_v17 }
0x47c8   :  { %8353 = vrcp.f32 %v4343_v19  ;;  %v4619_v19 = vld [vmem:[#allocation2 + $0x6] sm:$0x3] }
0x47d5   :  { %v8354_v24 = vpop.eup %8353 }
0x47d6   :  { %v4437_v25 = vmul.f32 %v8354_v24, %v4432_v20 }
0x47d8   :  { %4439 = vrot.lane.b32.xlu1 %v4437_v25, %s8508_s1 }
0x4826   :  { %v4388_v30 = vpop.permute.xlu0 %4387 }
0x4827   :  { %v4390_v31 = vadd.f32 %v4388_v30, %v4291_v63 }
0x4829   :  { %v7017_v32 = vmul.f32 -1.442695, %v4390_v31 }
0x484a   :  { %v4440_v26 = vpop.permute.xlu1 %4439 }
0x484b   :  { %v4442_v27 = vadd.f32 %v4440_v26, %v4291_v63 }
0x484d   :  { %8355 = vtanh.f32 %v4442_v27 }
0x484e   :  { %8357 = vpow2.f32 %v7017_v32 }
0x485a   :  { %v8356_v28 = vpop.eup %8355 }
0x485b   :  { %v4444_v29 = vsub.f32 %v4290_v60, %v8356_v28  ;;  %v8358_v33 = vpop.eup %8357 }
0x485c   :  { %v4394_v34 = vadd.f32 1.0, %v8358_v33 }
0x485d   :  { %4446 = vrot.lane.b32.xlu1 %v4444_v29, %s8507_s8 }
0x485e   :  { %8359 = vrcp.f32 %v4394_v34 }
0x486b   :  { %v8360_v35 = vpop.eup %8359 }
0x48cf   :  { %v4447_v36 = vpop.permute.xlu1 %4446 }
0x48d0   :  { %v4449_v37 = vmul.f32 %v8360_v35, %v4447_v36 }
0x48d2   :  { %4451 = vrot.lane.b32.xlu0 %v4449_v37, %s8509_s11 }
0x4944   :  { %v4452_v38 = vpop.permute.xlu0 %4451 }
0x4945   :  { %v4454_v39 = vadd.f32 %v8356_v28, %v4452_v38 }
0x4947   :  { %v4456_v40 = vpack.c.bf16 %v4454_v39, %v4454_v39 }
0x4949   :  { %4458 = vrot.lane.b32.xlu1 %v4456_v40, %s8510_s12 }
0x49bb   :  { %v4459_v41 = vpop.permute.xlu1 %4458 }
0x49bc   :  { %7826 = vmatmul.mubr.msk.bf16.vlgmr.msra.gmra.mxu1 %vm106_vm3, %v4459_v41  ;;  %7832 = vmatmul.mubr.msk.bf16.vlgmr.msra.gmra.mxu0 %vm106_vm3, %v4459_v41 }
0x49bd   :  { %7836 = vmatpush3.bf16.msra.mxu1 %v8598_v23  ;;  %7842 = vmatpush3.bf16.msra.mxu0 %v8586_v13 }
0x49be   :  { %7837 = vmatprep.mubr.msk.bf16.mxu1 %vm8503_vm1, %v8502_v0  ;;  %7847 = vmatprep.subr.bf16.mxu1 %v8502_v0 }
0x49bf   :  { %7843 = vmatprep.mubr.msk.bf16.mxu0 %vm8503_vm1, %v8502_v0  ;;  %7853 = vmatprep.subr.bf16.mxu0 %v8502_v0 }
0x49c4   :  { %7838 = vmatmul.mubr.msk.bf16.vlgmr.msra.gmra.mxu1 %vm106_vm3, %v4459_v41 }
0x49c5   :  { %7848 = vmatpush3.bf16.msra.mxu1 %v8580_v11  ;;  %7849 = vmatprep.mubr.msk.bf16.mxu1 %vm8503_vm1, %v8502_v0 }
0x49c6   :  { %7859 = vmatprep.subr.bf16.mxu1 %v8502_v0 }
0x4a7c   :  { %v4497_v43 = vpop.f32.mrf.mxu1  ;;  %v4544_v44 = vpop.f32.mrf.mxu0 }
0x4a7d   :  { %v4503_v45 = vadd.f32 %v4497_v43, %v4455_v42  ;;  %4551 = vrot.lane.b32.xlu1 %v4544_v44, %s8509_s11 }
0x4a7e   :  { %v7827_v46 = vpop.f32.mrf.mxu1  ;;  %v7833_v47 = vpop.f32.mrf.mxu0 }
0x4a7f   :  { %v7020_v49 = vmul.f32 -1.442695, %v4503_v45 }
0x4a80   :  { %v4500_v50 = vpop.f32.mrf.mxu1  ;;  %v4547_v51 = vpop.f32.mrf.mxu0 }
0x4a81   :  { %8361 = vpow2.f32 %v7020_v49 }
0x4a82   :  { %v7828_v52 = vpop.f32.mrf.mxu1  ;;  %v7834_v53 = vpop.f32.mrf.mxu0 }
0x4a84   :  { %v4595_v54 = vpop.f32.mrf.mxu1 }
0x4a85   :  { %v4596_v60 = vadd.f32 %v4595_v54, %v8610_v48 }
0x4a86   :  { %v7839_v55 = vpop.f32.mrf.mxu1 }
0x4a88   :  { %v4598_v56 = vpop.f32.mrf.mxu1 }
0x4a8a   :  { %v7840_v57 = vpop.f32.mrf.mxu1 }
0x4a8e   :  { %v8362_v58 = vpop.eup %8361 }
0x4a8f   :  { %v4507_v59 = vadd.f32 1.0, %v8362_v58 }
0x4a91   :  { %8363 = vrcp.f32 %v4507_v59  ;;  %v4783_v59 = vld [vmem:[#allocation2 + $0x8] sm:$0x3] }
0x4a9e   :  { %v8364_v61 = vpop.eup %8363 }
0x4a9f   :  { %v4601_v62 = vmul.f32 %v8364_v61, %v4596_v60 }
0x4aa1   :  { %4603 = vrot.lane.b32.xlu0 %v4601_v62, %s8508_s1 }
0x4aef   :  { %v4552_v4 = vpop.permute.xlu1 %4551 }
0x4af0   :  { %v4554_v5 = vadd.f32 %v4552_v4, %v4455_v42 }
0x4af2   :  { %v7022_v6 = vmul.f32 -1.442695, %v4554_v5 }
0x4b13   :  { %v4604_v63 = vpop.permute.xlu0 %4603 }
0x4b14   :  { %v4606_v1 = vadd.f32 %v4604_v63, %v4455_v42 }
0x4b16   :  { %8365 = vtanh.f32 %v4606_v1 }
0x4b17   :  { %8367 = vpow2.f32 %v7022_v6 }
0x4b23   :  { %v8366_v2 = vpop.eup %8365 }
0x4b24   :  { %v4608_v3 = vsub.f32 %v4454_v39, %v8366_v2  ;;  %v8368_v7 = vpop.eup %8367 }
0x4b25   :  { %v4558_v8 = vadd.f32 1.0, %v8368_v7 }
0x4b26   :  { %4610 = vrot.lane.b32.xlu0 %v4608_v3, %s8507_s8 }
0x4b27   :  { %8369 = vrcp.f32 %v4558_v8 }
0x4b34   :  { %v8370_v9 = vpop.eup %8369 }
0x4b98   :  { %v4611_v10 = vpop.permute.xlu0 %4610 }
0x4b99   :  { %v4613_v12 = vmul.f32 %v8370_v9, %v4611_v10 }
0x4b9b   :  { %4615 = vrot.lane.b32.xlu1 %v4613_v12, %s8509_s11 }
0x4c0d   :  { %v4616_v14 = vpop.permute.xlu1 %4615 }
0x4c0e   :  { %v4618_v15 = vadd.f32 %v8366_v2, %v4616_v14 }
0x4c10   :  { %v4620_v16 = vpack.c.bf16 %v4618_v15, %v4618_v15 }
0x4c12   :  { %4622 = vrot.lane.b32.xlu0 %v4620_v16, %s8510_s12 }
0x4c84   :  { %v4623_v17 = vpop.permute.xlu0 %4622 }
0x4c85   :  { %7844 = vmatmul.mubr.msk.bf16.vlgmr.msra.gmra.mxu0 %vm106_vm3, %v4623_v17  ;;  %7850 = vmatmul.mubr.msk.bf16.vlgmr.msra.gmra.mxu1 %vm106_vm3, %v4623_v17 }
0x4c86   :  { %7854 = vmatpush3.bf16.msra.mxu0 %v8598_v23  ;;  %7860 = vmatpush3.bf16.msra.mxu1 %v8586_v13 }
0x4c87   :  { %7855 = vmatprep.mubr.msk.bf16.mxu0 %vm8503_vm1, %v8502_v0  ;;  %7865 = vmatprep.subr.bf16.mxu0 %v8502_v0 }
0x4c88   :  { %7861 = vmatprep.mubr.msk.bf16.mxu1 %vm8503_vm1, %v8502_v0  ;;  %7871 = vmatprep.subr.bf16.mxu1 %v8502_v0 }
0x4c8d   :  { %7856 = vmatmul.mubr.msk.bf16.vlgmr.msra.gmra.mxu0 %vm106_vm3, %v4623_v17 }
0x4c8e   :  { %7866 = vmatpush3.bf16.msra.mxu0 %v8580_v11  ;;  %7867 = vmatprep.mubr.msk.bf16.mxu0 %vm8503_vm1, %v8502_v0 }
0x4c8f   :  { %7877 = vmatprep.subr.bf16.mxu0 %v8502_v0 }
0x4d45   :  { %v4661_v20 = vpop.f32.mrf.mxu0  ;;  %v4708_v24 = vpop.f32.mrf.mxu1 }
0x4d46   :  { %v4667_v25 = vadd.f32 %v4661_v20, %v4619_v19  ;;  %4715 = vrot.lane.b32.xlu0 %v4708_v24, %s8509_s11 }
0x4d47   :  { %v7845_v26 = vpop.f32.mrf.mxu0  ;;  %v7851_v27 = vpop.f32.mrf.mxu1 }
0x4d48   :  { %v7025_v28 = vmul.f32 -1.442695, %v4667_v25 }
0x4d49   :  { %v4664_v29 = vpop.f32.mrf.mxu0  ;;  %v4711_v30 = vpop.f32.mrf.mxu1 }
0x4d4a   :  { %8371 = vpow2.f32 %v7025_v28 }
0x4d4b   :  { %v7846_v31 = vpop.f32.mrf.mxu0  ;;  %v7852_v32 = vpop.f32.mrf.mxu1 }
0x4d4d   :  { %v4759_v33 = vpop.f32.mrf.mxu0 }
0x4d4e   :  { %v4760_v39 = vadd.f32 %v4759_v33, %v8610_v48 }
0x4d4f   :  { %v7857_v34 = vpop.f32.mrf.mxu0 }
0x4d51   :  { %v4762_v35 = vpop.f32.mrf.mxu0 }
0x4d53   :  { %v7858_v36 = vpop.f32.mrf.mxu0 }
0x4d57   :  { %v8372_v37 = vpop.eup %8371 }
0x4d58   :  { %v4671_v38 = vadd.f32 1.0, %v8372_v37 }
0x4d5a   :  { %8373 = vrcp.f32 %v4671_v38  ;;  %v4947_v38 = vld [vmem:[#allocation2 + $0xa] sm:$0x3] }
0x4d67   :  { %v8374_v40 = vpop.eup %8373 }
0x4d68   :  { %v4765_v41 = vmul.f32 %v8374_v40, %v4760_v39 }
0x4d6a   :  { %4767 = vrot.lane.b32.xlu1 %v4765_v41, %s8508_s1 }
0x4db8   :  { %v4716_v46 = vpop.permute.xlu0 %4715 }
0x4db9   :  { %v4718_v47 = vadd.f32 %v4716_v46, %v4619_v19 }
0x4dbb   :  { %v7027_v49 = vmul.f32 -1.442695, %v4718_v47 }
0x4ddc   :  { %v4768_v42 = vpop.permute.xlu1 %4767 }
0x4ddd   :  { %v4770_v43 = vadd.f32 %v4768_v42, %v4619_v19 }
0x4ddf   :  { %8375 = vtanh.f32 %v4770_v43 }
0x4de0   :  { %8377 = vpow2.f32 %v7027_v49 }
0x4dec   :  { %v8376_v44 = vpop.eup %8375 }
0x4ded   :  { %v4772_v45 = vsub.f32 %v4618_v15, %v8376_v44  ;;  %v8378_v50 = vpop.eup %8377 }
0x4dee   :  { %v4722_v51 = vadd.f32 1.0, %v8378_v50 }
0x4def   :  { %4774 = vrot.lane.b32.xlu1 %v4772_v45, %s8507_s8 }
0x4df0   :  { %8379 = vrcp.f32 %v4722_v51 }
0x4dfd   :  { %v8380_v52 = vpop.eup %8379 }
0x4e61   :  { %v4775_v53 = vpop.permute.xlu1 %4774 }
0x4e62   :  { %v4777_v54 = vmul.f32 %v8380_v52, %v4775_v53 }
0x4e64   :  { %4779 = vrot.lane.b32.xlu0 %v4777_v54, %s8509_s11 }
0x4ed6   :  { %v4780_v55 = vpop.permute.xlu0 %4779 }
0x4ed7   :  { %v4782_v56 = vadd.f32 %v8376_v44, %v4780_v55 }
0x4ed9   :  { %v4784_v57 = vpack.c.bf16 %v4782_v56, %v4782_v56 }
0x4edb   :  { %4786 = vrot.lane.b32.xlu1 %v4784_v57, %s8510_s12 }
0x4f4d   :  { %v4787_v58 = vpop.permute.xlu1 %4786 }
0x4f4e   :  { %7862 = vmatmul.mubr.msk.bf16.vlgmr.msra.gmra.mxu1 %vm106_vm3, %v4787_v58  ;;  %7868 = vmatmul.mubr.msk.bf16.vlgmr.msra.gmra.mxu0 %vm106_vm3, %v4787_v58 }
0x4f4f   :  { %7872 = vmatpush3.bf16.msra.mxu1 %v8598_v23  ;;  %7878 = vmatpush3.bf16.msra.mxu0 %v8586_v13 }
0x4f50   :  { %7873 = vmatprep.mubr.msk.bf16.mxu1 %vm8503_vm1, %v8502_v0  ;;  %7883 = vmatprep.subr.bf16.mxu1 %v8502_v0 }
0x4f51   :  { %7879 = vmatprep.mubr.msk.bf16.mxu0 %vm8503_vm1, %v8502_v0  ;;  %7889 = vmatprep.subr.bf16.mxu0 %v8502_v0 }
0x4f56   :  { %7874 = vmatmul.mubr.msk.bf16.vlgmr.msra.gmra.mxu1 %vm106_vm3, %v4787_v58 }
0x4f57   :  { %7884 = vmatpush3.bf16.msra.mxu1 %v8580_v11  ;;  %7885 = vmatprep.mubr.msk.bf16.mxu1 %vm8503_vm1, %v8502_v0 }
0x4f58   :  { %7895 = vmatprep.subr.bf16.mxu1 %v8502_v0 }
0x500e   :  { %v4825_v60 = vpop.f32.mrf.mxu1  ;;  %v4872_v61 = vpop.f32.mrf.mxu0 }
0x500f   :  { %v4831_v62 = vadd.f32 %v4825_v60, %v4783_v59  ;;  %4879 = vrot.lane.b32.xlu1 %v4872_v61, %s8509_s11 }
0x5010   :  { %v7863_v63 = vpop.f32.mrf.mxu1  ;;  %v7869_v1 = vpop.f32.mrf.mxu0 }
0x5011   :  { %v7030_v2 = vmul.f32 -1.442695, %v4831_v62 }
0x5012   :  { %v4828_v3 = vpop.f32.mrf.mxu1  ;;  %v4875_v4 = vpop.f32.mrf.mxu0 }
0x5013   :  { %8381 = vpow2.f32 %v7030_v2 }
0x5014   :  { %v7864_v5 = vpop.f32.mrf.mxu1  ;;  %v7870_v6 = vpop.f32.mrf.mxu0 }
0x5016   :  { %v4923_v7 = vpop.f32.mrf.mxu1 }
0x5017   :  { %v4924_v15 = vadd.f32 %v4923_v7, %v8610_v48 }
0x5018   :  { %v7875_v8 = vpop.f32.mrf.mxu1 }
0x501a   :  { %v4926_v9 = vpop.f32.mrf.mxu1 }
0x501c   :  { %v7876_v10 = vpop.f32.mrf.mxu1 }
0x5020   :  { %v8382_v12 = vpop.eup %8381 }
0x5021   :  { %v4835_v14 = vadd.f32 1.0, %v8382_v12 }
0x5023   :  { %8383 = vrcp.f32 %v4835_v14  ;;  %v5111_v14 = vld [vmem:[#allocation2 + $0xc] sm:$0x3] }
0x5030   :  { %v8384_v16 = vpop.eup %8383 }
0x5031   :  { %v4929_v17 = vmul.f32 %v8384_v16, %v4924_v15 }
0x5033   :  { %4931 = vrot.lane.b32.xlu0 %v4929_v17, %s8508_s1 }
0x5081   :  { %v4880_v26 = vpop.permute.xlu1 %4879 }
0x5082   :  { %v4882_v27 = vadd.f32 %v4880_v26, %v4783_v59 }
0x5084   :  { %v7032_v28 = vmul.f32 -1.442695, %v4882_v27 }
0x50a5   :  { %v4932_v19 = vpop.permute.xlu0 %4931 }
0x50a6   :  { %v4934_v20 = vadd.f32 %v4932_v19, %v4783_v59 }
0x50a8   :  { %8385 = vtanh.f32 %v4934_v20 }
0x50a9   :  { %8387 = vpow2.f32 %v7032_v28 }
0x50b5   :  { %v8386_v24 = vpop.eup %8385 }
0x50b6   :  { %v4936_v25 = vsub.f32 %v4782_v56, %v8386_v24  ;;  %v8388_v29 = vpop.eup %8387 }
0x50b7   :  { %v4886_v30 = vadd.f32 1.0, %v8388_v29 }
0x50b8   :  { %4938 = vrot.lane.b32.xlu0 %v4936_v25, %s8507_s8 }
0x50b9   :  { %8389 = vrcp.f32 %v4886_v30 }
0x50c6   :  { %v8390_v31 = vpop.eup %8389 }
0x512a   :  { %v4939_v32 = vpop.permute.xlu0 %4938 }
0x512b   :  { %v4941_v33 = vmul.f32 %v8390_v31, %v4939_v32 }
0x512d   :  { %4943 = vrot.lane.b32.xlu1 %v4941_v33, %s8509_s11 }
0x519f   :  { %v4944_v34 = vpop.permute.xlu1 %4943 }
0x51a0   :  { %v4946_v35 = vadd.f32 %v8386_v24, %v4944_v34 }
0x51a2   :  { %v4948_v36 = vpack.c.bf16 %v4946_v35, %v4946_v35 }
0x51a4   :  { %4950 = vrot.lane.b32.xlu0 %v4948_v36, %s8510_s12 }
0x5216   :  { %v4951_v37 = vpop.permute.xlu0 %4950 }
0x5217   :  { %7880 = vmatmul.mubr.msk.bf16.vlgmr.msra.gmra.mxu0 %vm106_vm3, %v4951_v37  ;;  %7886 = vmatmul.mubr.msk.bf16.vlgmr.msra.gmra.mxu1 %vm106_vm3, %v4951_v37 }
0x5218   :  { %7890 = vmatpush3.bf16.msra.mxu0 %v8598_v23  ;;  %7896 = vmatpush3.bf16.msra.mxu1 %v8586_v13 }
0x5219   :  { %7891 = vmatprep.mubr.msk.bf16.mxu0 %vm8503_vm1, %v8502_v0  ;;  %7901 = vmatprep.subr.bf16.mxu0 %v8502_v0 }
0x521a   :  { %7897 = vmatprep.mubr.msk.bf16.mxu1 %vm8503_vm1, %v8502_v0  ;;  %7907 = vmatprep.subr.bf16.mxu1 %v8502_v0 }
0x521f   :  { %7892 = vmatmul.mubr.msk.bf16.vlgmr.msra.gmra.mxu0 %vm106_vm3, %v4951_v37 }
0x5220   :  { %7902 = vmatpush3.bf16.msra.mxu0 %v8580_v11  ;;  %7903 = vmatprep.mubr.msk.bf16.mxu0 %vm8503_vm1, %v8502_v0 }
0x5221   :  { %7913 = vmatprep.subr.bf16.mxu0 %v8502_v0 }
0x52d7   :  { %v4989_v39 = vpop.f32.mrf.mxu0  ;;  %v5036_v40 = vpop.f32.mrf.mxu1 }
0x52d8   :  { %v4995_v41 = vadd.f32 %v4989_v39, %v4947_v38  ;;  %5043 = vrot.lane.b32.xlu0 %v5036_v40, %s8509_s11 }
0x52d9   :  { %v7881_v42 = vpop.f32.mrf.mxu0  ;;  %v7887_v43 = vpop.f32.mrf.mxu1 }
0x52da   :  { %v7035_v44 = vmul.f32 -1.442695, %v4995_v41 }
0x52db   :  { %v4992_v45 = vpop.f32.mrf.mxu0  ;;  %v5039_v46 = vpop.f32.mrf.mxu1 }
0x52dc   :  { %8391 = vpow2.f32 %v7035_v44 }
0x52dd   :  { %v7882_v47 = vpop.f32.mrf.mxu0  ;;  %v7888_v49 = vpop.f32.mrf.mxu1 }
0x52df   :  { %v5087_v50 = vpop.f32.mrf.mxu0 }
0x52e0   :  { %v5088_v56 = vadd.f32 %v5087_v50, %v8610_v48 }
0x52e1   :  { %v7893_v51 = vpop.f32.mrf.mxu0 }
0x52e3   :  { %v5090_v52 = vpop.f32.mrf.mxu0 }
0x52e5   :  { %v7894_v53 = vpop.f32.mrf.mxu0 }
0x52e9   :  { %v8392_v54 = vpop.eup %8391 }
0x52ea   :  { %v4999_v55 = vadd.f32 1.0, %v8392_v54 }
0x52ec   :  { %8393 = vrcp.f32 %v4999_v55  ;;  %v5275_v55 = vld [vmem:[#allocation2 + $0xe] sm:$0x3] }
0x52f9   :  { %v8394_v57 = vpop.eup %8393 }
0x52fa   :  { %v5093_v58 = vmul.f32 %v8394_v57, %v5088_v56 }
0x52fc   :  { %5095 = vrot.lane.b32.xlu1 %v5093_v58, %s8508_s1 }
0x534a   :  { %v5044_v63 = vpop.permute.xlu0 %5043 }
0x534b   :  { %v5046_v1 = vadd.f32 %v5044_v63, %v4947_v38 }
0x534d   :  { %v7037_v2 = vmul.f32 -1.442695, %v5046_v1 }
0x536e   :  { %v5096_v59 = vpop.permute.xlu1 %5095 }
0x536f   :  { %v5098_v60 = vadd.f32 %v5096_v59, %v4947_v38 }
0x5371   :  { %8395 = vtanh.f32 %v5098_v60 }
0x5372   :  { %8397 = vpow2.f32 %v7037_v2 }
0x537e   :  { %v8396_v61 = vpop.eup %8395 }
0x537f   :  { %v5100_v62 = vsub.f32 %v4946_v35, %v8396_v61  ;;  %v8398_v3 = vpop.eup %8397 }
0x5380   :  { %v5050_v4 = vadd.f32 1.0, %v8398_v3 }
0x5381   :  { %5102 = vrot.lane.b32.xlu1 %v5100_v62, %s8507_s8 }
0x5382   :  { %8399 = vrcp.f32 %v5050_v4 }
0x538f   :  { %v8400_v5 = vpop.eup %8399 }
0x53f3   :  { %v5103_v6 = vpop.permute.xlu1 %5102 }
0x53f4   :  { %v5105_v7 = vmul.f32 %v8400_v5, %v5103_v6 }
0x53f6   :  { %5107 = vrot.lane.b32.xlu0 %v5105_v7, %s8509_s11 }
0x5468   :  { %v5108_v8 = vpop.permute.xlu0 %5107 }
0x5469   :  { %v5110_v9 = vadd.f32 %v8396_v61, %v5108_v8 }
0x546b   :  { %v5112_v10 = vpack.c.bf16 %v5110_v9, %v5110_v9 }
0x546d   :  { %5114 = vrot.lane.b32.xlu1 %v5112_v10, %s8510_s12 }
0x54df   :  { %v5115_v12 = vpop.permute.xlu1 %5114 }
0x54e0   :  { %7898 = vmatmul.mubr.msk.bf16.vlgmr.msra.gmra.mxu1 %vm106_vm3, %v5115_v12  ;;  %7904 = vmatmul.mubr.msk.bf16.vlgmr.msra.gmra.mxu0 %vm106_vm3, %v5115_v12 }
0x54e1   :  { %7908 = vmatpush3.bf16.msra.mxu1 %v8598_v23  ;;  %7914 = vmatpush3.bf16.msra.mxu0 %v8586_v13 }
0x54e2   :  { %7909 = vmatprep.mubr.msk.bf16.mxu1 %vm8503_vm1, %v8502_v0  ;;  %7919 = vmatprep.subr.bf16.mxu1 %v8502_v0 }
0x54e3   :  { %7915 = vmatprep.mubr.msk.bf16.mxu0 %vm8503_vm1, %v8502_v0  ;;  %7925 = vmatprep.subr.bf16.mxu0 %v8502_v0 }
0x54e8   :  { %7910 = vmatmul.mubr.msk.bf16.vlgmr.msra.gmra.mxu1 %vm106_vm3, %v5115_v12 }
0x54e9   :  { %7920 = vmatpush3.bf16.msra.mxu1 %v8580_v11  ;;  %7921 = vmatprep.mubr.msk.bf16.mxu1 %vm8503_vm1, %v8502_v0 }
0x54ea   :  { %7931 = vmatprep.subr.bf16.mxu1 %v8502_v0 }
0x55a0   :  { %v5153_v15 = vpop.f32.mrf.mxu1  ;;  %v5200_v16 = vpop.f32.mrf.mxu0 }
0x55a1   :  { %v5159_v17 = vadd.f32 %v5153_v15, %v5111_v14  ;;  %5207 = vrot.lane.b32.xlu1 %v5200_v16, %s8509_s11 }
0x55a2   :  { %v7899_v19 = vpop.f32.mrf.mxu1  ;;  %v7905_v20 = vpop.f32.mrf.mxu0 }
0x55a3   :  { %v7040_v24 = vmul.f32 -1.442695, %v5159_v17 }
0x55a4   :  { %v5156_v25 = vpop.f32.mrf.mxu1  ;;  %v5203_v26 = vpop.f32.mrf.mxu0 }
0x55a5   :  { %8401 = vpow2.f32 %v7040_v24 }
0x55a6   :  { %v7900_v27 = vpop.f32.mrf.mxu1  ;;  %v7906_v28 = vpop.f32.mrf.mxu0 }
0x55a8   :  { %v5251_v29 = vpop.f32.mrf.mxu1 }
0x55a9   :  { %v5252_v35 = vadd.f32 %v5251_v29, %v8610_v48 }
0x55aa   :  { %v7911_v30 = vpop.f32.mrf.mxu1 }
0x55ac   :  { %v5254_v31 = vpop.f32.mrf.mxu1 }
0x55ae   :  { %v7912_v32 = vpop.f32.mrf.mxu1 }
0x55b2   :  { %v8402_v33 = vpop.eup %8401 }
0x55b3   :  { %v5163_v34 = vadd.f32 1.0, %v8402_v33 }
0x55b5   :  { %8403 = vrcp.f32 %v5163_v34  ;;  %v5444_v34 = vld [vmem:[#allocation2] sm:$0x3] }
0x55c2   :  { %v8404_v36 = vpop.eup %8403 }
0x55c3   :  { %v5257_v37 = vmul.f32 %v8404_v36, %v5252_v35 }
0x55c5   :  { %5259 = vrot.lane.b32.xlu0 %v5257_v37, %s8508_s1 }
0x5613   :  { %v5208_v42 = vpop.permute.xlu1 %5207 }
0x5614   :  { %v5210_v43 = vadd.f32 %v5208_v42, %v5111_v14 }
0x5616   :  { %v7042_v44 = vmul.f32 -1.442695, %v5210_v43 }
0x5637   :  { %v5260_v38 = vpop.permute.xlu0 %5259 }
0x5638   :  { %v5262_v39 = vadd.f32 %v5260_v38, %v5111_v14 }
0x563a   :  { %8405 = vtanh.f32 %v5262_v39 }
0x563b   :  { %8407 = vpow2.f32 %v7042_v44 }
0x5647   :  { %v8406_v40 = vpop.eup %8405 }
0x5648   :  { %v5264_v41 = vsub.f32 %v5110_v9, %v8406_v40  ;;  %v8408_v45 = vpop.eup %8407 }
0x5649   :  { %v5214_v46 = vadd.f32 1.0, %v8408_v45 }
0x564a   :  { %5266 = vrot.lane.b32.xlu0 %v5264_v41, %s8507_s8 }
0x564b   :  { %8409 = vrcp.f32 %v5214_v46 }
0x5658   :  { %v8410_v47 = vpop.eup %8409 }
0x56bc   :  { %v5267_v49 = vpop.permute.xlu0 %5266 }
0x56bd   :  { %v5269_v50 = vmul.f32 %v8410_v47, %v5267_v49 }
0x56bf   :  { %5271 = vrot.lane.b32.xlu1 %v5269_v50, %s8509_s11 }
0x5731   :  { %v5272_v51 = vpop.permute.xlu1 %5271 }
0x5732   :  { %v5274_v52 = vadd.f32 %v8406_v40, %v5272_v51 }
0x5734   :  { %v5276_v53 = vpack.c.bf16 %v5274_v52, %v5274_v52 }
0x5736   :  { %5278 = vrot.lane.b32.xlu0 %v5276_v53, %s8510_s12 }
0x57a8   :  { %v5279_v54 = vpop.permute.xlu0 %5278 }
0x57a9   :  { %7916 = vmatmul.mubr.msk.bf16.vlgmr.msra.gmra.mxu0 %vm106_vm3, %v5279_v54  ;;  %7922 = vmatmul.mubr.msk.bf16.vlgmr.msra.gmra.mxu1 %vm106_vm3, %v5279_v54 }
0x57aa   :  { %7926 = vmatpush3.bf16.msra.mxu0 %v8598_v23  ;;  %7932 = vmatpush3.bf16.msra.mxu1 %v8586_v13 }
0x57ab   :  { %7927 = vmatprep.mubr.msk.bf16.mxu0 %vm8503_vm1, %v8502_v0  ;;  %7937 = vmatprep.subr.bf16.mxu0 %v8502_v0 }
0x57ac   :  { %7933 = vmatprep.mubr.msk.bf16.mxu1 %vm8503_vm1, %v8502_v0  ;;  %7943 = vmatprep.subr.bf16.mxu1 %v8502_v0 }
0x57b1   :  { %7928 = vmatmul.mubr.msk.bf16.vlgmr.msra.gmra.mxu0 %vm106_vm3, %v5279_v54 }
0x57b2   :  { %7938 = vmatpush3.bf16.msra.mxu0 %v8580_v11  ;;  %7939 = vmatprep.mubr.msk.bf16.mxu0 %vm8503_vm1, %v8502_v0 }
0x57b3   :  { %7949 = vmatprep.subr.bf16.mxu0 %v8502_v0 }
0x5869   :  { %v5317_v56 = vpop.f32.mrf.mxu0  ;;  %v5364_v57 = vpop.f32.mrf.mxu1 }
0x586a   :  { %v5323_v58 = vadd.f32 %v5317_v56, %v5275_v55  ;;  %5371 = vrot.lane.b32.xlu0 %v5364_v57, %s8509_s11 }
0x586b   :  { %v7917_v59 = vpop.f32.mrf.mxu0  ;;  %v7923_v60 = vpop.f32.mrf.mxu1 }
0x586c   :  { %v7045_v61 = vmul.f32 -1.442695, %v5323_v58 }
0x586d   :  { %v5320_v62 = vpop.f32.mrf.mxu0  ;;  %v5367_v63 = vpop.f32.mrf.mxu1 }
0x586e   :  { %8411 = vpow2.f32 %v7045_v61 }
0x586f   :  { %v7918_v1 = vpop.f32.mrf.mxu0  ;;  %v7924_v2 = vpop.f32.mrf.mxu1 }
0x5871   :  { %v5415_v3 = vpop.f32.mrf.mxu0 }
0x5872   :  { %v5416_v9 = vadd.f32 %v5415_v3, %v8610_v48 }
0x5873   :  { %v7929_v4 = vpop.f32.mrf.mxu0 }
0x5875   :  { %v5418_v5 = vpop.f32.mrf.mxu0 }
0x5877   :  { %v7930_v6 = vpop.f32.mrf.mxu0 }
0x587b   :  { %v8412_v7 = vpop.eup %8411 }
0x587c   :  { %v5327_v8 = vadd.f32 1.0, %v8412_v7 }
0x587e   :  { %8413 = vrcp.f32 %v5327_v8  ;;  %v5608_v8 = vld [vmem:[#allocation2 + $0x2] sm:$0x3] }
0x588b   :  { %v8414_v10 = vpop.eup %8413 }
0x588c   :  { %v5421_v12 = vmul.f32 %v8414_v10, %v5416_v9 }
0x588e   :  { %5423 = vrot.lane.b32.xlu1 %v5421_v12, %s8508_s1 }
0x58dc   :  { %v5372_v19 = vpop.permute.xlu0 %5371 }
0x58dd   :  { %v5374_v20 = vadd.f32 %v5372_v19, %v5275_v55 }
0x58df   :  { %v7047_v24 = vmul.f32 -1.442695, %v5374_v20 }
0x5900   :  { %v5424_v14 = vpop.permute.xlu1 %5423 }
0x5901   :  { %v5426_v15 = vadd.f32 %v5424_v14, %v5275_v55 }
0x5903   :  { %8415 = vtanh.f32 %v5426_v15 }
0x5904   :  { %8417 = vpow2.f32 %v7047_v24 }
0x5910   :  { %v8416_v16 = vpop.eup %8415 }
0x5911   :  { %v5428_v17 = vsub.f32 %v5274_v52, %v8416_v16  ;;  %v8418_v25 = vpop.eup %8417 }
0x5912   :  { %v5378_v26 = vadd.f32 1.0, %v8418_v25 }
0x5913   :  { %5430 = vrot.lane.b32.xlu1 %v5428_v17, %s8507_s8 }
0x5914   :  { %8419 = vrcp.f32 %v5378_v26 }
0x5921   :  { %v8420_v27 = vpop.eup %8419 }
0x5985   :  { %v5431_v28 = vpop.permute.xlu1 %5430 }
0x5986   :  { %v5433_v29 = vmul.f32 %v8420_v27, %v5431_v28 }
0x5988   :  { %5435 = vrot.lane.b32.xlu0 %v5433_v29, %s8509_s11 }
0x59fa   :  { %v5436_v30 = vpop.permute.xlu0 %5435 }
0x59fb   :  { %v9285_v31 = vadd.f32 %v8416_v16, %v5436_v30 }
0x59fd   :  { %v5445_v32 = vpack.c.bf16 %v9285_v31, %v9285_v31 }
0x59ff   :  { %5447 = vrot.lane.b32.xlu1 %v5445_v32, %s8510_s12 }
0x5a71   :  { %v5448_v33 = vpop.permute.xlu1 %5447 }
0x5a72   :  { %7934 = vmatmul.mubr.msk.bf16.vlgmr.msra.gmra.mxu1 %vm106_vm3, %v5448_v33  ;;  %7940 = vmatmul.mubr.msk.bf16.vlgmr.msra.gmra.mxu0 %vm106_vm3, %v5448_v33 }
0x5a73   :  { %7944 = vmatpush3.bf16.msra.mxu1 %v8598_v23  ;;  %7950 = vmatpush3.bf16.msra.mxu0 %v8586_v13 }
0x5a74   :  { %7945 = vmatprep.mubr.msk.bf16.mxu1 %vm8503_vm1, %v8502_v0  ;;  %7955 = vmatprep.subr.bf16.mxu1 %v8502_v0 }
0x5a75   :  { %7951 = vmatprep.mubr.msk.bf16.mxu0 %vm8503_vm1, %v8502_v0  ;;  %7961 = vmatprep.subr.bf16.mxu0 %v8502_v0 }
0x5a7a   :  { %7946 = vmatmul.mubr.msk.bf16.vlgmr.msra.gmra.mxu1 %vm106_vm3, %v5448_v33 }
0x5a7b   :  { %7956 = vmatpush3.bf16.msra.mxu1 %v8580_v11  ;;  %7957 = vmatprep.mubr.msk.bf16.mxu1 %vm8503_vm1, %v8502_v0 }
0x5a7c   :  { %7967 = vmatprep.subr.bf16.mxu1 %v8502_v0 }
0x5b32   :  { %v5486_v35 = vpop.f32.mrf.mxu1  ;;  %v5533_v36 = vpop.f32.mrf.mxu0 }
0x5b33   :  { %v5492_v37 = vadd.f32 %v5486_v35, %v5444_v34  ;;  %5540 = vrot.lane.b32.xlu1 %v5533_v36, %s8509_s11 }
0x5b34   :  { %v7935_v38 = vpop.f32.mrf.mxu1  ;;  %v7941_v39 = vpop.f32.mrf.mxu0 }
0x5b35   :  { %v7050_v40 = vmul.f32 -1.442695, %v5492_v37 }
0x5b36   :  { %v5489_v41 = vpop.f32.mrf.mxu1  ;;  %v5536_v42 = vpop.f32.mrf.mxu0 }
0x5b37   :  { %8421 = vpow2.f32 %v7050_v40 }
0x5b38   :  { %v7936_v43 = vpop.f32.mrf.mxu1  ;;  %v7942_v44 = vpop.f32.mrf.mxu0 }
0x5b3a   :  { %v5584_v45 = vpop.f32.mrf.mxu1 }
0x5b3b   :  { %v5585_v52 = vadd.f32 %v5584_v45, %v8610_v48 }
0x5b3c   :  { %v7947_v46 = vpop.f32.mrf.mxu1 }
0x5b3e   :  { %v5587_v47 = vpop.f32.mrf.mxu1 }
0x5b40   :  { %v7948_v49 = vpop.f32.mrf.mxu1 }
0x5b44   :  { %v8422_v50 = vpop.eup %8421 }
0x5b45   :  { %v5496_v51 = vadd.f32 1.0, %v8422_v50 }
0x5b47   :  { %8423 = vrcp.f32 %v5496_v51 }
0x5b54   :  { %v8424_v53 = vpop.eup %8423 }
0x5b55   :  { %v5590_v54 = vmul.f32 %v8424_v53, %v5585_v52  ;;  %v5772_v52 = vld [vmem:[#allocation2 + $0x4] sm:$0x3] }
0x5b57   :  { %5592 = vrot.lane.b32.xlu0 %v5590_v54, %s8508_s1 }
0x5ba5   :  { %v5541_v59 = vpop.permute.xlu1 %5540 }
0x5ba6   :  { %v5543_v60 = vadd.f32 %v5541_v59, %v5444_v34 }
0x5ba8   :  { %v7052_v61 = vmul.f32 -1.442695, %v5543_v60 }
0x5bc9   :  { %v5593_v55 = vpop.permute.xlu0 %5592 }
0x5bca   :  { %v5595_v56 = vadd.f32 %v5593_v55, %v5444_v34 }
0x5bcc   :  { %8425 = vtanh.f32 %v5595_v56 }
0x5bcd   :  { %8427 = vpow2.f32 %v7052_v61 }
0x5bd9   :  { %v8426_v57 = vpop.eup %8425 }
0x5bda   :  { %v5597_v58 = vsub.f32 %v9285_v31, %v8426_v57  ;;  %v8428_v62 = vpop.eup %8427 }
0x5bdb   :  { %v5547_v63 = vadd.f32 1.0, %v8428_v62 }
0x5bdc   :  { %5599 = vrot.lane.b32.xlu0 %v5597_v58, %s8507_s8 }
0x5bdd   :  { %8429 = vrcp.f32 %v5547_v63 }
0x5bea   :  { %v8430_v1 = vpop.eup %8429 }
0x5c4e   :  { %v5600_v2 = vpop.permute.xlu0 %5599 }
0x5c4f   :  { %v5602_v3 = vmul.f32 %v8430_v1, %v5600_v2 }
0x5c51   :  { %5604 = vrot.lane.b32.xlu1 %v5602_v3, %s8509_s11 }
0x5cc3   :  { %v5605_v4 = vpop.permute.xlu1 %5604 }
0x5cc4   :  { %v5607_v5 = vadd.f32 %v8426_v57, %v5605_v4 }
0x5cc6   :  { %v5609_v6 = vpack.c.bf16 %v5607_v5, %v5607_v5 }
0x5cc8   :  { %5611 = vrot.lane.b32.xlu0 %v5609_v6, %s8510_s12 }
0x5d3a   :  { %v5612_v7 = vpop.permute.xlu0 %5611 }
0x5d3b   :  { %7952 = vmatmul.mubr.msk.bf16.vlgmr.msra.gmra.mxu0 %vm106_vm3, %v5612_v7  ;;  %7958 = vmatmul.mubr.msk.bf16.vlgmr.msra.gmra.mxu1 %vm106_vm3, %v5612_v7 }
0x5d3c   :  { %7962 = vmatpush3.bf16.msra.mxu0 %v8598_v23  ;;  %7968 = vmatpush3.bf16.msra.mxu1 %v8586_v13 }
0x5d3d   :  { %7963 = vmatprep.mubr.msk.bf16.mxu0 %vm8503_vm1, %v8502_v0  ;;  %7973 = vmatprep.subr.bf16.mxu0 %v8502_v0 }
0x5d3e   :  { %7969 = vmatprep.mubr.msk.bf16.mxu1 %vm8503_vm1, %v8502_v0  ;;  %7979 = vmatprep.subr.bf16.mxu1 %v8502_v0 }
0x5d43   :  { %7964 = vmatmul.mubr.msk.bf16.vlgmr.msra.gmra.mxu0 %vm106_vm3, %v5612_v7 }
0x5d44   :  { %7974 = vmatpush3.bf16.msra.mxu0 %v8580_v11  ;;  %7975 = vmatprep.mubr.msk.bf16.mxu0 %vm8503_vm1, %v8502_v0 }
0x5d45   :  { %7985 = vmatprep.subr.bf16.mxu0 %v8502_v0 }
0x5dfb   :  { %v5650_v9 = vpop.f32.mrf.mxu0  ;;  %v5697_v10 = vpop.f32.mrf.mxu1 }
0x5dfc   :  { %v5656_v12 = vadd.f32 %v5650_v9, %v5608_v8  ;;  %5704 = vrot.lane.b32.xlu0 %v5697_v10, %s8509_s11 }
0x5dfd   :  { %v7953_v14 = vpop.f32.mrf.mxu0  ;;  %v7959_v15 = vpop.f32.mrf.mxu1 }
0x5dfe   :  { %v7055_v16 = vmul.f32 -1.442695, %v5656_v12 }
0x5dff   :  { %v5653_v17 = vpop.f32.mrf.mxu0  ;;  %v5700_v19 = vpop.f32.mrf.mxu1 }
0x5e00   :  { %8431 = vpow2.f32 %v7055_v16 }
0x5e01   :  { %v7954_v20 = vpop.f32.mrf.mxu0  ;;  %v7960_v24 = vpop.f32.mrf.mxu1 }
0x5e03   :  { %v5748_v25 = vpop.f32.mrf.mxu0 }
0x5e04   :  { %v5749_v32 = vadd.f32 %v5748_v25, %v8610_v48 }
0x5e05   :  { %v7965_v26 = vpop.f32.mrf.mxu0 }
0x5e07   :  { %v5751_v27 = vpop.f32.mrf.mxu0 }
0x5e09   :  { %v7966_v28 = vpop.f32.mrf.mxu0 }
0x5e0d   :  { %v8432_v29 = vpop.eup %8431 }
0x5e0e   :  { %v5660_v30 = vadd.f32 1.0, %v8432_v29 }
0x5e10   :  { %8433 = vrcp.f32 %v5660_v30 }
0x5e1d   :  { %v8434_v33 = vpop.eup %8433 }
0x5e1e   :  { %v5754_v34 = vmul.f32 %v8434_v33, %v5749_v32  ;;  %v5936_v32 = vld [vmem:[#allocation2 + $0x6] sm:$0x3] }
0x5e20   :  { %5756 = vrot.lane.b32.xlu1 %v5754_v34, %s8508_s1 }
0x5e6e   :  { %v5705_v39 = vpop.permute.xlu0 %5704 }
0x5e6f   :  { %v5707_v40 = vadd.f32 %v5705_v39, %v5608_v8 }
0x5e71   :  { %v7057_v41 = vmul.f32 -1.442695, %v5707_v40 }
0x5e92   :  { %v5757_v35 = vpop.permute.xlu1 %5756 }
0x5e93   :  { %v5759_v36 = vadd.f32 %v5757_v35, %v5608_v8 }
0x5e95   :  { %8435 = vtanh.f32 %v5759_v36 }
0x5e96   :  { %8437 = vpow2.f32 %v7057_v41 }
0x5ea2   :  { %v8436_v37 = vpop.eup %8435 }
0x5ea3   :  { %v5761_v38 = vsub.f32 %v5607_v5, %v8436_v37  ;;  %v8438_v42 = vpop.eup %8437 }
0x5ea4   :  { %v5711_v43 = vadd.f32 1.0, %v8438_v42 }
0x5ea5   :  { %5763 = vrot.lane.b32.xlu1 %v5761_v38, %s8507_s8 }
0x5ea6   :  { %8439 = vrcp.f32 %v5711_v43 }
0x5eb3   :  { %v8440_v44 = vpop.eup %8439 }
0x5f17   :  { %v5764_v45 = vpop.permute.xlu1 %5763 }
0x5f18   :  { %v5766_v46 = vmul.f32 %v8440_v44, %v5764_v45 }
0x5f1a   :  { %5768 = vrot.lane.b32.xlu0 %v5766_v46, %s8509_s11 }
0x5f8c   :  { %v5769_v47 = vpop.permute.xlu0 %5768 }
0x5f8d   :  { %v5771_v49 = vadd.f32 %v8436_v37, %v5769_v47 }
0x5f8f   :  { %v5773_v50 = vpack.c.bf16 %v5771_v49, %v5771_v49 }
0x5f91   :  { %5775 = vrot.lane.b32.xlu1 %v5773_v50, %s8510_s12 }
0x6003   :  { %v5776_v51 = vpop.permute.xlu1 %5775 }
0x6004   :  { %7970 = vmatmul.mubr.msk.bf16.vlgmr.msra.gmra.mxu1 %vm106_vm3, %v5776_v51  ;;  %7976 = vmatmul.mubr.msk.bf16.vlgmr.msra.gmra.mxu0 %vm106_vm3, %v5776_v51 }
0x6005   :  { %7980 = vmatpush3.bf16.msra.mxu1 %v8598_v23  ;;  %7986 = vmatpush3.bf16.msra.mxu0 %v8586_v13 }
0x6006   :  { %7981 = vmatprep.mubr.msk.bf16.mxu1 %vm8503_vm1, %v8502_v0  ;;  %7991 = vmatprep.subr.bf16.mxu1 %v8502_v0 }
0x6007   :  { %7987 = vmatprep.mubr.msk.bf16.mxu0 %vm8503_vm1, %v8502_v0  ;;  %7997 = vmatprep.subr.bf16.mxu0 %v8502_v0 }
0x600c   :  { %7982 = vmatmul.mubr.msk.bf16.vlgmr.msra.gmra.mxu1 %vm106_vm3, %v5776_v51 }
0x600d   :  { %7992 = vmatpush3.bf16.msra.mxu1 %v8580_v11  ;;  %7993 = vmatprep.mubr.msk.bf16.mxu1 %vm8503_vm1, %v8502_v0 }
0x600e   :  { %8003 = vmatprep.subr.bf16.mxu1 %v8502_v0 }
0x60c4   :  { %v5814_v53 = vpop.f32.mrf.mxu1  ;;  %v5861_v54 = vpop.f32.mrf.mxu0 }
0x60c5   :  { %v5820_v55 = vadd.f32 %v5814_v53, %v5772_v52  ;;  %5868 = vrot.lane.b32.xlu1 %v5861_v54, %s8509_s11 }
0x60c6   :  { %v7971_v56 = vpop.f32.mrf.mxu1  ;;  %v7977_v57 = vpop.f32.mrf.mxu0 }
0x60c7   :  { %v7060_v58 = vmul.f32 -1.442695, %v5820_v55 }
0x60c8   :  { %v5817_v59 = vpop.f32.mrf.mxu1  ;;  %v5864_v60 = vpop.f32.mrf.mxu0 }
0x60c9   :  { %8441 = vpow2.f32 %v7060_v58 }
0x60ca   :  { %v7972_v61 = vpop.f32.mrf.mxu1  ;;  %v7978_v62 = vpop.f32.mrf.mxu0 }
0x60cc   :  { %v5912_v63 = vpop.f32.mrf.mxu1 }
0x60cd   :  { %v5913_v6 = vadd.f32 %v5912_v63, %v8610_v48 }
0x60ce   :  { %v7983_v1 = vpop.f32.mrf.mxu1 }
0x60d0   :  { %v5915_v2 = vpop.f32.mrf.mxu1 }
0x60d2   :  { %v7984_v3 = vpop.f32.mrf.mxu1 }
0x60d6   :  { %v8442_v4 = vpop.eup %8441 }
0x60d7   :  { %v5824_v5 = vadd.f32 1.0, %v8442_v4 }
0x60d9   :  { %8443 = vrcp.f32 %v5824_v5 }
0x60e6   :  { %v8444_v7 = vpop.eup %8443 }
0x60e7   :  { %v5918_v8 = vmul.f32 %v8444_v7, %v5913_v6  ;;  %v6100_v6 = vld [vmem:[#allocation2 + $0x8] sm:$0x3] }
0x60e9   :  { %5920 = vrot.lane.b32.xlu0 %v5918_v8, %s8508_s1 }
0x6137   :  { %v5869_v15 = vpop.permute.xlu1 %5868 }
0x6138   :  { %v5871_v16 = vadd.f32 %v5869_v15, %v5772_v52 }
0x613a   :  { %v7062_v17 = vmul.f32 -1.442695, %v5871_v16 }
0x615b   :  { %v5921_v9 = vpop.permute.xlu0 %5920 }
0x615c   :  { %v5923_v10 = vadd.f32 %v5921_v9, %v5772_v52 }
0x615e   :  { %8445 = vtanh.f32 %v5923_v10 }
0x615f   :  { %8447 = vpow2.f32 %v7062_v17 }
0x616b   :  { %v8446_v12 = vpop.eup %8445 }
0x616c   :  { %v5925_v14 = vsub.f32 %v5771_v49, %v8446_v12  ;;  %v8448_v19 = vpop.eup %8447 }
0x616d   :  { %v5875_v20 = vadd.f32 1.0, %v8448_v19 }
0x616e   :  { %5927 = vrot.lane.b32.xlu0 %v5925_v14, %s8507_s8 }
0x616f   :  { %8449 = vrcp.f32 %v5875_v20 }
0x617c   :  { %v8450_v24 = vpop.eup %8449 }
0x61e0   :  { %v5928_v25 = vpop.permute.xlu0 %5927 }
0x61e1   :  { %v5930_v26 = vmul.f32 %v8450_v24, %v5928_v25 }
0x61e3   :  { %5932 = vrot.lane.b32.xlu1 %v5930_v26, %s8509_s11 }
0x6255   :  { %v5933_v27 = vpop.permute.xlu1 %5932 }
0x6256   :  { %v5935_v28 = vadd.f32 %v8446_v12, %v5933_v27 }
0x6258   :  { %v5937_v29 = vpack.c.bf16 %v5935_v28, %v5935_v28 }
0x625a   :  { %5939 = vrot.lane.b32.xlu0 %v5937_v29, %s8510_s12 }
0x62cc   :  { %v5940_v30 = vpop.permute.xlu0 %5939 }
0x62cd   :  { %7988 = vmatmul.mubr.msk.bf16.vlgmr.msra.gmra.mxu0 %vm106_vm3, %v5940_v30  ;;  %7994 = vmatmul.mubr.msk.bf16.vlgmr.msra.gmra.mxu1 %vm106_vm3, %v5940_v30 }
0x62ce   :  { %7998 = vmatpush3.bf16.msra.mxu0 %v8598_v23  ;;  %8004 = vmatpush3.bf16.msra.mxu1 %v8586_v13 }
0x62cf   :  { %7999 = vmatprep.mubr.msk.bf16.mxu0 %vm8503_vm1, %v8502_v0  ;;  %8009 = vmatprep.subr.bf16.mxu0 %v8502_v0 }
0x62d0   :  { %8005 = vmatprep.mubr.msk.bf16.mxu1 %vm8503_vm1, %v8502_v0  ;;  %8015 = vmatprep.subr.bf16.mxu1 %v8502_v0 }
0x62d5   :  { %8000 = vmatmul.mubr.msk.bf16.vlgmr.msra.gmra.mxu0 %vm106_vm3, %v5940_v30 }
0x62d6   :  { %8010 = vmatpush3.bf16.msra.mxu0 %v8580_v11  ;;  %8011 = vmatprep.mubr.msk.bf16.mxu0 %vm8503_vm1, %v8502_v0 }
0x62d7   :  { %8021 = vmatprep.subr.bf16.mxu0 %v8502_v0 }
0x638d   :  { %v5978_v33 = vpop.f32.mrf.mxu0  ;;  %v6025_v34 = vpop.f32.mrf.mxu1 }
0x638e   :  { %v5984_v35 = vadd.f32 %v5978_v33, %v5936_v32  ;;  %6032 = vrot.lane.b32.xlu0 %v6025_v34, %s8509_s11 }
0x638f   :  { %v7989_v36 = vpop.f32.mrf.mxu0  ;;  %v7995_v37 = vpop.f32.mrf.mxu1 }
0x6390   :  { %v7065_v38 = vmul.f32 -1.442695, %v5984_v35 }
0x6391   :  { %v5981_v39 = vpop.f32.mrf.mxu0  ;;  %v6028_v40 = vpop.f32.mrf.mxu1 }
0x6392   :  { %8451 = vpow2.f32 %v7065_v38 }
0x6393   :  { %v7990_v41 = vpop.f32.mrf.mxu0  ;;  %v7996_v42 = vpop.f32.mrf.mxu1 }
0x6395   :  { %v6076_v43 = vpop.f32.mrf.mxu0 }
0x6396   :  { %v6077_v50 = vadd.f32 %v6076_v43, %v8610_v48 }
0x6397   :  { %v8001_v44 = vpop.f32.mrf.mxu0 }
0x6399   :  { %v6079_v45 = vpop.f32.mrf.mxu0 }
0x639b   :  { %v8002_v46 = vpop.f32.mrf.mxu0 }
0x639f   :  { %v8452_v47 = vpop.eup %8451 }
0x63a0   :  { %v5988_v49 = vadd.f32 1.0, %v8452_v47 }
0x63a2   :  { %8453 = vrcp.f32 %v5988_v49 }
0x63af   :  { %v8454_v51 = vpop.eup %8453 }
0x63b0   :  { %v6082_v52 = vmul.f32 %v8454_v51, %v6077_v50  ;;  %v6264_v50 = vld [vmem:[#allocation2 + $0xa] sm:$0x3] }
0x63b2   :  { %6084 = vrot.lane.b32.xlu1 %v6082_v52, %s8508_s1 }
0x6400   :  { %v6033_v57 = vpop.permute.xlu0 %6032 }
0x6401   :  { %v6035_v58 = vadd.f32 %v6033_v57, %v5936_v32 }
0x6403   :  { %v7067_v59 = vmul.f32 -1.442695, %v6035_v58 }
0x6424   :  { %v6085_v53 = vpop.permute.xlu1 %6084 }
0x6425   :  { %v6087_v54 = vadd.f32 %v6085_v53, %v5936_v32 }
0x6427   :  { %8455 = vtanh.f32 %v6087_v54 }
0x6428   :  { %8457 = vpow2.f32 %v7067_v59 }
0x6434   :  { %v8456_v55 = vpop.eup %8455 }
0x6435   :  { %v6089_v56 = vsub.f32 %v5935_v28, %v8456_v55  ;;  %v8458_v60 = vpop.eup %8457 }
0x6436   :  { %v6039_v61 = vadd.f32 1.0, %v8458_v60 }
0x6437   :  { %6091 = vrot.lane.b32.xlu1 %v6089_v56, %s8507_s8 }
0x6438   :  { %8459 = vrcp.f32 %v6039_v61 }
0x6445   :  { %v8460_v62 = vpop.eup %8459 }
0x64a9   :  { %v6092_v63 = vpop.permute.xlu1 %6091 }
0x64aa   :  { %v6094_v1 = vmul.f32 %v8460_v62, %v6092_v63 }
0x64ac   :  { %6096 = vrot.lane.b32.xlu0 %v6094_v1, %s8509_s11 }
0x651e   :  { %v6097_v2 = vpop.permute.xlu0 %6096 }
0x651f   :  { %v6099_v3 = vadd.f32 %v8456_v55, %v6097_v2 }
0x6521   :  { %v6101_v4 = vpack.c.bf16 %v6099_v3, %v6099_v3 }
0x6523   :  { %6103 = vrot.lane.b32.xlu1 %v6101_v4, %s8510_s12 }
0x6595   :  { %v6104_v5 = vpop.permute.xlu1 %6103 }
0x6596   :  { %8006 = vmatmul.mubr.msk.bf16.vlgmr.msra.gmra.mxu1 %vm106_vm3, %v6104_v5  ;;  %8012 = vmatmul.mubr.msk.bf16.vlgmr.msra.gmra.mxu0 %vm106_vm3, %v6104_v5 }
0x6597   :  { %8016 = vmatpush3.bf16.msra.mxu1 %v8598_v23  ;;  %8022 = vmatpush3.bf16.msra.mxu0 %v8586_v13 }
0x6598   :  { %8017 = vmatprep.mubr.msk.bf16.mxu1 %vm8503_vm1, %v8502_v0  ;;  %8027 = vmatprep.subr.bf16.mxu1 %v8502_v0 }
0x6599   :  { %8023 = vmatprep.mubr.msk.bf16.mxu0 %vm8503_vm1, %v8502_v0  ;;  %8033 = vmatprep.subr.bf16.mxu0 %v8502_v0 }
0x659e   :  { %8018 = vmatmul.mubr.msk.bf16.vlgmr.msra.gmra.mxu1 %vm106_vm3, %v6104_v5 }
0x659f   :  { %8028 = vmatpush3.bf16.msra.mxu1 %v8580_v11  ;;  %8029 = vmatprep.mubr.msk.bf16.mxu1 %vm8503_vm1, %v8502_v0 }
0x65a0   :  { %8039 = vmatprep.subr.bf16.mxu1 %v8502_v0 }
0x6656   :  { %v6142_v7 = vpop.f32.mrf.mxu1  ;;  %v6189_v8 = vpop.f32.mrf.mxu0 }
0x6657   :  { %v6148_v9 = vadd.f32 %v6142_v7, %v6100_v6  ;;  %6196 = vrot.lane.b32.xlu1 %v6189_v8, %s8509_s11 }
0x6658   :  { %v8007_v10 = vpop.f32.mrf.mxu1  ;;  %v8013_v12 = vpop.f32.mrf.mxu0 }
0x6659   :  { %v7070_v14 = vmul.f32 -1.442695, %v6148_v9 }
0x665a   :  { %v6145_v15 = vpop.f32.mrf.mxu1  ;;  %v6192_v16 = vpop.f32.mrf.mxu0 }
0x665b   :  { %8461 = vpow2.f32 %v7070_v14 }
0x665c   :  { %v8008_v17 = vpop.f32.mrf.mxu1  ;;  %v8014_v19 = vpop.f32.mrf.mxu0 }
0x665e   :  { %v6240_v20 = vpop.f32.mrf.mxu1 }
0x665f   :  { %v6241_v29 = vadd.f32 %v6240_v20, %v8610_v48 }
0x6660   :  { %v8019_v24 = vpop.f32.mrf.mxu1 }
0x6662   :  { %v6243_v25 = vpop.f32.mrf.mxu1 }
0x6664   :  { %v8020_v26 = vpop.f32.mrf.mxu1 }
0x6668   :  { %v8462_v27 = vpop.eup %8461 }
0x6669   :  { %v6152_v28 = vadd.f32 1.0, %v8462_v27 }
0x666b   :  { %8463 = vrcp.f32 %v6152_v28 }
0x6678   :  { %v8464_v30 = vpop.eup %8463 }
0x6679   :  { %v6246_v32 = vmul.f32 %v8464_v30, %v6241_v29 }
0x667b   :  { %6248 = vrot.lane.b32.xlu0 %v6246_v32, %s8508_s1 }
0x66c9   :  { %v6197_v37 = vpop.permute.xlu1 %6196 }
0x66ca   :  { %v6199_v38 = vadd.f32 %v6197_v37, %v6100_v6 }
0x66cc   :  { %v7072_v39 = vmul.f32 -1.442695, %v6199_v38 }
0x66ed   :  { %v6249_v33 = vpop.permute.xlu0 %6248 }
0x66ee   :  { %v6251_v34 = vadd.f32 %v6249_v33, %v6100_v6 }
0x66f0   :  { %8465 = vtanh.f32 %v6251_v34 }
0x66f1   :  { %8467 = vpow2.f32 %v7072_v39 }
0x66fd   :  { %v8466_v35 = vpop.eup %8465 }
0x66fe   :  { %v6253_v36 = vsub.f32 %v6099_v3, %v8466_v35  ;;  %v8468_v40 = vpop.eup %8467 }
0x66ff   :  { %v6203_v41 = vadd.f32 1.0, %v8468_v40 }
0x6700   :  { %6255 = vrot.lane.b32.xlu0 %v6253_v36, %s8507_s8 }
0x6701   :  { %8469 = vrcp.f32 %v6203_v41 }
0x670e   :  { %v8470_v42 = vpop.eup %8469 }
0x6772   :  { %v6256_v43 = vpop.permute.xlu0 %6255 }
0x6773   :  { %v6258_v44 = vmul.f32 %v8470_v42, %v6256_v43 }
0x6775   :  { %6260 = vrot.lane.b32.xlu1 %v6258_v44, %s8509_s11 }
0x67e7   :  { %v6261_v45 = vpop.permute.xlu1 %6260 }
0x67e8   :  { %v6263_v46 = vadd.f32 %v8466_v35, %v6261_v45 }
0x67ea   :  { %v6265_v47 = vpack.c.bf16 %v6263_v46, %v6263_v46 }
0x67ec   :  { %6267 = vrot.lane.b32.xlu0 %v6265_v47, %s8510_s12 }
0x685e   :  { %v6268_v49 = vpop.permute.xlu0 %6267 }
0x685f   :  { %8024 = vmatmul.mubr.msk.bf16.vlgmr.msra.gmra.mxu0 %vm106_vm3, %v6268_v49  ;;  %8030 = vmatmul.mubr.msk.bf16.vlgmr.msra.gmra.mxu1 %vm106_vm3, %v6268_v49 }
0x6860   :  { %8034 = vmatpush3.bf16.msra.mxu0 %v8598_v23  ;;  %8040 = vmatpush3.bf16.msra.mxu1 %v8586_v13 }
0x6861   :  { %8035 = vmatprep.mubr.msk.bf16.mxu0 %vm8503_vm1, %v8502_v0  ;;  %8045 = vmatprep.subr.bf16.mxu0 %v8502_v0 }
0x6862   :  { %8041 = vmatprep.mubr.msk.bf16.mxu1 %vm8503_vm1, %v8502_v0  ;;  %8051 = vmatprep.subr.bf16.mxu1 %v8502_v0 }
0x6867   :  { %8036 = vmatmul.mubr.msk.bf16.vlgmr.msra.gmra.mxu0 %vm106_vm3, %v6268_v49 }
0x6868   :  { %8046 = vmatpush3.bf16.msra.mxu0 %v8580_v11  ;;  %8047 = vmatprep.mubr.msk.bf16.mxu0 %vm8503_vm1, %v8502_v0 }
0x6869   :  { %8057 = vmatprep.subr.bf16.mxu0 %v8502_v0 }
0x691f   :  { %v6306_v51 = vpop.f32.mrf.mxu0  ;;  %v6353_v52 = vpop.f32.mrf.mxu1 }
0x6920   :  { %v6312_v53 = vadd.f32 %v6306_v51, %v6264_v50  ;;  %6360 = vrot.lane.b32.xlu0 %v6353_v52, %s8509_s11 }
0x6921   :  { %v8025_v54 = vpop.f32.mrf.mxu0  ;;  %v8031_v55 = vpop.f32.mrf.mxu1 }
0x6922   :  { %v7075_v56 = vmul.f32 -1.442695, %v6312_v53 }
0x6923   :  { %v6309_v57 = vpop.f32.mrf.mxu0  ;;  %v6356_v58 = vpop.f32.mrf.mxu1 }
0x6924   :  { %8471 = vpow2.f32 %v7075_v56 }
0x6925   :  { %v8026_v59 = vpop.f32.mrf.mxu0  ;;  %v8032_v60 = vpop.f32.mrf.mxu1 }
0x6927   :  { %v6404_v61 = vpop.f32.mrf.mxu0 }
0x6928   :  { %v6405_v4 = vadd.f32 %v6404_v61, %v8610_v48 }
0x6929   :  { %v8037_v62 = vpop.f32.mrf.mxu0 }
0x692b   :  { %v6407_v63 = vpop.f32.mrf.mxu0 }
0x692d   :  { %v8038_v1 = vpop.f32.mrf.mxu0 }
0x6931   :  { %v8472_v2 = vpop.eup %8471 }
0x6932   :  { %v6316_v3 = vadd.f32 1.0, %v8472_v2  ;;  %v6592_v2 = vld [vmem:[#allocation2 + $0xe] sm:$0x3] }
0x6934   :  { %8473 = vrcp.f32 %v6316_v3 }
0x6941   :  { %v8474_v5 = vpop.eup %8473 }
0x6942   :  { %v6410_v6 = vmul.f32 %v8474_v5, %v6405_v4 }
0x6944   :  { %6412 = vrot.lane.b32.xlu1 %v6410_v6, %s8508_s1 }
0x6992   :  { %v6361_v12 = vpop.permute.xlu0 %6360 }
0x6993   :  { %v6363_v14 = vadd.f32 %v6361_v12, %v6264_v50 }
0x6995   :  { %v7077_v15 = vmul.f32 -1.442695, %v6363_v14 }
0x69b6   :  { %v6413_v7 = vpop.permute.xlu1 %6412 }
0x69b7   :  { %v6415_v8 = vadd.f32 %v6413_v7, %v6264_v50 }
0x69b9   :  { %8475 = vtanh.f32 %v6415_v8 }
0x69ba   :  { %8477 = vpow2.f32 %v7077_v15 }
0x69c6   :  { %v8476_v9 = vpop.eup %8475 }
0x69c7   :  { %v6417_v10 = vsub.f32 %v6263_v46, %v8476_v9  ;;  %v8478_v16 = vpop.eup %8477 }
0x69c8   :  { %v6367_v17 = vadd.f32 1.0, %v8478_v16 }
0x69c9   :  { %6419 = vrot.lane.b32.xlu1 %v6417_v10, %s8507_s8 }
0x69ca   :  { %8479 = vrcp.f32 %v6367_v17 }
0x69d7   :  { %v8480_v19 = vpop.eup %8479 }
0x6a3b   :  { %v6420_v20 = vpop.permute.xlu1 %6419 }
0x6a3c   :  { %v6422_v24 = vmul.f32 %v8480_v19, %v6420_v20 }
0x6a3e   :  { %6424 = vrot.lane.b32.xlu0 %v6422_v24, %s8509_s11 }
0x6ab0   :  { %v6425_v25 = vpop.permute.xlu0 %6424 }
0x6ab1   :  { %v6427_v26 = vadd.f32 %v8476_v9, %v6425_v25 }
0x6ab3   :  { %v6429_v27 = vpack.c.bf16 %v6427_v26, %v6427_v26 }
0x6ab5   :  { %6431 = vrot.lane.b32.xlu1 %v6429_v27, %s8510_s12 }
0x6b27   :  { %v6432_v28 = vpop.permute.xlu1 %6431 }
0x6b28   :  { %8042 = vmatmul.mubr.msk.bf16.vlgmr.msra.gmra.mxu1 %vm106_vm3, %v6432_v28  ;;  %8048 = vmatmul.mubr.msk.bf16.vlgmr.msra.gmra.mxu0 %vm106_vm3, %v6432_v28 }
0x6b29   :  { %8052 = vmatpush3.bf16.msra.mxu1 %v8598_v23  ;;  %8058 = vmatpush3.bf16.msra.mxu0 %v8586_v13  ;;  %v6428_v13 = vld [vmem:[#allocation2 + $0xc] sm:$0x3] }
0x6b2a   :  { %8053 = vmatprep.mubr.msk.bf16.mxu1 %vm8503_vm1, %v8502_v0  ;;  %8063 = vmatprep.subr.bf16.mxu1 %v8502_v0 }
0x6b2b   :  { %8059 = vmatprep.mubr.msk.bf16.mxu0 %vm8503_vm1, %v8502_v0  ;;  %8069 = vmatprep.subr.bf16.mxu0 %v8502_v0 }
0x6b30   :  { %8054 = vmatmul.mubr.msk.bf16.vlgmr.msra.gmra.mxu1 %vm106_vm3, %v6432_v28 }
0x6b31   :  { %8064 = vmatpush3.bf16.msra.mxu1 %v8580_v11  ;;  %8065 = vmatprep.mubr.msk.bf16.mxu1 %vm8503_vm1, %v8502_v0 }
0x6b32   :  { %8075 = vmatprep.subr.bf16.mxu1 %v8502_v0 }
0x6be8   :  { %v6470_v29 = vpop.f32.mrf.mxu1  ;;  %v6517_v30 = vpop.f32.mrf.mxu0 }
0x6be9   :  { %v6476_v32 = vadd.f32 %v6470_v29, %v6428_v13  ;;  %6524 = vrot.lane.b32.xlu1 %v6517_v30, %s8509_s11 }
0x6bea   :  { %v8043_v33 = vpop.f32.mrf.mxu1  ;;  %v8049_v34 = vpop.f32.mrf.mxu0 }
0x6beb   :  { %v7080_v35 = vmul.f32 -1.442695, %v6476_v32 }
0x6bec   :  { %v6473_v36 = vpop.f32.mrf.mxu1  ;;  %v6520_v37 = vpop.f32.mrf.mxu0 }
0x6bed   :  { %8481 = vpow2.f32 %v7080_v35 }
0x6bee   :  { %v8044_v38 = vpop.f32.mrf.mxu1  ;;  %v8050_v39 = vpop.f32.mrf.mxu0 }
0x6bf0   :  { %v6568_v11 = vpop.f32.mrf.mxu1 }
0x6bf1   :  { %v6569_v45 = vadd.f32 %v6568_v11, %v8610_v48 }
0x6bf2   :  { %v8055_v40 = vpop.f32.mrf.mxu1 }
0x6bf4   :  { %v6571_v41 = vpop.f32.mrf.mxu1 }
0x6bf6   :  { %v8056_v42 = vpop.f32.mrf.mxu1 }
0x6bfa   :  { %v8482_v43 = vpop.eup %8481 }
0x6bfb   :  { %v6480_v44 = vadd.f32 1.0, %v8482_v43 }
0x6bfd   :  { %8483 = vrcp.f32 %v6480_v44 }
0x6c0a   :  { %v8484_v46 = vpop.eup %8483 }
0x6c0b   :  { %v6574_v47 = vmul.f32 %v8484_v46, %v6569_v45 }
0x6c0d   :  { %6576 = vrot.lane.b32.xlu0 %v6574_v47, %s8508_s1 }
0x6c5b   :  { %v6525_v53 = vpop.permute.xlu1 %6524 }
0x6c5c   :  { %v6527_v54 = vadd.f32 %v6525_v53, %v6428_v13 }
0x6c5e   :  { %v7082_v55 = vmul.f32 -1.442695, %v6527_v54 }
0x6c7f   :  { %v6577_v49 = vpop.permute.xlu0 %6576 }
0x6c80   :  { %v6579_v50 = vadd.f32 %v6577_v49, %v6428_v13 }
0x6c82   :  { %8485 = vtanh.f32 %v6579_v50 }
0x6c83   :  { %8487 = vpow2.f32 %v7082_v55 }
0x6c8f   :  { %v8486_v51 = vpop.eup %8485 }
0x6c90   :  { %v6581_v52 = vsub.f32 %v6427_v26, %v8486_v51  ;;  %v8488_v56 = vpop.eup %8487 }
0x6c91   :  { %v6531_v57 = vadd.f32 1.0, %v8488_v56 }
0x6c92   :  { %6583 = vrot.lane.b32.xlu0 %v6581_v52, %s8507_s8 }
0x6c93   :  { %8489 = vrcp.f32 %v6531_v57 }
0x6ca0   :  { %v8490_v58 = vpop.eup %8489 }
0x6d04   :  { %v6584_v59 = vpop.permute.xlu0 %6583 }
0x6d05   :  { %v6586_v60 = vmul.f32 %v8490_v58, %v6584_v59 }
0x6d07   :  { %6588 = vrot.lane.b32.xlu1 %v6586_v60, %s8509_s11 }
0x6d79   :  { %v6589_v61 = vpop.permute.xlu1 %6588 }
0x6d7a   :  { %v6591_v62 = vadd.f32 %v8486_v51, %v6589_v61 }
0x6d7c   :  { %v6593_v63 = vpack.c.bf16 %v6591_v62, %v6591_v62 }
0x6d7e   :  { %6595 = vrot.lane.b32.xlu0 %v6593_v63, %s8510_s12 }
0x6df0   :  { %v6596_v1 = vpop.permute.xlu0 %6595 }
0x6df1   :  { %8060 = vmatmul.mubr.msk.bf16.vlgmr.msra.gmra.mxu0 %vm106_vm3, %v6596_v1  ;;  %8066 = vmatmul.mubr.msk.bf16.vlgmr.msra.gmra.mxu1 %vm106_vm3, %v6596_v1 }
0x6df2   :  { %8070 = vmatpush3.bf16.msra.mxu0 %v8598_v23  ;;  %8071 = vmatprep.mubr.msk.bf16.mxu0 %vm8503_vm1, %v8502_v0 }
0x6df3   :  { %8077 = vmatprep.mubr.msk.bf16.mxu1 %vm8503_vm1, %v8502_v0  ;;  %8081 = vmatprep.subr.bf16.mxu0 %v8502_v0 }
0x6df9   :  { %8072 = vmatmul.mubr.msk.bf16.vlgmr.msra.gmra.mxu0 %vm106_vm3, %v6596_v1 }
0x6dfa   :  { %8083 = vmatprep.mubr.msk.bf16.mxu0 %vm8503_vm1, %v8502_v0 }
0x6eb1   :  { %v6634_v3 = vpop.f32.mrf.mxu0  ;;  %v6681_v4 = vpop.f32.mrf.mxu1 }
0x6eb2   :  { %v6640_v5 = vadd.f32 %v6634_v3, %v6592_v2  ;;  %6688 = vrot.lane.b32.xlu0 %v6681_v4, %s8509_s11 }
0x6eb3   :  { %v8061_v23 = vpop.f32.mrf.mxu0  ;;  %v8067_v6 = vpop.f32.mrf.mxu1 }
0x6eb4   :  { %v7085_v7 = vmul.f32 -1.442695, %v6640_v5 }
0x6eb5   :  { %v6637_v8 = vpop.f32.mrf.mxu0  ;;  %v6684_v9 = vpop.f32.mrf.mxu1 }
0x6eb6   :  { %8491 = vpow2.f32 %v7085_v7 }
0x6eb7   :  { %v8062_v10 = vpop.f32.mrf.mxu0  ;;  %v8068_v12 = vpop.f32.mrf.mxu1 }
0x6eb9   :  { %v6732_v14 = vpop.f32.mrf.mxu0 }
0x6eba   :  { %v6733_v20 = vadd.f32 %v6732_v14, %v8610_v48 }
0x6ebb   :  { %v8073_v15 = vpop.f32.mrf.mxu0 }
0x6ebd   :  { %v6735_v16 = vpop.f32.mrf.mxu0 }
0x6ebf   :  { %v8074_v17 = vpop.f32.mrf.mxu0 }
0x6ec3   :  { %v8492_v19 = vpop.eup %8491 }
0x6ec4   :  { %v6644_v0 = vadd.f32 1.0, %v8492_v19 }
0x6ec6   :  { %8493 = vrcp.f32 %v6644_v0 }
0x6ed3   :  { %v8494_v24 = vpop.eup %8493 }
0x6ed4   :  { %v6738_v25 = vmul.f32 %v8494_v24, %v6733_v20 }
0x6ed6   :  { %6740 = vrot.lane.b32.xlu1 %v6738_v25, %s8508_s1 }
0x6f24   :  { %v6689_v29 = vpop.permute.xlu0 %6688 }
0x6f25   :  { %v6691_v30 = vadd.f32 %v6689_v29, %v6592_v2 }
0x6f27   :  { %v7087_v48 = vmul.f32 -1.442695, %v6691_v30 }
0x6f48   :  { %v6741_v26 = vpop.permute.xlu1 %6740 }
0x6f49   :  { %v6743_v27 = vadd.f32 %v6741_v26, %v6592_v2 }
0x6f4b   :  { %8495 = vtanh.f32 %v6743_v27 }
0x6f4c   :  { %8497 = vpow2.f32 %v7087_v48 }
0x6f58   :  { %v8496_v28 = vpop.eup %8495 }
0x6f59   :  { %v6745_v13 = vsub.f32 %v6591_v62, %v8496_v28  ;;  %v8498_v32 = vpop.eup %8497 }
0x6f5a   :  { %v6695_v33 = vadd.f32 1.0, %v8498_v32 }
0x6f5b   :  { %6747 = vrot.lane.b32.xlu1 %v6745_v13, %s8507_s8 }
0x6f5c   :  { %8499 = vrcp.f32 %v6695_v33 }
0x6f5f   :  { %1488 = vrot.lane.b32.xlu1 %v8766_v21, %s8510_s12 }
0x6f63   :  { %4123 = vrot.lane.b32.xlu1 %v9112_v22, %s8510_s12  ;;  %v8100_v22 = vld [vmem:[%s9488_s3] sm:$0xff]  }
0x6f69   :  { %v8500_v34 = vpop.eup %8499 }
0x6fcd   :  { %v6748_v35 = vpop.permute.xlu1 %6747 }
0x6fce   :  { %v6750_v36 = vmul.f32 %v8500_v34, %v6748_v35 }
0x6fd0   :  { %6752 = vrot.lane.b32.xlu0 %v6750_v36, %s8509_s11 }
0x6fd1   :  { %v1489_v37 = vpop.permute.xlu1 %1488 }
0x6fd2   :  { %1492 = vst.msk [vmem:[#allocation3] sm:$0x3] %vm1491_vm5, %v1489_v37 }
0x6fd4   :  { %2806 = vrot.lane.b32.xlu0 %v8939_v18, %s8510_s12  ;;  %v8501_v18 = vld [vmem:[%s9489_s4] ss:$0 sm:$0xff] }
0x6fd5   :  { %v4124_v21 = vpop.permute.xlu1 %4123 }
0x6fd6   :  { %4126 = vst.msk [vmem:[#allocation3 + $0x4] sm:$0x3] %vm1491_vm5, %v4124_v21 }
0x6fd8   :  { %5440 = vrot.lane.b32.xlu0 %v9285_v31, %s8510_s12 }
0x6fdc   :  { %6771 = vrot.lane.b32.xlu0 %v8100_v22, %s8508_s1 }
0x6fe0   :  { %6824 = vrot.lane.b32.xlu0 %v8100_v22, %s8509_s11 }
0x7042   :  { %v6753_v38 = vpop.permute.xlu0 %6752 }
0x7043   :  { %v6755_v39 = vadd.f32 %v8496_v28, %v6753_v38 }
0x7045   :  { %6757 = vrot.lane.b32.xlu1 %v6755_v39, %s8510_s12 }
0x7046   :  { %v2807_v11 = vpop.permute.xlu0 %2806 }
0x7047   :  { %2809 = vst.msk [vmem:[#allocation3 + $0x2] sm:$0x3] %vm1491_vm5, %v2807_v11 }
0x7049   :  { %6774 = vrot.lane.b32.xlu1 %v8501_v18, %s8506_s29 }
0x704a   :  { %v5441_v31 = vpop.permute.xlu0 %5440 }
0x704b   :  { %5443 = vst.msk [vmem:[#allocation3 + $0x6] sm:$0x3] %vm1491_vm5, %v5441_v31 }
0x704d   :  { %6827 = vrot.lane.b32.xlu1 %v8501_v18, %s8508_s1 }
0x704e   :  { %v6772_v40 = vpop.permute.xlu0 %6771 }
0x704f   :  { %8076 = vmatpush3.bf16.msra.mxu1 %v6772_v40 }
0x7052   :  { %v6761_v42 = vld [vmem:[#allocation3] sm:$0xff]  ;;  %v6825_v45 = vpop.permute.xlu0 %6824 }
0x7053   :  { %8082 = vmatpush3.bf16.msra.mxu0 %v6825_v45 }
0x70b7   :  { %v6758_v41 = vpop.permute.xlu1 %6757 }
0x70b8   :  { %6760 = vst.msk [vmem:[#allocation3 + $0x8] sm:$0x3] %vm1491_vm5, %v6758_v41 }
0x70bb   :  { %v6775_v47 = vpop.permute.xlu1 %6774 }
0x70bf   :  { %v6762_v43 = vld [vmem:[#allocation3 + $0x8] sm:$0x3]  ;;  %v6828_v57 = vpop.permute.xlu1 %6827 }
0x70c0   :  { %v6765_v44 = vpack.c.bf16 %v6762_v43, %v6761_v42 }
0x70c2   :  { %8078 = vmatmul.mubr.msk.bf16.vlgmr.msra.gmra.mxu1 %vm106_vm3, %v6765_v44 }
0x7182   :  { %v6814_v46 = vpop.f32.mrf.mxu1 }
0x7183   :  { %v6815_v50 = vadd.f32 %v6814_v46, %v6775_v47 }
0x7184   :  { %v8079_v49 = vpop.f32.mrf.mxu1 }
0x7185   :  { %v6821_v54 = vmax.f32 %v6815_v50, 0.0 }
0x7186   :  { %v6817_v51 = vpop.f32.mrf.mxu1 }
0x7187   :  { %v6818_v52 = vadd.f32 %v6817_v51, %v6775_v47 }
0x7188   :  { %v8080_v53 = vpop.f32.mrf.mxu1 }
0x7189   :  { %v6822_v55 = vmax.f32 %v6818_v52, 0.0 }
0x718b   :  { %v6823_v56 = vpack.c.bf16 %v6822_v55, %v6821_v54 }
0x718d   :  { %8084 = vmatmul.mubr.msk.bf16.vlgmr.msra.gmra.mxu0 %vm106_vm3, %v6823_v56 }
0x724d   :  { %v6867_v58 = vpop.f32.mrf.mxu0 }
0x724e   :  { %v6868_v59 = vadd.f32 %v6867_v58, %v6828_v57 }
0x724f   :  { %v8085_v60 = vpop.f32.mrf.mxu0 }
0x7250   :  { %6875 = vst.msk [vmem:[%s9491_s5] sm:$0xff] %vm6874_vm6, %v6868_v59 }
0x7251   :  { %v6870_v61 = vpop.f32.mrf.mxu0 }
0x7252   :  { %v6871_v62 = vadd.f32 %v6870_v61, %v6828_v57 }
0x7253   :  { %v8086_v63 = vpop.f32.mrf.mxu0 }
0x7254   :  { %6877 = vst.msk [vmem:[%s9491_s5 + $0x8] sm:$0x3] %vm6876_vm7, %v6871_v62 }

</bundles_post_ra>
